<compile_context>
chip_gen: v6e
topology: v6e:2x2x1
jax: 0.10.0
libtpu: 0.0.40
codegen_flags: <defaults>
</compile_context>

<pallas_src>
import functools

import jax
import jax.numpy as jnp
import numpy as np
from jax import lax
from jax.experimental import pallas as pl
from jax.experimental.pallas import tpu as pltpu

# ----------------------------- configuration --------------------------------
IN_CH = 34                 # fixed by the module (Conv2d(34, ...), Linear(34, ...))
IMG = 11                   # 11x11 -> conv(5,s3) -> 3x3 -> conv(3,s1) -> 1x1
CNN_CH = 32                # cnn_channels (small for the example)
HIDDEN = 64                # hidden_size
H2 = HIDDEN // 2
ACTION_NVEC = (7, 5)       # synthetic env.single_action_space.nvec
SUM_N = sum(ACTION_NVEC)
P = 9                      # 3x3 conv1 output positions == conv2 receptive field

K_OBS = IN_CH * IMG * IMG  # 4114 = flattened (ci, y, x) observation row
NCOL = H2 + P * CNN_CH     # 320  = [self(32) | pos0(32) | ... | pos8(32)]

HEAD_W = SUM_N + 1         # real head outputs: all logits + value = 13
HEAD_PAD = HIDDEN          # pad head block so hidden(64) + head(64) = 128 lanes
OUT_W = HIDDEN + HEAD_PAD  # 128 -> one full-width (un-masked) output slab


def _round_up(x, m):
    return (x + m - 1) // m * m


K_PAD = _round_up(K_OBS, 128)   # 4224 = 33 * 128


# ------------------------------- Pallas kernel -------------------------------
def policy_kernel(obs_ref,                 # (TB, K_PAD) bf16 flattened obs row
                  w1s_ref, b1s_ref,        # fused conv1(9 pos)+self scatter: (K_PAD, NCOL), (1, NCOL)
                  w2_ref, b2_ref,          # conv2 as one contraction: (NCOL, C), (1, C)
                  w3_ref, b3_ref,          # post-flatten linear: (C, H2), (1, H2)
                  wh_ref, bh_ref,          # fused actor+value head: (H, HEAD_PAD), (1, HEAD_PAD)
                  out_ref):                # packed (TB, 128): [hidden | logits | value | 0]
    # --- conv1 (all 9 positions) + self-encoder: ONE scatter-weight matmul ---
    act = jnp.dot(obs_ref[...], w1s_ref[...], preferred_element_type=jnp.float32)
    act = jnp.maximum(act + b1s_ref[...], 0.0)            # (TB, NCOL) f32
    act_bf = act.astype(jnp.bfloat16)                     # MXU operand only

    # --- conv2 (1x1 output): single contraction over (position, channel).
    # The first H2 rows of w2 are zero, so the self columns drop out and no
    # unaligned lane slice of `act_bf` is needed.
    h2 = jnp.dot(act_bf, w2_ref[...], preferred_element_type=jnp.float32)
    h2 = jnp.maximum(h2 + b2_ref[...], 0.0)               # (TB, C) f32

    # --- Flatten (spatial is 1x1) -> Linear(C, H2) + ReLU ---
    cnn = jnp.dot(h2.astype(jnp.bfloat16), w3_ref[...],
                  preferred_element_type=jnp.float32)
    cnn = jnp.maximum(cnn + b3_ref[...], 0.0)             # (TB, H2) f32

    # hidden = [self_features | cnn_features]  (self was already ReLU'd in act)
    hidden = jnp.concatenate([act[:, :H2], cnn], axis=1)  # (TB, HIDDEN) f32

    # --- fused actor heads + value head (output lane-padded to HEAD_PAD) ---
    head = jnp.dot(hidden.astype(jnp.bfloat16), wh_ref[...],
                   preferred_element_type=jnp.float32) + bh_ref[...]

    # single 128-lane-wide slab -> un-masked full vst / lane-dense output DMA
    out_ref[...] = jnp.concatenate([hidden, head], axis=1)


# ------------------------------- wrapper -------------------------------------
def init_params(key):
    """Deterministic synthetic parameters, PyTorch-convention shapes."""
    ks = jax.random.split(key, 7)
    s = 0.05
    params = {
        "w_conv1": jax.random.normal(ks[0], (CNN_CH, IN_CH, 5, 5), jnp.float32) * s,
        "b_conv1": jnp.zeros((CNN_CH,), jnp.float32),
        "w_conv2": jax.random.normal(ks[1], (CNN_CH, CNN_CH, 3, 3), jnp.float32) * s,
        "b_conv2": jnp.zeros((CNN_CH,), jnp.float32),
        "w_fc":    jax.random.normal(ks[2], (H2, CNN_CH), jnp.float32) * s,
        "b_fc":    jnp.zeros((H2,), jnp.float32),
        "w_self":  jax.random.normal(ks[3], (H2, IN_CH), jnp.float32) * s,
        "b_self":  jnp.zeros((H2,), jnp.float32),
        "w_actor": [jax.random.normal(k, (n, HIDDEN), jnp.float32) * 0.01
                    for k, n in zip(jax.random.split(ks[4], len(ACTION_NVEC)),
                                    ACTION_NVEC)],
        "b_actor": [jnp.zeros((n,), jnp.float32) for n in ACTION_NVEC],
        "w_value": jax.random.normal(ks[5], (1, HIDDEN), jnp.float32) * s,
        "b_value": jnp.zeros((1,), jnp.float32),
    }
    return params


@functools.partial(jax.jit, static_argnames=("block_b",))
def policy_forward(observations, params, block_b=512):
    """Mirrors Policy.forward: returns ((logits_list, value), hidden)."""
    obs = observations.astype(jnp.float32)                 # (B, 34, 11, 11) NCHW
    B = obs.shape[0]

    # Batch tile: multiple of 16 (bf16 sublane packing).  Keep >= 2 grid steps
    # whenever the batch allows so the "parallel" axis shards across v7x's two
    # TensorCores; default tile 512 keeps per-step overhead <~5% of the DMA.
    TB = _round_up(min(block_b, max(16, _round_up(B, 16) // 2)), 16)
    B_pad = _round_up(B, TB)

    # --- single lane-dense bf16 obs slab, (ci, y, x) flattening, 4224 lanes ---
    slab = obs.reshape(B, K_OBS).astype(jnp.bfloat16)
    slab = jnp.pad(slab, ((0, B_pad - B), (0, K_PAD - K_OBS)))   # pad rows are 0

    # --- scatter-weight for fused conv1 (9 positions) + self-encoder ----------
    # column layout: [ self(32) | (oy,ox)=(0,0) | (0,1) | ... | (2,2) ]
    w1_t = jnp.transpose(params["w_conv1"], (1, 2, 3, 0))        # (ci, kh, kw, co)
    ws_t = params["w_self"].T.reshape(IN_CH, 1, 1, H2)           # center pixel (5,5)
    blocks = [jnp.pad(ws_t, ((0, 0), (5, 5), (5, 5), (0, 0))).reshape(K_OBS, H2)]
    for oy in range(3):
        for ox in range(3):
            blocks.append(jnp.pad(
                w1_t, ((0, 0), (3 * oy, 6 - 3 * oy), (3 * ox, 6 - 3 * ox), (0, 0))
            ).reshape(K_OBS, CNN_CH))
    w1s = jnp.concatenate(blocks, axis=1)                        # (4114, NCOL)
    w1s = jnp.pad(w1s, ((0, K_PAD - K_OBS), (0, 0))).astype(jnp.bfloat16)
    b1s = jnp.concatenate([params["b_self"], jnp.tile(params["b_conv1"], P)]
                          ).reshape(1, NCOL).astype(jnp.float32)

    # conv2 as one (NCOL, C) contraction; zero rows for the self columns
    w2 = jnp.concatenate(
        [jnp.zeros((H2, CNN_CH), jnp.float32),
         jnp.transpose(params["w_conv2"], (2, 3, 1, 0)).reshape(P * CNN_CH, CNN_CH)],
        axis=0).astype(jnp.bfloat16)                             # (NCOL, C)
    b2 = params["b_conv2"].reshape(1, CNN_CH).astype(jnp.float32)

    w3 = params["w_fc"].T.astype(jnp.bfloat16)                   # (C, H2)
    b3 = params["b_fc"].reshape(1, H2).astype(jnp.float32)

    # fused actor heads + value head, lane-padded to HEAD_PAD
    wh = jnp.concatenate([w.T for w in params["w_actor"]]
                         + [params["w_value"].T], axis=1)        # (H, 13)
    wh = jnp.pad(wh, ((0, 0), (0, HEAD_PAD - HEAD_W))).astype(jnp.bfloat16)
    bh = jnp.concatenate(list(params["b_actor"]) + [params["b_value"]])
    bh = jnp.pad(bh, (0, HEAD_PAD - HEAD_W)).reshape(1, HEAD_PAD).astype(jnp.float32)

    grid = (B_pad // TB,)
    const2 = lambda i: (0, 0)

    out = pl.pallas_call(
        policy_kernel,
        out_shape=jax.ShapeDtypeStruct((B_pad, OUT_W), jnp.float32),
        grid=grid,
        in_specs=[
            pl.BlockSpec((TB, K_PAD), lambda i: (i, 0)),     # obs slab (batch tiled)
            pl.BlockSpec((K_PAD, NCOL), const2),             # w1s (resident)
            pl.BlockSpec((1, NCOL), const2),                 # b1s
            pl.BlockSpec((NCOL, CNN_CH), const2),            # w2
            pl.BlockSpec((1, CNN_CH), const2),               # b2
            pl.BlockSpec((CNN_CH, H2), const2),              # w3
            pl.BlockSpec((1, H2), const2),                   # b3
            pl.BlockSpec((HIDDEN, HEAD_PAD), const2),        # wh
            pl.BlockSpec((1, HEAD_PAD), const2),             # bh
        ],
        out_specs=pl.BlockSpec((TB, OUT_W), lambda i: (i, 0)),
        compiler_params=pltpu.CompilerParams(
            dimension_semantics=("parallel",),     # megacore-shardable on v7x
            vmem_limit_bytes=40 * 1024 * 1024,     # fits TB<=1024 on v5e/v6e/v7x
        ),
    )(slab, w1s, b1s, w2, b2, w3, b3, wh, bh)

    # unpack the lane-dense slab and drop the batch padding
    hidden = out[:B, :HIDDEN]
    logits_cat = out[:B, HIDDEN:HIDDEN + SUM_N]
    value = out[:B, HIDDEN + SUM_N:HIDDEN + SUM_N + 1]

    logits, off = [], 0
    for n in ACTION_NVEC:
        logits.append(logits_cat[:, off:off + n])
        off += n
    return (logits, value), hidden


# --------------------------- pure-JAX reference -------------------------------
def policy_reference(observations, params):
    obs = observations.astype(jnp.float32)
    B = obs.shape[0]
    dn = ("NCHW", "OIHW", "NCHW")
    x = lax.conv_general_dilated(obs, params["w_conv1"], (3, 3), "VALID",
                                 dimension_numbers=dn)
    x = jax.nn.relu(x + params["b_conv1"][None, :, None, None])
    x = lax.conv_general_dilated(x, params["w_conv2"], (1, 1), "VALID",
                                 dimension_numbers=dn)
    x = jax.nn.relu(x + params["b_conv2"][None, :, None, None])
    x = x.reshape(B, CNN_CH)
    cnn = jax.nn.relu(x @ params["w_fc"].T + params["b_fc"])
    selff = jax.nn.relu(obs[:, :, 5, 5] @ params["w_self"].T + params["b_self"])
    hidden = jnp.concatenate([selff, cnn], axis=1)
    logits = [hidden @ w.T + b for w, b in zip(params["w_actor"], params["b_actor"])]
    value = hidden @ params["w_value"].T + params["b_value"]
    return (logits, value), hidden


# ---------------------------------- main --------------------------------------
if __name__ == "__main__":
    key = jax.random.PRNGKey(0)
    k_obs, k_par = jax.random.split(key)
    params = init_params(k_par)

    def check(B, block_b):
        obs = jax.random.normal(jax.random.fold_in(k_obs, B),
                                (B, IN_CH, IMG, IMG), jnp.float32)
        (logits, value), hidden = jax.block_until_ready(
            policy_forward(obs, params, block_b=block_b))
        (logits_r, value_r), hidden_r = policy_reference(obs, params)
        assert hidden.shape == (B, HIDDEN) and value.shape == (B, 1)
        assert [l.shape for l in logits] == [(B, n) for n in ACTION_NVEC]
        np.testing.assert_allclose(np.asarray(hidden), np.asarray(hidden_r),
                                   rtol=3e-2, atol=3e-2)
        np.testing.assert_allclose(np.asarray(value), np.asarray(value_r),
                                   rtol=3e-2, atol=3e-2)
        for l, lr in zip(logits, logits_r):
            np.testing.assert_allclose(np.asarray(l), np.asarray(lr),
                                       rtol=3e-2, atol=3e-2)

    # small: TB=32, 2 grid steps + batch-tail padding
    check(B=40, block_b=512)
    # production tiling: TB=512, an even 2-step "parallel" grid (v7x-friendly)
    check(B=1024, block_b=512)
    print("KERNEL_OK")
</pallas_src>

<mosaic_0001>
module attributes {stable_mosaic.version = 11 : i64} {
  func.func @policy_kernel(%arg0: i32, %arg1: memref<32x4224xbf16, #tpu.memory_space<vmem>>, %arg2: memref<4224x320xbf16, #tpu.memory_space<vmem>>, %arg3: memref<1x320xf32, #tpu.memory_space<vmem>>, %arg4: memref<320x32xbf16, #tpu.memory_space<vmem>>, %arg5: memref<1x32xf32, #tpu.memory_space<vmem>>, %arg6: memref<32x32xbf16, #tpu.memory_space<vmem>>, %arg7: memref<1x32xf32, #tpu.memory_space<vmem>>, %arg8: memref<64x64xbf16, #tpu.memory_space<vmem>>, %arg9: memref<1x64xf32, #tpu.memory_space<vmem>>, %arg10: memref<32x128xf32, #tpu.memory_space<vmem>>) attributes {dimension_semantics = [#tpu.dimension_semantics<parallel>], iteration_bounds = array<i64: 2>, scalar_prefetch = 0 : i64, scratch_operands = 0 : i64, tpu.core_type = #tpu.core_type<tc>, window_params = [{transform_indices = @transform_0, window_bounds = array<i64: 32, 4224>}, {pipeline_mode = #tpu.pipeline_mode<synchronous>, transform_indices = @transform_1, window_bounds = array<i64: 4224, 320>}, {pipeline_mode = #tpu.pipeline_mode<synchronous>, transform_indices = @transform_2, window_bounds = array<i64: 1, 320>}, {pipeline_mode = #tpu.pipeline_mode<synchronous>, transform_indices = @transform_3, window_bounds = array<i64: 320, 32>}, {pipeline_mode = #tpu.pipeline_mode<synchronous>, transform_indices = @transform_4, window_bounds = array<i64: 1, 32>}, {pipeline_mode = #tpu.pipeline_mode<synchronous>, transform_indices = @transform_5, window_bounds = array<i64: 32, 32>}, {pipeline_mode = #tpu.pipeline_mode<synchronous>, transform_indices = @transform_6, window_bounds = array<i64: 1, 32>}, {pipeline_mode = #tpu.pipeline_mode<synchronous>, transform_indices = @transform_7, window_bounds = array<i64: 64, 64>}, {pipeline_mode = #tpu.pipeline_mode<synchronous>, transform_indices = @transform_8, window_bounds = array<i64: 1, 64>}, {transform_indices = @transform_9, window_bounds = array<i64: 32, 128>}]} {
    %c0 = arith.constant 0 : index
    %c0_0 = arith.constant 0 : index
    %0 = vector.load %arg1[%c0, %c0_0] : memref<32x4224xbf16, #tpu.memory_space<vmem>>, vector<32x4224xbf16>
    %c0_1 = arith.constant 0 : index
    %c0_2 = arith.constant 0 : index
    %1 = vector.load %arg2[%c0_1, %c0_2] : memref<4224x320xbf16, #tpu.memory_space<vmem>>, vector<4224x320xbf16>
    %cst = arith.constant dense<0.000000e+00> : vector<32x320xf32>
    %2 = tpu.matmul %0, %1, %cst {dimension_numbers = #tpu.dot_dimension_numbers<[1], [0], [0], [1], [0, 0, 1, 1], [], []>} : vector<32x4224xbf16>, vector<4224x320xbf16>, vector<32x320xf32> -> vector<32x320xf32>
    %c0_3 = arith.constant 0 : index
    %c0_4 = arith.constant 0 : index
    %3 = vector.load %arg3[%c0_3, %c0_4] : memref<1x320xf32, #tpu.memory_space<vmem>>, vector<1x320xf32>
    %4 = vector.broadcast %3 : vector<1x320xf32> to vector<32x320xf32>
    %5 = arith.addf %2, %4 : vector<32x320xf32>
    %cst_5 = arith.constant 0.000000e+00 : f32
    %6 = vector.broadcast %cst_5 : f32 to vector<32x320xf32>
    %7 = arith.maximumf %5, %6 : vector<32x320xf32>
    %8 = arith.truncf %7 : vector<32x320xf32> to vector<32x320xbf16>
    %c0_6 = arith.constant 0 : index
    %c0_7 = arith.constant 0 : index
    %9 = vector.load %arg4[%c0_6, %c0_7] : memref<320x32xbf16, #tpu.memory_space<vmem>>, vector<320x32xbf16>
    %cst_8 = arith.constant dense<0.000000e+00> : vector<32x32xf32>
    %10 = tpu.matmul %8, %9, %cst_8 {dimension_numbers = #tpu.dot_dimension_numbers<[1], [0], [0], [1], [0, 0, 1, 1], [], []>} : vector<32x320xbf16>, vector<320x32xbf16>, vector<32x32xf32> -> vector<32x32xf32>
    %c0_9 = arith.constant 0 : index
    %c0_10 = arith.constant 0 : index
    %11 = vector.load %arg5[%c0_9, %c0_10] : memref<1x32xf32, #tpu.memory_space<vmem>>, vector<1x32xf32>
    %12 = vector.broadcast %11 : vector<1x32xf32> to vector<32x32xf32>
    %13 = arith.addf %10, %12 : vector<32x32xf32>
    %cst_11 = arith.constant 0.000000e+00 : f32
    %14 = vector.broadcast %cst_11 : f32 to vector<32x32xf32>
    %15 = arith.maximumf %13, %14 : vector<32x32xf32>
    %16 = arith.truncf %15 : vector<32x32xf32> to vector<32x32xbf16>
    %c0_12 = arith.constant 0 : index
    %c0_13 = arith.constant 0 : index
    %17 = vector.load %arg6[%c0_12, %c0_13] : memref<32x32xbf16, #tpu.memory_space<vmem>>, vector<32x32xbf16>
    %cst_14 = arith.constant dense<0.000000e+00> : vector<32x32xf32>
    %18 = tpu.matmul %16, %17, %cst_14 {dimension_numbers = #tpu.dot_dimension_numbers<[1], [0], [0], [1], [0, 0, 1, 1], [], []>} : vector<32x32xbf16>, vector<32x32xbf16>, vector<32x32xf32> -> vector<32x32xf32>
    %c0_15 = arith.constant 0 : index
    %c0_16 = arith.constant 0 : index
    %19 = vector.load %arg7[%c0_15, %c0_16] : memref<1x32xf32, #tpu.memory_space<vmem>>, vector<1x32xf32>
    %20 = vector.broadcast %19 : vector<1x32xf32> to vector<32x32xf32>
    %21 = arith.addf %18, %20 : vector<32x32xf32>
    %cst_17 = arith.constant 0.000000e+00 : f32
    %22 = vector.broadcast %cst_17 : f32 to vector<32x32xf32>
    %23 = arith.maximumf %21, %22 : vector<32x32xf32>
    %24 = vector.extract_strided_slice %7 {offsets = [0, 0], sizes = [32, 32], strides = [1, 1]} : vector<32x320xf32> to vector<32x32xf32>
    %25 = tpu.concatenate %24, %23 in 1 : vector<32x32xf32>, vector<32x32xf32> -> vector<32x64xf32>
    %26 = arith.truncf %25 : vector<32x64xf32> to vector<32x64xbf16>
    %c0_18 = arith.constant 0 : index
    %c0_19 = arith.constant 0 : index
    %27 = vector.load %arg8[%c0_18, %c0_19] : memref<64x64xbf16, #tpu.memory_space<vmem>>, vector<64x64xbf16>
    %cst_20 = arith.constant dense<0.000000e+00> : vector<32x64xf32>
    %28 = tpu.matmul %26, %27, %cst_20 {dimension_numbers = #tpu.dot_dimension_numbers<[1], [0], [0], [1], [0, 0, 1, 1], [], []>} : vector<32x64xbf16>, vector<64x64xbf16>, vector<32x64xf32> -> vector<32x64xf32>
    %c0_21 = arith.constant 0 : index
    %c0_22 = arith.constant 0 : index
    %29 = vector.load %arg9[%c0_21, %c0_22] : memref<1x64xf32, #tpu.memory_space<vmem>>, vector<1x64xf32>
    %30 = vector.broadcast %29 : vector<1x64xf32> to vector<32x64xf32>
    %31 = arith.addf %28, %30 : vector<32x64xf32>
    %32 = tpu.concatenate %25, %31 in 1 : vector<32x64xf32>, vector<32x64xf32> -> vector<32x128xf32>
    %c0_23 = arith.constant 0 : index
    %c0_24 = arith.constant 0 : index
    %33 = vector.load %arg10[%c0_23, %c0_24] : memref<32x128xf32, #tpu.memory_space<vmem>>, vector<32x128xf32>
    tpu.vector_store %arg10[%c0_23, %c0_24], %32 {strides = array<i32>} : memref<32x128xf32, #tpu.memory_space<vmem>>, vector<32x128xf32>,
    return
  }
  func.func @transform_0(%arg0: i32) -> (i32, i32) {
    %c0_i32 = arith.constant 0 : i32
    %c0_i32_0 = arith.constant 0 : i32
    return %arg0, %c0_i32 : i32, i32
  }
  func.func @transform_1(%arg0: i32) -> (i32, i32) {
    %c0_i32 = arith.constant 0 : i32
    %c0_i32_0 = arith.constant 0 : i32
    %c0_i32_1 = arith.constant 0 : i32
    return %c0_i32, %c0_i32_0 : i32, i32
  }
  func.func @transform_2(%arg0: i32) -> (i32, i32) {
    %c0_i32 = arith.constant 0 : i32
    %c0_i32_0 = arith.constant 0 : i32
    %c0_i32_1 = arith.constant 0 : i32
    return %c0_i32, %c0_i32_0 : i32, i32
  }
  func.func @transform_3(%arg0: i32) -> (i32, i32) {
    %c0_i32 = arith.constant 0 : i32
    %c0_i32_0 = arith.constant 0 : i32
    %c0_i32_1 = arith.constant 0 : i32
    return %c0_i32, %c0_i32_0 : i32, i32
  }
  func.func @transform_4(%arg0: i32) -> (i32, i32) {
    %c0_i32 = arith.constant 0 : i32
    %c0_i32_0 = arith.constant 0 : i32
    %c0_i32_1 = arith.constant 0 : i32
    return %c0_i32, %c0_i32_0 : i32, i32
  }
  func.func @transform_5(%arg0: i32) -> (i32, i32) {
    %c0_i32 = arith.constant 0 : i32
    %c0_i32_0 = arith.constant 0 : i32
    %c0_i32_1 = arith.constant 0 : i32
    return %c0_i32, %c0_i32_0 : i32, i32
  }
  func.func @transform_6(%arg0: i32) -> (i32, i32) {
    %c0_i32 = arith.constant 0 : i32
    %c0_i32_0 = arith.constant 0 : i32
    %c0_i32_1 = arith.constant 0 : i32
    return %c0_i32, %c0_i32_0 : i32, i32
  }
  func.func @transform_7(%arg0: i32) -> (i32, i32) {
    %c0_i32 = arith.constant 0 : i32
    %c0_i32_0 = arith.constant 0 : i32
    %c0_i32_1 = arith.constant 0 : i32
    return %c0_i32, %c0_i32_0 : i32, i32
  }
  func.func @transform_8(%arg0: i32) -> (i32, i32) {
    %c0_i32 = arith.constant 0 : i32
    %c0_i32_0 = arith.constant 0 : i32
    %c0_i32_1 = arith.constant 0 : i32
    return %c0_i32, %c0_i32_0 : i32, i32
  }
  func.func @transform_9(%arg0: i32) -> (i32, i32) {
    %c0_i32 = arith.constant 0 : i32
    %c0_i32_0 = arith.constant 0 : i32
    return %arg0, %c0_i32 : i32, i32
  }
}

</mosaic_0001>

<bundles_post_ra>
// kernel: tile.8
= control target key start
LH: loop header
LB: loop body
LE: loop exit
PB: predicated region body
PF: predicated region fallthrough
CT: control target
= control target key end

     0   :  { %s28_s0 = inlined_call_operand.vmem [shape: f32[32], index: 0, kind: input, shape index: {}]   ;;  %s29_s1 = inlined_call_operand.vmem [shape: f32[9,32], index: 1, kind: output, shape index: {}]  }
   0x1   :  { %v4_v0 = vld [vmem:[%s28_s0] ss:$0 sm:$0xff] }
   0x2   :  { %5 = vst [vmem:[%s29_s1] sm:$0xff] %v4_v0  ;;  %8 = vst [vmem:[%s29_s1 + $0x8] sm:$0xff] %v4_v0 }

// kernel: tile.9
= control target key start
LH: loop header
LB: loop body
LE: loop exit
PB: predicated region body
PF: predicated region fallthrough
CT: control target
= control target key end

     0   :  { %s6_s6 = smov 3  ;;  %s13_s11 = smov 3  ;;  %vm3_vm0 = vcmask 261120   ;;  %vm10_vm1 = vcmask 1048320   ;;  %vm17_vm2 = vcmask 785920   ;;  %vm24_vm3 = vcmask 523520   ;;  %s68_s0 = inlined_call_operand.vmem [shape: f32[9,32], index: 0, kind: input, shape index: {}]   ;;  %s69_s1 = inlined_call_operand.vmem [shape: f32[288], index: 1, kind: output, shape index: {}]  }
   0x1   :  { %v2_v0 = vld [vmem:[%s68_s0] ss:$4 sm:$0x7]   ;;  %v34_v1 = vld [vmem:[%s68_s0 + $0x3] ss:$4 sm:%s6_s6]   ;;  %s40_s12 = smov 96  }
   0x2   :  { %8 = vrot.lane.b32.xlu0 %v34_v1, %s40_s12  ;;  %s20_s13 = smov 3  ;;  %4 = vst.msk [vmem:[#allocation0] sm:$0x7] %vm3_vm0, %v2_v0   ;;  %v35_v2 = vld [vmem:[%s68_s0 + $0x2] ss:$4 sm:%s13_s11]   ;;  %s42_s18 = smov 64  }
   0x3   :  { %v36_v3 = vld [vmem:[%s68_s0 + $0x1] ss:$4 sm:%s20_s13]   ;;  %s41_s0 = smov 32  }
   0x4   :  { %22 = vrot.lane.b32.xlu1 %v36_v3, %s41_s0 }
   0x6   :  { %15 = vrot.lane.b32.xlu0 %v35_v2, %s42_s18 }
  0x74   :  { %v9_v4 = vpop.permute.xlu0 %8  }
  0x75   :  { %11 = vst.msk [vmem:[#allocation0] sm:$0x3] %vm10_vm1, %v9_v4  }
  0x76   :  { %v23_v5 = vpop.permute.xlu1 %22  }
  0x78   :  { %v16_v6 = vpop.permute.xlu0 %15  }
  0x79   :  { %18 = vst.msk [vmem:[#allocation0] sm:$0x3] %vm17_vm2, %v16_v6  }
  0x7a   :  { %25 = vst.msk [vmem:[#allocation0] sm:$0x3] %vm24_vm3, %v23_v5  }
  0x81   :  { %v30_v7 = vld [vmem:[#allocation0] sm:$0xf] }
  0x82   :  { %33 = vst [vmem:[%s69_s1] sm:$0xf] %v30_v7 }

// kernel: policy_forward.1
= control target key start
LH: loop header
LB: loop body
LE: loop exit
PB: predicated region body
PF: predicated region fallthrough
CT: control target
= control target key end

     0   :  { %s11124_s30 = smov 0   ;;  %s14295_s0 = inlined_call_operand.vmem [shape: bf16[64,4224], index: 0, kind: input, shape index: {}]   ;;  %s14296_s1 = inlined_call_operand.vmem [shape: bf16[4224,320], index: 1, kind: input, shape index: {}]   ;;  %s14297_s2 = inlined_call_operand.vmem [shape: f32[1,320], index: 2, kind: input, shape index: {}]   ;;  %s14298_s3 = inlined_call_operand.vmem [shape: bf16[320,32], index: 3, kind: input, shape index: {}]   ;;  %s14299_s4 = inlined_call_operand.vmem [shape: f32[1,32], index: 4, kind: input, shape index: {}]   ;;  %s14300_s5 = inlined_call_operand.vmem [shape: bf16[32,32], index: 5, kind: input, shape index: {}]   ;;  %s14301_s6 = inlined_call_operand.vmem [shape: f32[1,32], index: 6, kind: input, shape index: {}]   ;;  %s14302_s7 = inlined_call_operand.vmem [shape: bf16[64,64], index: 7, kind: input, shape index: {}]   ;;  %s14303_s8 = inlined_call_operand.vmem [shape: f32[1,64], index: 8, kind: input, shape index: {}]   ;;  %s14304_s9 = inlined_call_operand.vmem [shape: f32[64,128], index: 9, kind: output, shape index: {}]  }
   0x1 LB: > { %s8346_s10 = sadd.s32 4294967295, %s11069_s30   ;;  %p8350_p0 = scmp.ge.s32.totalorder %s11069_s30, 1  ;;  %s11069_s30 = sphi %s11124_s30, %s19_s30  }
   0x2   : > { %p289_p1 = scmp.lt.s32.totalorder %s11069_s30, 3 }
   0x4   : > { %p290_p2 = pnand %p8350_p0, %p289_p1 }
   0x6   : > { %293 = sbr.rel (%p290_p2) target bundleno = 1879 (0x757), region = 56 }
   0xb   : > { %v9816_v0 = vld [vmem:[%s14296_s1 + $0xac] ss:$12 sps:$4 sm:$0xff]   ;;  %v9818_v1 = vld [vmem:[%s14296_s1 + $0xa8] ss:$12 sps:$4 sm:$0xff]   ;;  %v9824_v5 = vld [vmem:[%s14296_s1 + $0x90] ss:$12 sps:$4 sm:$0xff]  }
   0xc   : > { %6037 = vmatprep.subr.bf16.mxu0 %v9816_v0  ;;  %v9819_v2 = vld [vmem:[%s14296_s1 + $0x22c] ss:$12 sps:$4 sm:$0xff]   ;;  %v9821_v3 = vld [vmem:[%s14296_s1 + $0x228] ss:$12 sps:$4 sm:$0xff]   ;;  %v9827_v7 = vld [vmem:[%s14296_s1 + $0x210] ss:$12 sps:$4 sm:$0xff]  }
   0xd   : > { %6038 = vmatpush1.bf16.msra.mxu0 %v9818_v1  ;;  %v9822_v4 = vld [vmem:[%s14296_s1 + $0x94] ss:$12 sps:$4 sm:$0xff]   ;;  %6090 = vmatprep.subr.bf16.mxu1 %v9819_v2  ;;  %v9828_v8 = vld [vmem:[%s14296_s1 + $0x7c] ss:$12 sps:$4 sm:$0xff]   ;;  %v9830_v9 = vld [vmem:[%s14296_s1 + $0x78] ss:$12 sps:$4 sm:$0xff]  }
   0xe   : > { %v9825_v6 = vld [vmem:[%s14296_s1 + $0x214] ss:$12 sps:$4 sm:$0xff]   ;;  %6091 = vmatpush1.bf16.msra.mxu1 %v9821_v3  ;;  %6039 = vmatprep.subr.bf16.mxu0 %v9822_v4  ;;  %v9831_v10 = vld [vmem:[%s14296_s1 + $0x1fc] ss:$12 sps:$4 sm:$0xff]   ;;  %v9834_v11 = vld [vmem:[%s14296_s1 + $0x64] ss:$12 sps:$4 sm:$0xff]  }
   0xf   : > { %6092 = vmatprep.subr.bf16.mxu1 %v9825_v6  ;;  %v9833_v12 = vld [vmem:[%s14296_s1 + $0x1f8] ss:$12 sps:$4 sm:$0xff]   ;;  %v9836_v14 = vld [vmem:[%s14296_s1 + $0x60] ss:$12 sps:$4 sm:$0xff]   ;;  %v9842_v18 = vld [vmem:[%s14296_s1 + $0x48] ss:$12 sps:$4 sm:$0xff]  }
  0x10   : > { %v9837_v13 = vld [vmem:[%s14296_s1 + $0x1e4] ss:$12 sps:$4 sm:$0xff]   ;;  %v9840_v15 = vld [vmem:[%s14296_s1 + $0x4c] ss:$12 sps:$4 sm:$0xff]   ;;  %v9846_v19 = vld [vmem:[%s14296_s1 + $0x34] ss:$12 sps:$4 sm:$0xff]  }
  0x11   : > { %6040 = vmatpush1.bf16.msra.mxu0 %v9824_v5  ;;  %v9839_v16 = vld [vmem:[%s14296_s1 + $0x1e0] ss:$12 sps:$4 sm:$0xff]   ;;  %v9845_v20 = vld [vmem:[%s14296_s1 + $0x1c8] ss:$12 sps:$4 sm:$0xff]   ;;  %v9848_v22 = vld [vmem:[%s14296_s1 + $0x30] ss:$12 sps:$4 sm:$0xff]  }
  0x12   : > { %6041 = vmatprep.subr.bf16.mxu0 %v9828_v8  ;;  %6093 = vmatpush1.bf16.msra.mxu1 %v9827_v7  ;;  %v9843_v17 = vld [vmem:[%s14296_s1 + $0x1cc] ss:$12 sps:$4 sm:$0xff]   ;;  %v9849_v21 = vld [vmem:[%s14296_s1 + $0x1b4] ss:$12 sps:$4 sm:$0xff]   ;;  %v9852_v23 = vld [vmem:[%s14296_s1 + $0x1c] ss:$12 sps:$4 sm:$0xff]  }
  0x13   : > { %6094 = vmatprep.subr.bf16.mxu1 %v9831_v10  ;;  %v9851_v24 = vld [vmem:[%s14296_s1 + $0x1b0] ss:$12 sps:$4 sm:$0xff]   ;;  %v9854_v26 = vld [vmem:[%s14296_s1 + $0x18] ss:$12 sps:$4 sm:$0xff]   ;;  %s8351_s12 = sshll.u32 %s8346_s10, 2  ;;  %vm7956_vm0 = vcmask 523264  }
  0x14   : > { %v9855_v25 = vld [vmem:[%s14296_s1 + $0x19c] ss:$12 sps:$4 sm:$0xff]   ;;  %v9858_v27 = vld [vmem:[%s14296_s1 + $0x4] ss:$12 sps:$4 sm:$0xff]   ;;  %v9860_v30 = vld [vmem:[%s14296_s1] ss:$12 sps:$4 sm:$0xff]  }
  0x15   : > { %6042 = vmatpush1.bf16.msra.mxu0 %v9830_v9  ;;  %v9857_v28 = vld [vmem:[%s14296_s1 + $0x198] ss:$12 sps:$4 sm:$0xff]   ;;  %p327_p3 = scmp.lt.s32.totalorder %s8351_s12, 7  ;;  %v9863_v32 = vld [vmem:[%s14296_s1 + $0x180] ss:$12 sps:$4 sm:$0xff]   ;;  %vm8090_vm1 = vcmask 261120  }
  0x16   : > { %6043 = vmatprep.subr.bf16.mxu0 %v9834_v11  ;;  %6095 = vmatpush1.bf16.msra.mxu1 %v9833_v12  ;;  %v9861_v29 = vld [vmem:[%s14296_s1 + $0x184] ss:$12 sps:$4 sm:$0xff]   ;;  %v9864_v31 = vld [vmem:[%s14296_s1 + $0x16c] ss:$12 sps:$4 sm:$0xff]   ;;  %v9866_v34 = vld [vmem:[%s14296_s1 + $0x168] ss:$12 sps:$4 sm:$0xff]  }
  0x17   : > { %6096 = vmatprep.subr.bf16.mxu1 %v9837_v13  ;;  %v9867_v33 = vld [vmem:[%s14296_s1 + $0x2ec] ss:$12 sps:$4 sm:$0xff]   ;;  %v9870_v35 = vld [vmem:[%s14296_s1 + $0x154] ss:$12 sps:$4 sm:$0xff]   ;;  %s14386_s12 = smov (!%p327_p3, %s8351_s12), 7  ;;  %s11072_s14 = smov 32  }
  0x18   : > { %v9869_v36 = vld [vmem:[%s14296_s1 + $0x2e8] ss:$12 sps:$4 sm:$0xff]   ;;  %v9872_v38 = vld [vmem:[%s14296_s1 + $0x150] ss:$12 sps:$4 sm:$0xff]   ;;  %s9804_s16 = smul.u32 132, %s14386_s12  ;;  %s11073_s17 = smov 64  }
  0x19   : > { %6044 = vmatpush1.bf16.msra.mxu0 %v9836_v14  ;;  %v9873_v37 = vld [vmem:[%s14296_s1 + $0x2d4] ss:$12 sps:$4 sm:$0xff]   ;;  %v9876_v39 = vld [vmem:[%s14296_s1 + $0x13c] ss:$12 sps:$4 sm:$0xff]   ;;  %v9878_v42 = vld [vmem:[%s14296_s1 + $0x138] ss:$12 sps:$4 sm:$0xff]  }
  0x1a   : > { %6045 = vmatprep.subr.bf16.mxu0 %v9840_v15  ;;  %6097 = vmatpush1.bf16.msra.mxu1 %v9839_v16  ;;  %v9875_v40 = vld [vmem:[%s14296_s1 + $0x2d0] ss:$12 sps:$4 sm:$0xff]   ;;  %s11272_s26 = scalar_lea.vmem %s14295_s0, %s9804_s16  ;;  %v9881_v44 = vld [vmem:[%s14296_s1 + $0x2b8] ss:$12 sps:$4 sm:$0xff]   ;;  %v9884_v46 = vld [vmem:[%s14296_s1 + $0x120] ss:$12 sps:$4 sm:$0xff]  }
  0x1b   : > { %6098 = vmatprep.subr.bf16.mxu1 %v9843_v17  ;;  %v9879_v41 = vld [vmem:[%s14296_s1 + $0x2bc] ss:$12 sps:$4 sm:$0xff]   ;;  %v9882_v43 = vld [vmem:[%s14296_s1 + $0x124] ss:$12 sps:$4 sm:$0xff]   ;;  %v9888_v48 = vld [vmem:[%s14296_s1 + $0x10c] ss:$12 sps:$4 sm:$0xff]  }
  0x1c   : > { %v9885_v45 = vld [vmem:[%s14296_s1 + $0x2a4] ss:$12 sps:$4 sm:$0xff]   ;;  %v9887_v49 = vld [vmem:[%s14296_s1 + $0x2a0] ss:$12 sps:$4 sm:$0xff]   ;;  %v9890_v52 = vld [vmem:[%s14296_s1 + $0x108] ss:$12 sps:$4 sm:$0xff]  }
  0x1d   : > { %6046 = vmatpush1.bf16.msra.mxu0 %v9842_v18  ;;  %v9913_v47 = vld [vmem:[%s11272_s26 + $0x4] ss:$132 sps:$4 sm:$0xff]   ;;  %v9891_v50 = vld [vmem:[%s14296_s1 + $0x28c] ss:$12 sps:$4 sm:$0xff]   ;;  %v9894_v53 = vld [vmem:[%s14296_s1 + $0xf4] ss:$12 sps:$4 sm:$0xff]  }
  0x1e   : > { %6047 = vmatprep.subr.bf16.mxu0 %v9846_v19  ;;  %6099 = vmatpush1.bf16.msra.mxu1 %v9845_v20  ;;  %v9920_v51 = vld [vmem:[%s11272_s26 + $0xc] ss:$132 sps:$4 sm:$0xff]   ;;  %v9893_v54 = vld [vmem:[%s14296_s1 + $0x288] ss:$12 sps:$4 sm:$0xff]   ;;  %v9902_v60 = vld [vmem:[%s14296_s1 + $0xd8] ss:$12 sps:$4 sm:$0xff]  }
  0x1f   : > { %6100 = vmatprep.subr.bf16.mxu1 %v9849_v21  ;;  %6069 = vmatprep.mubr.bf16.mxu0 %v9913_v47  ;;  %v9897_v55 = vld [vmem:[%s14296_s1 + $0x274] ss:$12 sps:$4 sm:$0xff]   ;;  %v9896_v56 = vld [vmem:[%s14296_s1 + $0xf0] ss:$12 sps:$4 sm:$0xff]   ;;  %v9905_v62 = vld [vmem:[%s14296_s1 + $0x258] ss:$12 sps:$4 sm:$0xff]  }
  0x20   : > { %6122 = vmatprep.mubr.bf16.mxu1 %v9920_v51  ;;  %v9900_v57 = vld [vmem:[%s14296_s1 + $0xdc] ss:$12 sps:$4 sm:$0xff]   ;;  %v9906_v61 = vld [vmem:[%s14296_s1 + $0xc4] ss:$12 sps:$4 sm:$0xff]   ;;  %v9908_v0 = vld [vmem:[%s14296_s1 + $0xc0] ss:$12 sps:$4 sm:$0xff]  }
  0x21   : > { %6048 = vmatpush1.bf16.msra.mxu0 %v9848_v22  ;;  %v9899_v58 = vld [vmem:[%s14296_s1 + $0x270] ss:$12 sps:$4 sm:$0xff]   ;;  %v9917_v1 = vld [vmem:[%s14296_s1 + $0x3ac] ss:$12 sps:$4 sm:$0xff]   ;;  %v9911_v3 = vld [vmem:[%s11272_s26] ss:$132 sps:$4 sm:$0xff]  }
  0x22   : > { %6049 = vmatprep.subr.bf16.mxu0 %v9852_v23  ;;  %6101 = vmatpush1.bf16.msra.mxu1 %v9851_v24  ;;  %v9903_v59 = vld [vmem:[%s14296_s1 + $0x25c] ss:$12 sps:$4 sm:$0xff]   ;;  %v9909_v63 = vld [vmem:[%s14296_s1 + $0x244] ss:$12 sps:$4 sm:$0xff]   ;;  %v9914_v2 = vld [vmem:[%s14296_s1 + $0x240] ss:$12 sps:$4 sm:$0xff]  }
  0x23   : > { %6102 = vmatprep.subr.bf16.mxu1 %v9855_v25  ;;  %v9923_v4 = vld [vmem:[%s14296_s1 + $0x52c] ss:$12 sps:$4 sm:$0xff]   ;;  %v9915_v5 = vld [vmem:[%s14296_s1 + $0x3a8] ss:$12 sps:$4 sm:$0xff]   ;;  %v9924_v10 = vld [vmem:[%s14296_s1 + $0x390] ss:$12 sps:$4 sm:$0xff]  }
  0x24   : > { %v9918_v6 = vld [vmem:[%s11272_s26 + $0x8] ss:$132 sps:$4 sm:$0xff]   ;;  %v9926_v7 = vld [vmem:[%s14296_s1 + $0x394] ss:$12 sps:$4 sm:$0xff]   ;;  %v9927_v12 = vld [vmem:[%s14296_s1 + $0x510] ss:$12 sps:$4 sm:$0xff]  }
  0x25   : > { %6050 = vmatpush1.bf16.msra.mxu0 %v9854_v26  ;;  %v9921_v8 = vld [vmem:[%s14296_s1 + $0x528] ss:$12 sps:$4 sm:$0xff]   ;;  %v9930_v14 = vld [vmem:[%s14296_s1 + $0x378] ss:$12 sps:$4 sm:$0xff]   ;;  %v9936_v18 = vld [vmem:[%s14296_s1 + $0x360] ss:$12 sps:$4 sm:$0xff]  }
  0x26   : > { %6051 = vmatprep.subr.bf16.mxu0 %v9858_v27  ;;  %6103 = vmatpush1.bf16.msra.mxu1 %v9857_v28  ;;  %v9929_v9 = vld [vmem:[%s14296_s1 + $0x514] ss:$12 sps:$4 sm:$0xff]   ;;  %v9932_v11 = vld [vmem:[%s14296_s1 + $0x37c] ss:$12 sps:$4 sm:$0xff]   ;;  %v9938_v15 = vld [vmem:[%s14296_s1 + $0x364] ss:$12 sps:$4 sm:$0xff]  }
  0x27   : > { %6104 = vmatprep.subr.bf16.mxu1 %v9861_v29  ;;  %v9935_v13 = vld [vmem:[%s14296_s1 + $0x4fc] ss:$12 sps:$4 sm:$0xff]   ;;  %v9933_v16 = vld [vmem:[%s14296_s1 + $0x4f8] ss:$12 sps:$4 sm:$0xff]   ;;  %v9939_v20 = vld [vmem:[%s14296_s1 + $0x4e0] ss:$12 sps:$4 sm:$0xff]  }
  0x28   : > { %v9941_v17 = vld [vmem:[%s14296_s1 + $0x4e4] ss:$12 sps:$4 sm:$0xff]   ;;  %v9944_v19 = vld [vmem:[%s14296_s1 + $0x34c] ss:$12 sps:$4 sm:$0xff]   ;;  %v9942_v21 = vld [vmem:[%s14296_s1 + $0x348] ss:$12 sps:$4 sm:$0xff]  }
  0x29   : > { %6052 = vmatpush1.bf16.msra.mxu0 %v9860_v30  ;;  %v9947_v22 = vld [vmem:[%s14296_s1 + $0x4cc] ss:$12 sps:$4 sm:$0xff]   ;;  %v9945_v23 = vld [vmem:[%s14296_s1 + $0x4c8] ss:$12 sps:$4 sm:$0xff]   ;;  %v9948_v29 = vld [vmem:[%s14296_s1 + $0x330] ss:$12 sps:$4 sm:$0xff]  }
  0x2a   : > { %6053 = vmatprep.subr.bf16.mxu0 %v9864_v31  ;;  %6105 = vmatpush1.bf16.msra.mxu1 %v9863_v32  ;;  %v9993_v24 = vld [vmem:[%s11272_s26 + $0x10c] ss:$132 sps:$4 sm:$0xff]   ;;  %v9950_v25 = vld [vmem:[%s14296_s1 + $0x334] ss:$12 sps:$4 sm:$0xff]   ;;  %v9956_v31 = vld [vmem:[%s14296_s1 + $0x31c] ss:$12 sps:$4 sm:$0xff]  }
  0x2b   : > { %6106 = vmatprep.subr.bf16.mxu1 %v9867_v33  ;;  %v9953_v26 = vld [vmem:[%s14296_s1 + $0x4b4] ss:$12 sps:$4 sm:$0xff]   ;;  %v9998_v27 = vld [vmem:[%s11272_s26 + $0x108] ss:$132 sps:$4 sm:$0xff]   ;;  %v9951_v32 = vld [vmem:[%s14296_s1 + $0x4b0] ss:$12 sps:$4 sm:$0xff]  }
  0x2c   : > { %v9999_v28 = vld [vmem:[%s11272_s26 + $0x114] ss:$132 sps:$4 sm:$0xff]   ;;  %v9959_v33 = vld [vmem:[%s14296_s1 + $0x49c] ss:$12 sps:$4 sm:$0xff]   ;;  %s8354_s18 = sshll.u32 %s14386_s12, 3 }
  0x2d   : > { %6054 = vmatpush2.bf16.msra.mxu0 %v9866_v34  ;;  %v10004_v30 = vld [vmem:[%s11272_s26 + $0x110] ss:$132 sps:$4 sm:$0xff]   ;;  %v9954_v34 = vld [vmem:[%s14296_s1 + $0x318] ss:$12 sps:$4 sm:$0xff]   ;;  %v9983_v51 = vld [vmem:[%s14296_s1 + $0x5bc] ss:$12 sps:$4 sm:$0xff]   ;;  %s337_s10 = scalar_lea.vmem %s14304_s9, %s8354_s18 }
  0x2e   : > { %6055 = vmatprep.subr.bf16.mxu0 %v9870_v35  ;;  %6107 = vmatpush2.bf16.msra.mxu1 %v9869_v36  ;;  %v9962_v35 = vld [vmem:[%s14296_s1 + $0x304] ss:$12 sps:$4 sm:$0xff]   ;;  %v9977_v47 = vld [vmem:[%s14296_s1 + $0x5d4] ss:$12 sps:$4 sm:$0xff]  }
  0x2f   : > { %6108 = vmatprep.subr.bf16.mxu1 %v9873_v37  ;;  %v9957_v36 = vld [vmem:[%s14296_s1 + $0x498] ss:$12 sps:$4 sm:$0xff]  }
  0x30   : > { %v9965_v37 = vld [vmem:[%s14296_s1 + $0x484] ss:$12 sps:$4 sm:$0xff]  }
  0x31   : > { %6056 = vmatpush2.bf16.msra.mxu0 %v9872_v38  ;;  %v9960_v38 = vld [vmem:[%s14296_s1 + $0x300] ss:$12 sps:$4 sm:$0xff]  }
  0x32   : > { %6057 = vmatprep.subr.bf16.mxu0 %v9876_v39  ;;  %6109 = vmatpush2.bf16.msra.mxu1 %v9875_v40  ;;  %v10022_v39 = vld [vmem:[%s11272_s26 + $0x14] ss:$132 sps:$4 sm:$0xff]  }
  0x33   : > { %6110 = vmatprep.subr.bf16.mxu1 %v9879_v41  ;;  %v9968_v40 = vld [vmem:[%s14296_s1 + $0x46c] ss:$12 sps:$4 sm:$0xff]  }
  0x34   : > { %v9963_v41 = vld [vmem:[%s14296_s1 + $0x480] ss:$12 sps:$4 sm:$0xff]  }
  0x35   : > { %6058 = vmatpush2.bf16.msra.mxu0 %v9878_v42  ;;  %v9971_v42 = vld [vmem:[%s14296_s1 + $0x5ec] ss:$12 sps:$4 sm:$0xff]  }
  0x36   : > { %6059 = vmatprep.subr.bf16.mxu0 %v9882_v43  ;;  %6111 = vmatpush2.bf16.msra.mxu1 %v9881_v44  ;;  %v10028_v43 = vld [vmem:[%s11272_s26 + $0x1c] ss:$132 sps:$4 sm:$0xff]   ;;  %v9966_v44 = vld [vmem:[%s14296_s1 + $0x468] ss:$12 sps:$4 sm:$0xff]  }
  0x37   : > { %6112 = vmatprep.subr.bf16.mxu1 %v9885_v45  ;;  %v9974_v45 = vld [vmem:[%s14296_s1 + $0x454] ss:$12 sps:$4 sm:$0xff]  }
  0x39   : > { %6060 = vmatpush2.bf16.msra.mxu0 %v9884_v46  ;;  %v9969_v46 = vld [vmem:[%s14296_s1 + $0x5e8] ss:$12 sps:$4 sm:$0xff]  }
  0x3a   : > { %6061 = vmatprep.subr.bf16.mxu0 %v9888_v48  ;;  %6113 = vmatpush2.bf16.msra.mxu1 %v9887_v49  ;;  %v9972_v48 = vld [vmem:[%s14296_s1 + $0x450] ss:$12 sps:$4 sm:$0xff]  }
  0x3b   : > { %6114 = vmatprep.subr.bf16.mxu1 %v9891_v50  ;;  %v9980_v49 = vld [vmem:[%s14296_s1 + $0x43c] ss:$12 sps:$4 sm:$0xff]  }
  0x3c   : > { %v9975_v50 = vld [vmem:[%s14296_s1 + $0x5d0] ss:$12 sps:$4 sm:$0xff]  }
  0x3d   : > { %6062 = vmatpush2.bf16.msra.mxu0 %v9890_v52  ;;  %v9978_v52 = vld [vmem:[%s14296_s1 + $0x438] ss:$12 sps:$4 sm:$0xff]  }
  0x3e   : > { %6063 = vmatprep.subr.bf16.mxu0 %v9894_v53  ;;  %6115 = vmatpush2.bf16.msra.mxu1 %v9893_v54  ;;  %v9986_v53 = vld [vmem:[%s14296_s1 + $0x424] ss:$12 sps:$4 sm:$0xff]  }
  0x3f   : > { %6116 = vmatprep.subr.bf16.mxu1 %v9897_v55  ;;  %v9981_v54 = vld [vmem:[%s14296_s1 + $0x5b8] ss:$12 sps:$4 sm:$0xff]  }
  0x40   : > { %v9989_v55 = vld [vmem:[%s14296_s1 + $0x5a4] ss:$12 sps:$4 sm:$0xff]  }
  0x41   : > { %6064 = vmatpush2.bf16.msra.mxu0 %v9896_v56  ;;  %v9984_v56 = vld [vmem:[%s14296_s1 + $0x420] ss:$12 sps:$4 sm:$0xff]  }
  0x42   : > { %6065 = vmatprep.subr.bf16.mxu0 %v9900_v57  ;;  %6117 = vmatpush2.bf16.msra.mxu1 %v9899_v58  ;;  %v9992_v57 = vld [vmem:[%s14296_s1 + $0x40c] ss:$12 sps:$4 sm:$0xff]  }
  0x43   : > { %6118 = vmatprep.subr.bf16.mxu1 %v9903_v59  ;;  %v9987_v58 = vld [vmem:[%s14296_s1 + $0x5a0] ss:$12 sps:$4 sm:$0xff]  }
  0x44   : > { %v9997_v59 = vld [vmem:[%s14296_s1 + $0x58c] ss:$12 sps:$4 sm:$0xff]  }
  0x45   : > { %6066 = vmatpush2.bf16.msra.mxu0 %v9902_v60  ;;  %v9990_v60 = vld [vmem:[%s14296_s1 + $0x408] ss:$12 sps:$4 sm:$0xff]  }
  0x46   : > { %6067 = vmatprep.subr.bf16.mxu0 %v9906_v61  ;;  %6119 = vmatpush2.bf16.msra.mxu1 %v9905_v62  ;;  %v10003_v61 = vld [vmem:[%s14296_s1 + $0x3f4] ss:$12 sps:$4 sm:$0xff]  }
  0x47   : > { %6120 = vmatprep.subr.bf16.mxu1 %v9909_v63  ;;  %v9995_v62 = vld [vmem:[%s14296_s1 + $0x588] ss:$12 sps:$4 sm:$0xff]  }
  0x48   : > { %v10007_v63 = vld [vmem:[%s14296_s1 + $0x574] ss:$12 sps:$4 sm:$0xff]  }
  0x49   : > { %6068 = vmatpush2.bf16.msra.mxu0 %v9908_v0  ;;  %v10001_v0 = vld [vmem:[%s14296_s1 + $0x3f0] ss:$12 sps:$4 sm:$0xff]  }
  0x4a   : > { %6143 = vmatprep.subr.bf16.mxu0 %v9917_v1  ;;  %6121 = vmatpush2.bf16.msra.mxu1 %v9914_v2  ;;  %v10010_v1 = vld [vmem:[%s14296_s1 + $0x3dc] ss:$12 sps:$4 sm:$0xff]  }
  0x4b   : > { %6196 = vmatprep.subr.bf16.mxu1 %v9923_v4  ;;  %v10005_v2 = vld [vmem:[%s14296_s1 + $0x570] ss:$12 sps:$4 sm:$0xff]   ;;  %v10008_v4 = vld [vmem:[%s14296_s1 + $0x3d8] ss:$12 sps:$4 sm:$0xff]  }
  0x4c   : > { %6070 = vmatmul.mubr.bf16.vlgmr.msra.gmra.mxu0 %v9911_v3  ;;  %v10013_v3 = vld [vmem:[%s14296_s1 + $0x55c] ss:$12 sps:$4 sm:$0xff]  }
  0x4d   : > { %6144 = vmatpush1.bf16.msra.mxu0 %v9915_v5  ;;  %6123 = vmatmul.mubr.bf16.vlgmr.msra.gmra.mxu1 %v9918_v6  ;;  %v10016_v5 = vld [vmem:[%s14296_s1 + $0x3c4] ss:$12 sps:$4 sm:$0xff]  }
  0x4e   : > { %6145 = vmatprep.subr.bf16.mxu0 %v9926_v7  ;;  %6197 = vmatpush1.bf16.msra.mxu1 %v9921_v8  ;;  %v10011_v6 = vld [vmem:[%s14296_s1 + $0x558] ss:$12 sps:$4 sm:$0xff]   ;;  %v10014_v8 = vld [vmem:[%s14296_s1 + $0x3c0] ss:$12 sps:$4 sm:$0xff]  }
  0x4f   : > { %6198 = vmatprep.subr.bf16.mxu1 %v9929_v9  ;;  %6079 = vmatprep.mubr.bf16.mxu0 %v9993_v24  ;;  %v10019_v7 = vld [vmem:[%s14296_s1 + $0x544] ss:$12 sps:$4 sm:$0xff]   ;;  %v10017_v9 = vld [vmem:[%s14296_s1 + $0x540] ss:$12 sps:$4 sm:$0xff]   ;;  %v10049_v24 = vld [vmem:[%s14296_s1 + $0x7fc] ss:$12 sps:$4 sm:$0xff]  }
  0x50   : > { %6132 = vmatprep.mubr.bf16.mxu1 %v9999_v28  ;;  %v10047_v28 = vld [vmem:[%s14296_s1 + $0x7f8] ss:$12 sps:$4 sm:$0xff]  }
  0x51   : > { %6146 = vmatpush1.bf16.msra.mxu0 %v9924_v10  ;;  %v10020_v10 = vld [vmem:[%s11272_s26 + $0x10] ss:$132 sps:$4 sm:$0xff]  }
  0x52   : > { %6147 = vmatprep.subr.bf16.mxu0 %v9932_v11  ;;  %6199 = vmatpush1.bf16.msra.mxu1 %v9927_v12  ;;  %v10025_v11 = vld [vmem:[%s14296_s1 + $0x6ac] ss:$12 sps:$4 sm:$0xff]   ;;  %v10023_v12 = vld [vmem:[%s14296_s1 + $0x6a8] ss:$12 sps:$4 sm:$0xff]  }
  0x53   : > { %6200 = vmatprep.subr.bf16.mxu1 %v9935_v13  ;;  %v10026_v13 = vld [vmem:[%s11272_s26 + $0x18] ss:$132 sps:$4 sm:$0xff]  }
  0x54   : > { %6080 = vmatmul.mubr.bf16.gmra.mxu0 %v9998_v27  ;;  %v10052_v27 = vld [vmem:[%s14296_s1 + $0x664] ss:$12 sps:$4 sm:$0xff]  }
  0x55   : > { %6148 = vmatpush1.bf16.msra.mxu0 %v9930_v14  ;;  %6133 = vmatmul.mubr.bf16.gmra.mxu1 %v10004_v30  ;;  %v10031_v14 = vld [vmem:[%s14296_s1 + $0x82c] ss:$12 sps:$4 sm:$0xff]  }
  0x56   : > { %6149 = vmatprep.subr.bf16.mxu0 %v9938_v15  ;;  %6201 = vmatpush1.bf16.msra.mxu1 %v9933_v16  ;;  %v10029_v15 = vld [vmem:[%s14296_s1 + $0x828] ss:$12 sps:$4 sm:$0xff]   ;;  %v10038_v16 = vld [vmem:[%s11272_s26 + $0x11c] ss:$132 sps:$4 sm:$0xff]  }
  0x57   : > { %6202 = vmatprep.subr.bf16.mxu1 %v9941_v17  ;;  %6175 = vmatprep.mubr.bf16.mxu0 %v10022_v39  ;;  %v10034_v17 = vld [vmem:[%s14296_s1 + $0x694] ss:$12 sps:$4 sm:$0xff]  }
  0x58   : > { %6228 = vmatprep.mubr.bf16.mxu1 %v10028_v43  ;;  %v10050_v30 = vld [vmem:[%s14296_s1 + $0x660] ss:$12 sps:$4 sm:$0xff]   ;;  %v10073_v43 = vld [vmem:[%s14296_s1 + $0x79c] ss:$12 sps:$4 sm:$0xff]  }
  0x59   : > { %6150 = vmatpush1.bf16.msra.mxu0 %v9936_v18  ;;  %v10044_v18 = vld [vmem:[%s11272_s26 + $0x124] ss:$132 sps:$4 sm:$0xff]   ;;  %v10067_v39 = vld [vmem:[%s14296_s1 + $0x7b4] ss:$12 sps:$4 sm:$0xff]  }
  0x5a   : > { %6151 = vmatprep.subr.bf16.mxu0 %v9944_v19  ;;  %6203 = vmatpush1.bf16.msra.mxu1 %v9939_v20  ;;  %v10037_v19 = vld [vmem:[%s14296_s1 + $0x814] ss:$12 sps:$4 sm:$0xff]   ;;  %v10032_v20 = vld [vmem:[%s14296_s1 + $0x690] ss:$12 sps:$4 sm:$0xff]  }
  0x5b   : > { %6204 = vmatprep.subr.bf16.mxu1 %v9947_v22  ;;  %v10035_v22 = vld [vmem:[%s14296_s1 + $0x810] ss:$12 sps:$4 sm:$0xff]  }
  0x5d   : > { %6152 = vmatpush1.bf16.msra.mxu0 %v9942_v21  ;;  %v10043_v21 = vld [vmem:[%s14296_s1 + $0x67c] ss:$12 sps:$4 sm:$0xff]  }
  0x5e   : > { %6153 = vmatprep.subr.bf16.mxu0 %v9950_v25  ;;  %6205 = vmatpush1.bf16.msra.mxu1 %v9945_v23  ;;  %v10040_v23 = vld [vmem:[%s11272_s26 + $0x118] ss:$132 sps:$4 sm:$0xff]  }
  0x5f   : > { %6206 = vmatprep.subr.bf16.mxu1 %v9953_v26  ;;  %v10041_v25 = vld [vmem:[%s14296_s1 + $0x678] ss:$12 sps:$4 sm:$0xff]  }
  0x60   : > { %v10046_v26 = vld [vmem:[%s11272_s26 + $0x120] ss:$132 sps:$4 sm:$0xff]  }
  0x61   : > { %6154 = vmatpush1.bf16.msra.mxu0 %v9948_v29  ;;  %v10055_v29 = vld [vmem:[%s14296_s1 + $0x7e4] ss:$12 sps:$4 sm:$0xff]  }
  0x62   : > { %6155 = vmatprep.subr.bf16.mxu0 %v9956_v31  ;;  %6207 = vmatpush1.bf16.msra.mxu1 %v9951_v32  ;;  %v10130_v31 = vld [vmem:[%s11272_s26 + $0x24] ss:$132 sps:$4 sm:$0xff]   ;;  %v10058_v32 = vld [vmem:[%s14296_s1 + $0x64c] ss:$12 sps:$4 sm:$0xff]  }
  0x63   : > { %6208 = vmatprep.subr.bf16.mxu1 %v9959_v33  ;;  %v10053_v33 = vld [vmem:[%s14296_s1 + $0x7e0] ss:$12 sps:$4 sm:$0xff]  }
  0x65   : > { %6156 = vmatpush1.bf16.msra.mxu0 %v9954_v34  ;;  %v10061_v34 = vld [vmem:[%s14296_s1 + $0x7cc] ss:$12 sps:$4 sm:$0xff]  }
  0x66   : > { %6157 = vmatprep.subr.bf16.mxu0 %v9962_v35  ;;  %6209 = vmatpush1.bf16.msra.mxu1 %v9957_v36  ;;  %v10136_v35 = vld [vmem:[%s11272_s26 + $0x2c] ss:$132 sps:$4 sm:$0xff]   ;;  %v10056_v36 = vld [vmem:[%s14296_s1 + $0x648] ss:$12 sps:$4 sm:$0xff]  }
  0x67   : > { %6210 = vmatprep.subr.bf16.mxu1 %v9965_v37  ;;  %v10064_v37 = vld [vmem:[%s14296_s1 + $0x634] ss:$12 sps:$4 sm:$0xff]  }
  0x69   : > { %6158 = vmatpush1.bf16.msra.mxu0 %v9960_v38  ;;  %v10059_v38 = vld [vmem:[%s14296_s1 + $0x7c8] ss:$12 sps:$4 sm:$0xff]  }
  0x6a   : > { %6159 = vmatprep.subr.bf16.mxu0 %v9968_v40  ;;  %6211 = vmatpush1.bf16.msra.mxu1 %v9963_v41  ;;  %v10062_v40 = vld [vmem:[%s14296_s1 + $0x630] ss:$12 sps:$4 sm:$0xff]  }
  0x6b   : > { %6212 = vmatprep.subr.bf16.mxu1 %v9971_v42  ;;  %v10070_v41 = vld [vmem:[%s14296_s1 + $0x61c] ss:$12 sps:$4 sm:$0xff]  }
  0x6c   : > { %v10065_v42 = vld [vmem:[%s14296_s1 + $0x7b0] ss:$12 sps:$4 sm:$0xff]  }
  0x6d   : > { %6160 = vmatpush2.bf16.msra.mxu0 %v9966_v44  ;;  %v10068_v44 = vld [vmem:[%s14296_s1 + $0x618] ss:$12 sps:$4 sm:$0xff]  }
  0x6e   : > { %6161 = vmatprep.subr.bf16.mxu0 %v9974_v45  ;;  %6213 = vmatpush2.bf16.msra.mxu1 %v9969_v46  ;;  %v10076_v45 = vld [vmem:[%s14296_s1 + $0x604] ss:$12 sps:$4 sm:$0xff]  }
  0x6f   : > { %6214 = vmatprep.subr.bf16.mxu1 %v9977_v47  ;;  %v10071_v46 = vld [vmem:[%s14296_s1 + $0x798] ss:$12 sps:$4 sm:$0xff]  }
  0x70   : > { %v10079_v47 = vld [vmem:[%s14296_s1 + $0x784] ss:$12 sps:$4 sm:$0xff]  }
  0x71   : > { %6162 = vmatpush2.bf16.msra.mxu0 %v9972_v48  ;;  %v10074_v48 = vld [vmem:[%s14296_s1 + $0x600] ss:$12 sps:$4 sm:$0xff]  }
  0x72   : > { %6163 = vmatprep.subr.bf16.mxu0 %v9980_v49  ;;  %6215 = vmatpush2.bf16.msra.mxu1 %v9975_v50  ;;  %v10082_v49 = vld [vmem:[%s14296_s1 + $0x76c] ss:$12 sps:$4 sm:$0xff]  }
  0x73   : > { %6216 = vmatprep.subr.bf16.mxu1 %v9983_v51  ;;  %v10077_v50 = vld [vmem:[%s14296_s1 + $0x780] ss:$12 sps:$4 sm:$0xff]  }
  0x74   : > { %v10085_v51 = vld [vmem:[%s14296_s1 + $0x8ec] ss:$12 sps:$4 sm:$0xff]  }
  0x75   : > { %6164 = vmatpush2.bf16.msra.mxu0 %v9978_v52  ;;  %v10080_v52 = vld [vmem:[%s14296_s1 + $0x768] ss:$12 sps:$4 sm:$0xff]  }
  0x76   : > { %6165 = vmatprep.subr.bf16.mxu0 %v9986_v53  ;;  %6217 = vmatpush2.bf16.msra.mxu1 %v9981_v54  ;;  %v10088_v53 = vld [vmem:[%s14296_s1 + $0x754] ss:$12 sps:$4 sm:$0xff]  }
  0x77   : > { %6218 = vmatprep.subr.bf16.mxu1 %v9989_v55  ;;  %v10083_v54 = vld [vmem:[%s14296_s1 + $0x8e8] ss:$12 sps:$4 sm:$0xff]  }
  0x78   : > { %v10091_v55 = vld [vmem:[%s14296_s1 + $0x8d4] ss:$12 sps:$4 sm:$0xff]  }
  0x79   : > { %6166 = vmatpush2.bf16.msra.mxu0 %v9984_v56  ;;  %v10086_v56 = vld [vmem:[%s14296_s1 + $0x750] ss:$12 sps:$4 sm:$0xff]  }
  0x7a   : > { %6167 = vmatprep.subr.bf16.mxu0 %v9992_v57  ;;  %6219 = vmatpush2.bf16.msra.mxu1 %v9987_v58  ;;  %v10094_v57 = vld [vmem:[%s14296_s1 + $0x73c] ss:$12 sps:$4 sm:$0xff]  }
  0x7b   : > { %6220 = vmatprep.subr.bf16.mxu1 %v9997_v59  ;;  %v10089_v58 = vld [vmem:[%s14296_s1 + $0x8d0] ss:$12 sps:$4 sm:$0xff]  }
  0x7c   : > { %v10097_v59 = vld [vmem:[%s14296_s1 + $0x8bc] ss:$12 sps:$4 sm:$0xff]  }
  0x7d   : > { %6168 = vmatpush2.bf16.msra.mxu0 %v9990_v60  ;;  %v10092_v60 = vld [vmem:[%s14296_s1 + $0x738] ss:$12 sps:$4 sm:$0xff]  }
  0x7e   : > { %6169 = vmatprep.subr.bf16.mxu0 %v10003_v61  ;;  %6221 = vmatpush2.bf16.msra.mxu1 %v9995_v62  ;;  %v10100_v61 = vld [vmem:[%s14296_s1 + $0x724] ss:$12 sps:$4 sm:$0xff]  }
  0x7f   : > { %6222 = vmatprep.subr.bf16.mxu1 %v10007_v63  ;;  %v10095_v62 = vld [vmem:[%s14296_s1 + $0x8b8] ss:$12 sps:$4 sm:$0xff]  }
  0x80   : > { %v10103_v63 = vld [vmem:[%s14296_s1 + $0x8a4] ss:$12 sps:$4 sm:$0xff]  }
  0x81   : > { %6170 = vmatpush2.bf16.msra.mxu0 %v10001_v0  ;;  %v10098_v0 = vld [vmem:[%s14296_s1 + $0x720] ss:$12 sps:$4 sm:$0xff]  }
  0x82   : > { %6171 = vmatprep.subr.bf16.mxu0 %v10010_v1  ;;  %6223 = vmatpush2.bf16.msra.mxu1 %v10005_v2  ;;  %v10106_v1 = vld [vmem:[%s14296_s1 + $0x70c] ss:$12 sps:$4 sm:$0xff]  }
  0x83   : > { %6224 = vmatprep.subr.bf16.mxu1 %v10013_v3  ;;  %v10101_v2 = vld [vmem:[%s14296_s1 + $0x8a0] ss:$12 sps:$4 sm:$0xff]  }
  0x84   : > { %v10109_v3 = vld [vmem:[%s14296_s1 + $0x88c] ss:$12 sps:$4 sm:$0xff]  }
  0x85   : > { %6172 = vmatpush2.bf16.msra.mxu0 %v10008_v4  ;;  %v10104_v4 = vld [vmem:[%s14296_s1 + $0x708] ss:$12 sps:$4 sm:$0xff]  }
  0x86   : > { %6173 = vmatprep.subr.bf16.mxu0 %v10016_v5  ;;  %6225 = vmatpush2.bf16.msra.mxu1 %v10011_v6  ;;  %v10112_v5 = vld [vmem:[%s14296_s1 + $0x6f4] ss:$12 sps:$4 sm:$0xff]  }
  0x87   : > { %6226 = vmatprep.subr.bf16.mxu1 %v10019_v7  ;;  %v10107_v6 = vld [vmem:[%s14296_s1 + $0x888] ss:$12 sps:$4 sm:$0xff]  }
  0x88   : > { %v10115_v7 = vld [vmem:[%s14296_s1 + $0x874] ss:$12 sps:$4 sm:$0xff]  }
  0x89   : > { %6174 = vmatpush2.bf16.msra.mxu0 %v10014_v8  ;;  %v10110_v8 = vld [vmem:[%s14296_s1 + $0x6f0] ss:$12 sps:$4 sm:$0xff]  }
  0x8a   : > { %6249 = vmatprep.subr.bf16.mxu0 %v10025_v11  ;;  %6227 = vmatpush2.bf16.msra.mxu1 %v10017_v9  ;;  %v10118_v9 = vld [vmem:[%s14296_s1 + $0x6dc] ss:$12 sps:$4 sm:$0xff]  }
  0x8b   : > { %6302 = vmatprep.subr.bf16.mxu1 %v10031_v14  ;;  %v10121_v11 = vld [vmem:[%s14296_s1 + $0x85c] ss:$12 sps:$4 sm:$0xff]   ;;  %v10119_v14 = vld [vmem:[%s14296_s1 + $0x858] ss:$12 sps:$4 sm:$0xff]  }
  0x8c   : > { %6176 = vmatmul.mubr.bf16.vlgmr.msra.gmra.mxu0 %v10020_v10  ;;  %v10113_v10 = vld [vmem:[%s14296_s1 + $0x870] ss:$12 sps:$4 sm:$0xff]  }
  0x8d   : > { %6250 = vmatpush1.bf16.msra.mxu0 %v10023_v12  ;;  %6185 = vmatprep.mubr.bf16.mxu0 %v10038_v16  ;;  %v10116_v12 = vld [vmem:[%s14296_s1 + $0x6d8] ss:$12 sps:$4 sm:$0xff]   ;;  %v10122_v16 = vld [vmem:[%s14296_s1 + $0x6c0] ss:$12 sps:$4 sm:$0xff]  }
  0x8e   : > { %6229 = vmatmul.mubr.bf16.vlgmr.msra.gmra.mxu1 %v10026_v13  ;;  %6251 = vmatprep.subr.bf16.mxu0 %v10034_v17  ;;  %v10124_v13 = vld [vmem:[%s14296_s1 + $0x6c4] ss:$12 sps:$4 sm:$0xff]   ;;  %v10125_v17 = vld [vmem:[%s14296_s1 + $0x840] ss:$12 sps:$4 sm:$0xff]  }
  0x8f   : > { %6303 = vmatpush1.bf16.msra.mxu1 %v10029_v15  ;;  %6238 = vmatprep.mubr.bf16.mxu1 %v10044_v18  ;;  %v10127_v15 = vld [vmem:[%s14296_s1 + $0x844] ss:$12 sps:$4 sm:$0xff]   ;;  %v10133_v18 = vld [vmem:[%s14296_s1 + $0x9ac] ss:$12 sps:$4 sm:$0xff]  }
  0x90   : > { %6304 = vmatprep.subr.bf16.mxu1 %v10037_v19  ;;  %v10128_v19 = vld [vmem:[%s11272_s26 + $0x20] ss:$132 sps:$4 sm:$0xff]  }
  0x91   : > { %6252 = vmatpush1.bf16.msra.mxu0 %v10032_v20  ;;  %v10131_v20 = vld [vmem:[%s14296_s1 + $0x9a8] ss:$12 sps:$4 sm:$0xff]  }
  0x92   : > { %6253 = vmatprep.subr.bf16.mxu0 %v10043_v21  ;;  %v10134_v21 = vld [vmem:[%s11272_s26 + $0x28] ss:$132 sps:$4 sm:$0xff]  }
  0x93   : > { %6305 = vmatpush1.bf16.msra.mxu1 %v10035_v22  ;;  %v10139_v22 = vld [vmem:[%s14296_s1 + $0xb2c] ss:$12 sps:$4 sm:$0xff]  }
  0x94   : > { %6186 = vmatmul.mubr.bf16.gmra.mxu0 %v10040_v23  ;;  %6306 = vmatprep.subr.bf16.mxu1 %v10049_v24  ;;  %v10146_v23 = vld [vmem:[%s11272_s26 + $0x12c] ss:$132 sps:$4 sm:$0xff]   ;;  %v10142_v24 = vld [vmem:[%s14296_s1 + $0x994] ss:$12 sps:$4 sm:$0xff]  }
  0x95   : > { %6254 = vmatpush1.bf16.msra.mxu0 %v10041_v25  ;;  %6281 = vmatprep.mubr.bf16.mxu0 %v10130_v31  ;;  %v10137_v25 = vld [vmem:[%s14296_s1 + $0xb28] ss:$12 sps:$4 sm:$0xff]  }
  0x96   : > { %6239 = vmatmul.mubr.bf16.gmra.mxu1 %v10046_v26  ;;  %6255 = vmatprep.subr.bf16.mxu0 %v10052_v27  ;;  %v10152_v26 = vld [vmem:[%s11272_s26 + $0x134] ss:$132 sps:$4 sm:$0xff]   ;;  %v10140_v27 = vld [vmem:[%s14296_s1 + $0x990] ss:$12 sps:$4 sm:$0xff]   ;;  %v10148_v31 = vld [vmem:[%s11272_s26 + $0x128] ss:$132 sps:$4 sm:$0xff]  }
  0x97   : > { %6307 = vmatpush1.bf16.msra.mxu1 %v10047_v28  ;;  %6334 = vmatprep.mubr.bf16.mxu1 %v10136_v35  ;;  %v10145_v28 = vld [vmem:[%s14296_s1 + $0xb14] ss:$12 sps:$4 sm:$0xff]  }
  0x98   : > { %6308 = vmatprep.subr.bf16.mxu1 %v10055_v29  ;;  %v10143_v29 = vld [vmem:[%s14296_s1 + $0xb10] ss:$12 sps:$4 sm:$0xff]   ;;  %v10238_v35 = vld [vmem:[%s11272_s26 + $0x34] ss:$132 sps:$4 sm:$0xff]  }
  0x99   : > { %6256 = vmatpush1.bf16.msra.mxu0 %v10050_v30  ;;  %v10151_v30 = vld [vmem:[%s14296_s1 + $0x97c] ss:$12 sps:$4 sm:$0xff]  }
  0x9a   : > { %6257 = vmatprep.subr.bf16.mxu0 %v10058_v32  ;;  %v10149_v32 = vld [vmem:[%s14296_s1 + $0x978] ss:$12 sps:$4 sm:$0xff]  }
  0x9b   : > { %6309 = vmatpush1.bf16.msra.mxu1 %v10053_v33  ;;  %v10154_v33 = vld [vmem:[%s11272_s26 + $0x130] ss:$132 sps:$4 sm:$0xff]  }
  0x9c   : > { %6310 = vmatprep.subr.bf16.mxu1 %v10061_v34  ;;  %v10157_v34 = vld [vmem:[%s14296_s1 + $0xafc] ss:$12 sps:$4 sm:$0xff]  }
  0x9d   : > { %6258 = vmatpush1.bf16.msra.mxu0 %v10056_v36  ;;  %v10160_v36 = vld [vmem:[%s14296_s1 + $0x964] ss:$12 sps:$4 sm:$0xff]  }
  0x9e   : > { %6259 = vmatprep.subr.bf16.mxu0 %v10064_v37  ;;  %v10155_v37 = vld [vmem:[%s14296_s1 + $0xaf8] ss:$12 sps:$4 sm:$0xff]  }
  0x9f   : > { %6311 = vmatpush1.bf16.msra.mxu1 %v10059_v38  ;;  %v10244_v38 = vld [vmem:[%s11272_s26 + $0x3c] ss:$132 sps:$4 sm:$0xff]  }
  0xa0   : > { %6312 = vmatprep.subr.bf16.mxu1 %v10067_v39  ;;  %v10163_v39 = vld [vmem:[%s14296_s1 + $0xae4] ss:$12 sps:$4 sm:$0xff]  }
  0xa1   : > { %6260 = vmatpush1.bf16.msra.mxu0 %v10062_v40  ;;  %v10158_v40 = vld [vmem:[%s14296_s1 + $0x960] ss:$12 sps:$4 sm:$0xff]  }
  0xa2   : > { %6261 = vmatprep.subr.bf16.mxu0 %v10070_v41  ;;  %v10166_v41 = vld [vmem:[%s14296_s1 + $0x94c] ss:$12 sps:$4 sm:$0xff]  }
  0xa3   : > { %6313 = vmatpush1.bf16.msra.mxu1 %v10065_v42  ;;  %v10161_v42 = vld [vmem:[%s14296_s1 + $0xae0] ss:$12 sps:$4 sm:$0xff]  }
  0xa4   : > { %6314 = vmatprep.subr.bf16.mxu1 %v10073_v43  ;;  %v10169_v43 = vld [vmem:[%s14296_s1 + $0xacc] ss:$12 sps:$4 sm:$0xff]  }
  0xa5   : > { %6262 = vmatpush1.bf16.msra.mxu0 %v10068_v44  ;;  %v10164_v44 = vld [vmem:[%s14296_s1 + $0x948] ss:$12 sps:$4 sm:$0xff]  }
  0xa6   : > { %6263 = vmatprep.subr.bf16.mxu0 %v10076_v45  ;;  %v10172_v45 = vld [vmem:[%s14296_s1 + $0x934] ss:$12 sps:$4 sm:$0xff]  }
  0xa7   : > { %6315 = vmatpush1.bf16.msra.mxu1 %v10071_v46  ;;  %v10167_v46 = vld [vmem:[%s14296_s1 + $0xac8] ss:$12 sps:$4 sm:$0xff]  }
  0xa8   : > { %6316 = vmatprep.subr.bf16.mxu1 %v10079_v47  ;;  %v10175_v47 = vld [vmem:[%s14296_s1 + $0xab4] ss:$12 sps:$4 sm:$0xff]  }
  0xa9   : > { %6264 = vmatpush1.bf16.msra.mxu0 %v10074_v48  ;;  %v10170_v48 = vld [vmem:[%s14296_s1 + $0x930] ss:$12 sps:$4 sm:$0xff]  }
  0xaa   : > { %6265 = vmatprep.subr.bf16.mxu0 %v10082_v49  ;;  %v10178_v49 = vld [vmem:[%s14296_s1 + $0x91c] ss:$12 sps:$4 sm:$0xff]  }
  0xab   : > { %6317 = vmatpush1.bf16.msra.mxu1 %v10077_v50  ;;  %v10173_v50 = vld [vmem:[%s14296_s1 + $0xab0] ss:$12 sps:$4 sm:$0xff]  }
  0xac   : > { %6318 = vmatprep.subr.bf16.mxu1 %v10085_v51  ;;  %v10181_v51 = vld [vmem:[%s14296_s1 + $0xa9c] ss:$12 sps:$4 sm:$0xff]  }
  0xad   : > { %6266 = vmatpush2.bf16.msra.mxu0 %v10080_v52  ;;  %v10176_v52 = vld [vmem:[%s14296_s1 + $0x918] ss:$12 sps:$4 sm:$0xff]  }
  0xae   : > { %6267 = vmatprep.subr.bf16.mxu0 %v10088_v53  ;;  %v10184_v53 = vld [vmem:[%s14296_s1 + $0x904] ss:$12 sps:$4 sm:$0xff]  }
  0xaf   : > { %6319 = vmatpush2.bf16.msra.mxu1 %v10083_v54  ;;  %v10179_v54 = vld [vmem:[%s14296_s1 + $0xa98] ss:$12 sps:$4 sm:$0xff]  }
  0xb0   : > { %6320 = vmatprep.subr.bf16.mxu1 %v10091_v55  ;;  %v10187_v55 = vld [vmem:[%s14296_s1 + $0xa84] ss:$12 sps:$4 sm:$0xff]  }
  0xb1   : > { %6268 = vmatpush2.bf16.msra.mxu0 %v10086_v56  ;;  %v10182_v56 = vld [vmem:[%s14296_s1 + $0x900] ss:$12 sps:$4 sm:$0xff]  }
  0xb2   : > { %6269 = vmatprep.subr.bf16.mxu0 %v10094_v57  ;;  %v10190_v57 = vld [vmem:[%s14296_s1 + $0xa6c] ss:$12 sps:$4 sm:$0xff]  }
  0xb3   : > { %6321 = vmatpush2.bf16.msra.mxu1 %v10089_v58  ;;  %v10185_v58 = vld [vmem:[%s14296_s1 + $0xa80] ss:$12 sps:$4 sm:$0xff]  }
  0xb4   : > { %6322 = vmatprep.subr.bf16.mxu1 %v10097_v59  ;;  %v10193_v59 = vld [vmem:[%s14296_s1 + $0xbec] ss:$12 sps:$4 sm:$0xff]  }
  0xb5   : > { %6270 = vmatpush2.bf16.msra.mxu0 %v10092_v60  ;;  %v10188_v60 = vld [vmem:[%s14296_s1 + $0xa68] ss:$12 sps:$4 sm:$0xff]  }
  0xb6   : > { %6271 = vmatprep.subr.bf16.mxu0 %v10100_v61  ;;  %v10196_v61 = vld [vmem:[%s14296_s1 + $0xa54] ss:$12 sps:$4 sm:$0xff]  }
  0xb7   : > { %6323 = vmatpush2.bf16.msra.mxu1 %v10095_v62  ;;  %v10191_v62 = vld [vmem:[%s14296_s1 + $0xbe8] ss:$12 sps:$4 sm:$0xff]  }
  0xb8   : > { %6324 = vmatprep.subr.bf16.mxu1 %v10103_v63  ;;  %v10199_v63 = vld [vmem:[%s14296_s1 + $0xbd4] ss:$12 sps:$4 sm:$0xff]  }
  0xb9   : > { %6272 = vmatpush2.bf16.msra.mxu0 %v10098_v0  ;;  %v10194_v0 = vld [vmem:[%s14296_s1 + $0xa50] ss:$12 sps:$4 sm:$0xff]  }
  0xba   : > { %6273 = vmatprep.subr.bf16.mxu0 %v10106_v1  ;;  %v10202_v1 = vld [vmem:[%s14296_s1 + $0xa3c] ss:$12 sps:$4 sm:$0xff]  }
  0xbb   : > { %6325 = vmatpush2.bf16.msra.mxu1 %v10101_v2  ;;  %v10197_v2 = vld [vmem:[%s14296_s1 + $0xbd0] ss:$12 sps:$4 sm:$0xff]  }
  0xbc   : > { %6326 = vmatprep.subr.bf16.mxu1 %v10109_v3  ;;  %v10205_v3 = vld [vmem:[%s14296_s1 + $0xbbc] ss:$12 sps:$4 sm:$0xff]  }
  0xbd   : > { %6274 = vmatpush2.bf16.msra.mxu0 %v10104_v4  ;;  %v10200_v4 = vld [vmem:[%s14296_s1 + $0xa38] ss:$12 sps:$4 sm:$0xff]  }
  0xbe   : > { %6275 = vmatprep.subr.bf16.mxu0 %v10112_v5  ;;  %v10208_v5 = vld [vmem:[%s14296_s1 + $0xa24] ss:$12 sps:$4 sm:$0xff]  }
  0xbf   : > { %6327 = vmatpush2.bf16.msra.mxu1 %v10107_v6  ;;  %v10203_v6 = vld [vmem:[%s14296_s1 + $0xbb8] ss:$12 sps:$4 sm:$0xff]  }
  0xc0   : > { %6328 = vmatprep.subr.bf16.mxu1 %v10115_v7  ;;  %v10211_v7 = vld [vmem:[%s14296_s1 + $0xba4] ss:$12 sps:$4 sm:$0xff]  }
  0xc1   : > { %6276 = vmatpush2.bf16.msra.mxu0 %v10110_v8  ;;  %v10206_v8 = vld [vmem:[%s14296_s1 + $0xa20] ss:$12 sps:$4 sm:$0xff]  }
  0xc2   : > { %6277 = vmatprep.subr.bf16.mxu0 %v10118_v9  ;;  %v10214_v9 = vld [vmem:[%s14296_s1 + $0xa0c] ss:$12 sps:$4 sm:$0xff]  }
  0xc3   : > { %6329 = vmatpush2.bf16.msra.mxu1 %v10113_v10  ;;  %v10209_v10 = vld [vmem:[%s14296_s1 + $0xba0] ss:$12 sps:$4 sm:$0xff]  }
  0xc4   : > { %6330 = vmatprep.subr.bf16.mxu1 %v10121_v11  ;;  %v10217_v11 = vld [vmem:[%s14296_s1 + $0xb8c] ss:$12 sps:$4 sm:$0xff]  }
  0xc5   : > { %6278 = vmatpush2.bf16.msra.mxu0 %v10116_v12  ;;  %v10212_v12 = vld [vmem:[%s14296_s1 + $0xa08] ss:$12 sps:$4 sm:$0xff]  }
  0xc6   : > { %6279 = vmatprep.subr.bf16.mxu0 %v10124_v13  ;;  %v10220_v13 = vld [vmem:[%s14296_s1 + $0x9f4] ss:$12 sps:$4 sm:$0xff]  }
  0xc7   : > { %6331 = vmatpush2.bf16.msra.mxu1 %v10119_v14  ;;  %v10215_v14 = vld [vmem:[%s14296_s1 + $0xb88] ss:$12 sps:$4 sm:$0xff]  }
  0xc8   : > { %6332 = vmatprep.subr.bf16.mxu1 %v10127_v15  ;;  %v10223_v15 = vld [vmem:[%s14296_s1 + $0xb74] ss:$12 sps:$4 sm:$0xff]  }
  0xc9   : > { %6280 = vmatpush2.bf16.msra.mxu0 %v10122_v16  ;;  %v10218_v16 = vld [vmem:[%s14296_s1 + $0x9f0] ss:$12 sps:$4 sm:$0xff]  }
  0xca   : > { %6355 = vmatprep.subr.bf16.mxu0 %v10133_v18  ;;  %v10226_v18 = vld [vmem:[%s14296_s1 + $0x9dc] ss:$12 sps:$4 sm:$0xff]  }
  0xcb   : > { %6333 = vmatpush2.bf16.msra.mxu1 %v10125_v17  ;;  %v1466_v17 = vlaneseq }
  0xcc   : > { %6282 = vmatmul.mubr.bf16.vlgmr.msra.gmra.mxu0 %v10128_v19  ;;  %6408 = vmatprep.subr.bf16.mxu1 %v10139_v22  ;;  %v10221_v19 = vld [vmem:[%s14296_s1 + $0xb70] ss:$12 sps:$4 sm:$0xff]  }
  0xcd   : > { %6356 = vmatpush1.bf16.msra.mxu0 %v10131_v20  ;;  %6291 = vmatprep.mubr.bf16.mxu0 %v10146_v23  ;;  %v10229_v20 = vld [vmem:[%s14296_s1 + $0xb5c] ss:$12 sps:$4 sm:$0xff]   ;;  %v11921_v22 = vshrl.u32 %v1466_v17, 7  ;;  %v10232_v23 = vld [vmem:[%s14296_s1 + $0x9c4] ss:$12 sps:$4 sm:$0xff]  }
  0xce   : > { %6335 = vmatmul.mubr.bf16.vlgmr.msra.gmra.mxu1 %v10134_v21  ;;  %6357 = vmatprep.subr.bf16.mxu0 %v10142_v24  ;;  %v10224_v21 = vld [vmem:[%s14296_s1 + $0x9d8] ss:$12 sps:$4 sm:$0xff]  }
  0xcf   : > { %6409 = vmatpush1.bf16.msra.mxu1 %v10137_v25  ;;  %6344 = vmatprep.mubr.bf16.mxu1 %v10152_v26  ;;  %v10227_v24 = vld [vmem:[%s14296_s1 + $0xb58] ss:$12 sps:$4 sm:$0xff]   ;;  %v10230_v25 = vld [vmem:[%s14296_s1 + $0x9c0] ss:$12 sps:$4 sm:$0xff]  }
  0xd0   : > { %6410 = vmatprep.subr.bf16.mxu1 %v10145_v28  ;;  %v10235_v26 = vld [vmem:[%s14296_s1 + $0xb44] ss:$12 sps:$4 sm:$0xff]   ;;  %v1464_v28 = vld [vmem:[%s14297_s2] sm:$0x7] }
  0xd1   : > { %6358 = vmatpush1.bf16.msra.mxu0 %v10140_v27  ;;  %v10233_v27 = vld [vmem:[%s14296_s1 + $0xb40] ss:$12 sps:$4 sm:$0xff]  }
  0xd2   : > { %6359 = vmatprep.subr.bf16.mxu0 %v10151_v30  ;;  %v10241_v30 = vld [vmem:[%s14296_s1 + $0xcac] ss:$12 sps:$4 sm:$0xff]  }
  0xd3   : > { %6411 = vmatpush1.bf16.msra.mxu1 %v10143_v29  ;;  %v1468_v29 = vsub.s32 0, %v11921_v22 }
  0xd4   : > { %6292 = vmatmul.mubr.bf16.gmra.mxu0 %v10148_v31  ;;  %6412 = vmatprep.subr.bf16.mxu1 %v10157_v34  ;;  %v10236_v31 = vld [vmem:[%s11272_s26 + $0x30] ss:$132 sps:$4 sm:$0xff]   ;;  %v10242_v34 = vld [vmem:[%s11272_s26 + $0x38] ss:$132 sps:$4 sm:$0xff]  }
  0xd5   : > { %6360 = vmatpush1.bf16.msra.mxu0 %v10149_v32  ;;  %6387 = vmatprep.mubr.bf16.mxu0 %v10238_v35  ;;  %v10239_v32 = vld [vmem:[%s14296_s1 + $0xca8] ss:$12 sps:$4 sm:$0xff]   ;;  %v10247_v35 = vld [vmem:[%s14296_s1 + $0xe2c] ss:$12 sps:$4 sm:$0xff]  }
  0xd6   : > { %6345 = vmatmul.mubr.bf16.gmra.mxu1 %v10154_v33  ;;  %6361 = vmatprep.subr.bf16.mxu0 %v10160_v36  ;;  %v1472_v33 = vsub.s32 1, %v11921_v22  ;;  %v11954_v36 = vrot.slane %v1464_v28, %v1468_v29 }
  0xd7   : > { %6413 = vmatpush1.bf16.msra.mxu1 %v10155_v37  ;;  %6440 = vmatprep.mubr.bf16.mxu1 %v10244_v38  ;;  %v10254_v37 = vld [vmem:[%s11272_s26 + $0x13c] ss:$132 sps:$4 sm:$0xff]  }
  0xd8   : > { %6414 = vmatprep.subr.bf16.mxu1 %v10163_v39  ;;  %v10250_v38 = vld [vmem:[%s14296_s1 + $0xc94] ss:$12 sps:$4 sm:$0xff]   ;;  %v11960_v39 = vrot.slane %v1464_v28, %v1472_v33  ;;  %v10287_v28 = vld [vmem:[%s14296_s1 + $0xd98] ss:$12 sps:$4 sm:$0xff]  }
  0xd9   : > { %6362 = vmatpush1.bf16.msra.mxu0 %v10158_v40  ;;  %v10245_v40 = vld [vmem:[%s14296_s1 + $0xe28] ss:$12 sps:$4 sm:$0xff]   ;;  %v10290_v33 = vld [vmem:[%s14296_s1 + $0xc00] ss:$12 sps:$4 sm:$0xff]  }
  0xda   : > { %6363 = vmatprep.subr.bf16.mxu0 %v10166_v41  ;;  %v10260_v41 = vld [vmem:[%s11272_s26 + $0x144] ss:$132 sps:$4 sm:$0xff]  }
  0xdb   : > { %6415 = vmatpush1.bf16.msra.mxu1 %v10161_v42 }
  0xdc   : > { %6416 = vmatprep.subr.bf16.mxu1 %v10169_v43  ;;  %v10248_v43 = vld [vmem:[%s14296_s1 + $0xc90] ss:$12 sps:$4 sm:$0xff]  }
  0xdd   : > { %6364 = vmatpush1.bf16.msra.mxu0 %v10164_v44  ;;  %v10253_v44 = vld [vmem:[%s14296_s1 + $0xe14] ss:$12 sps:$4 sm:$0xff]  }
  0xde   : > { %6365 = vmatprep.subr.bf16.mxu0 %v10172_v45 }
  0xdf   : > { %6417 = vmatpush1.bf16.msra.mxu1 %v10167_v46  ;;  %v10251_v46 = vld [vmem:[%s14296_s1 + $0xe10] ss:$12 sps:$4 sm:$0xff]  }
  0xe0   : > { %6418 = vmatprep.subr.bf16.mxu1 %v10175_v47 }
  0xe1   : > { %6366 = vmatpush1.bf16.msra.mxu0 %v10170_v48 }
  0xe2   : > { %6367 = vmatprep.subr.bf16.mxu0 %v10178_v49  ;;  %v10259_v49 = vld [vmem:[%s14296_s1 + $0xc7c] ss:$12 sps:$4 sm:$0xff]  }
  0xe3   : > { %6419 = vmatpush1.bf16.msra.mxu1 %v10173_v50 }
  0xe4   : > { %6420 = vmatprep.subr.bf16.mxu1 %v10181_v51 }
  0xe5   : > { %6368 = vmatpush1.bf16.msra.mxu0 %v10176_v52  ;;  %v10256_v52 = vld [vmem:[%s11272_s26 + $0x138] ss:$132 sps:$4 sm:$0xff]  }
  0xe6   : > { %6369 = vmatprep.subr.bf16.mxu0 %v10184_v53  ;;  %v10257_v53 = vld [vmem:[%s14296_s1 + $0xc78] ss:$12 sps:$4 sm:$0xff]  }
  0xe7   : > { %6421 = vmatpush1.bf16.msra.mxu1 %v10179_v54 }
  0xe8   : > { %6422 = vmatprep.subr.bf16.mxu1 %v10187_v55 }
  0xe9   : > { %6370 = vmatpush1.bf16.msra.mxu0 %v10182_v56  ;;  %v10262_v56 = vld [vmem:[%s11272_s26 + $0x140] ss:$132 sps:$4 sm:$0xff]  }
  0xea   : > { %6371 = vmatprep.subr.bf16.mxu0 %v10190_v57  ;;  %v10265_v57 = vld [vmem:[%s14296_s1 + $0xdfc] ss:$12 sps:$4 sm:$0xff]  }
  0xeb   : > { %6423 = vmatpush1.bf16.msra.mxu1 %v10185_v58 }
  0xec   : > { %6424 = vmatprep.subr.bf16.mxu1 %v10193_v59 }
  0xed   : > { %6372 = vmatpush2.bf16.msra.mxu0 %v10188_v60  ;;  %v10346_v60 = vld [vmem:[%s11272_s26 + $0x44] ss:$132 sps:$4 sm:$0xff]  }
  0xee   : > { %6373 = vmatprep.subr.bf16.mxu0 %v10196_v61 }
  0xef   : > { %6425 = vmatpush2.bf16.msra.mxu1 %v10191_v62  ;;  %v10268_v62 = vld [vmem:[%s14296_s1 + $0xc64] ss:$12 sps:$4 sm:$0xff]  }
  0xf0   : > { %6426 = vmatprep.subr.bf16.mxu1 %v10199_v63 }
  0xf1   : > { %6374 = vmatpush2.bf16.msra.mxu0 %v10194_v0  ;;  %v10263_v0 = vld [vmem:[%s14296_s1 + $0xdf8] ss:$12 sps:$4 sm:$0xff]  }
  0xf2   : > { %6375 = vmatprep.subr.bf16.mxu0 %v10202_v1  ;;  %v10352_v1 = vld [vmem:[%s11272_s26 + $0x4c] ss:$132 sps:$4 sm:$0xff]  }
  0xf3   : > { %6427 = vmatpush2.bf16.msra.mxu1 %v10197_v2  ;;  %v10271_v2 = vld [vmem:[%s14296_s1 + $0xde4] ss:$12 sps:$4 sm:$0xff]  }
  0xf4   : > { %6428 = vmatprep.subr.bf16.mxu1 %v10205_v3  ;;  %v10266_v3 = vld [vmem:[%s14296_s1 + $0xc60] ss:$12 sps:$4 sm:$0xff]  }
  0xf5   : > { %6376 = vmatpush2.bf16.msra.mxu0 %v10200_v4  ;;  %v10274_v4 = vld [vmem:[%s14296_s1 + $0xc4c] ss:$12 sps:$4 sm:$0xff]  }
  0xf6   : > { %6377 = vmatprep.subr.bf16.mxu0 %v10208_v5  ;;  %v10269_v5 = vld [vmem:[%s14296_s1 + $0xde0] ss:$12 sps:$4 sm:$0xff]  }
  0xf7   : > { %6429 = vmatpush2.bf16.msra.mxu1 %v10203_v6  ;;  %v10277_v6 = vld [vmem:[%s14296_s1 + $0xdcc] ss:$12 sps:$4 sm:$0xff]  }
  0xf8   : > { %6430 = vmatprep.subr.bf16.mxu1 %v10211_v7  ;;  %v10272_v7 = vld [vmem:[%s14296_s1 + $0xc48] ss:$12 sps:$4 sm:$0xff]  }
  0xf9   : > { %6378 = vmatpush2.bf16.msra.mxu0 %v10206_v8  ;;  %v10280_v8 = vld [vmem:[%s14296_s1 + $0xc34] ss:$12 sps:$4 sm:$0xff]  }
  0xfa   : > { %6379 = vmatprep.subr.bf16.mxu0 %v10214_v9  ;;  %v10275_v9 = vld [vmem:[%s14296_s1 + $0xdc8] ss:$12 sps:$4 sm:$0xff]  }
  0xfb   : > { %6431 = vmatpush2.bf16.msra.mxu1 %v10209_v10 }
  0xfc   : > { %6432 = vmatprep.subr.bf16.mxu1 %v10217_v11  ;;  %v10283_v11 = vld [vmem:[%s14296_s1 + $0xdb4] ss:$12 sps:$4 sm:$0xff]  }
  0xfd   : > { %6380 = vmatpush2.bf16.msra.mxu0 %v10212_v12  ;;  %v10278_v12 = vld [vmem:[%s14296_s1 + $0xc30] ss:$12 sps:$4 sm:$0xff]  }
  0xfe   : > { %6381 = vmatprep.subr.bf16.mxu0 %v10220_v13 }
  0xff   : > { %6433 = vmatpush2.bf16.msra.mxu1 %v10215_v14  ;;  %v10286_v14 = vld [vmem:[%s14296_s1 + $0xc1c] ss:$12 sps:$4 sm:$0xff]  }
 0x100   : > { %6434 = vmatprep.subr.bf16.mxu1 %v10223_v15 }
 0x101   : > { %6382 = vmatpush2.bf16.msra.mxu0 %v10218_v16  ;;  %v10281_v16 = vld [vmem:[%s14296_s1 + $0xdb0] ss:$12 sps:$4 sm:$0xff]  }
 0x102   : > { %6383 = vmatprep.subr.bf16.mxu0 %v10226_v18  ;;  %v10289_v18 = vld [vmem:[%s14296_s1 + $0xd9c] ss:$12 sps:$4 sm:$0xff]  }
 0x103   : > { %6435 = vmatpush2.bf16.msra.mxu1 %v10221_v19 }
 0x104   : > { %6436 = vmatprep.subr.bf16.mxu1 %v10229_v20 }
 0x105   : > { %6384 = vmatpush2.bf16.msra.mxu0 %v10224_v21  ;;  %v10284_v21 = vld [vmem:[%s14296_s1 + $0xc18] ss:$12 sps:$4 sm:$0xff]  }
 0x106   : > { %6385 = vmatprep.subr.bf16.mxu0 %v10232_v23 }
 0x107   : > { %6437 = vmatpush2.bf16.msra.mxu1 %v10227_v24 }
 0x108   : > { %6438 = vmatprep.subr.bf16.mxu1 %v10235_v26 }
 0x109   : > { %6386 = vmatpush2.bf16.msra.mxu0 %v10230_v25  ;;  %v10292_v25 = vld [vmem:[%s14296_s1 + $0xc04] ss:$12 sps:$4 sm:$0xff]  }
 0x10a   : > { %6461 = vmatprep.subr.bf16.mxu0 %v10241_v30 }
 0x10b   : > { %6439 = vmatpush2.bf16.msra.mxu1 %v10233_v27 }
 0x10c   : > { %v6071_v42 = vpop.f32.mrf.mxu0  ;;  %6388 = vmatmul.mubr.bf16.vlgmr.msra.gmra.mxu0 %v10236_v31  ;;  %6514 = vmatprep.subr.bf16.mxu1 %v10247_v35  ;;  %v10295_v31 = vld [vmem:[%s14296_s1 + $0xd84] ss:$12 sps:$4 sm:$0xff]   ;;  %v10298_v35 = vld [vmem:[%s14296_s1 + $0xd6c] ss:$12 sps:$4 sm:$0xff]  }
 0x10d   : > { %v6072_v45 = vadd.f32 %v6071_v42, %v11954_v36  ;;  %6462 = vmatpush1.bf16.msra.mxu0 %v10239_v32  ;;  %6397 = vmatprep.mubr.bf16.mxu0 %v10254_v37  ;;  %v6124_v48 = vpop.f32.mrf.mxu1  ;;  %v10301_v37 = vld [vmem:[%s14296_s1 + $0xeec] ss:$12 sps:$4 sm:$0xff]   ;;  %v10307_v42 = vld [vmem:[%s14296_s1 + $0xed4] ss:$12 sps:$4 sm:$0xff]  }
 0x10e   : > { %v6073_v47 = vpop.f32.mrf.mxu0  ;;  %6441 = vmatmul.mubr.bf16.vlgmr.msra.gmra.mxu1 %v10242_v34  ;;  %6463 = vmatprep.subr.bf16.mxu0 %v10250_v38  ;;  %v10296_v38 = vld [vmem:[%s14296_s1 + $0xd68] ss:$12 sps:$4 sm:$0xff]  }
 0x10f   : > { %v6074_v50 = vadd.f32 %v6073_v47, %v11960_v39  ;;  %v11980_v51 = vadd.f32 %v6124_v48, %v6072_v45  ;;  %6515 = vmatpush1.bf16.msra.mxu1 %v10245_v40  ;;  %6450 = vmatprep.mubr.bf16.mxu1 %v10260_v41  ;;  %v6126_v55 = vpop.f32.mrf.mxu1  ;;  %v10304_v40 = vld [vmem:[%s14296_s1 + $0xd54] ss:$12 sps:$4 sm:$0xff]   ;;  %v10305_v45 = vld [vmem:[%s14296_s1 + $0xed0] ss:$12 sps:$4 sm:$0xff]   ;;  %v10308_v47 = vld [vmem:[%s14296_s1 + $0xd38] ss:$12 sps:$4 sm:$0xff]  }
 0x110   : > { %v6075_v54 = vpop.f32.mrf.mxu0  ;;  %6516 = vmatprep.subr.bf16.mxu1 %v10253_v44  ;;  %v10299_v41 = vld [vmem:[%s14296_s1 + $0xee8] ss:$12 sps:$4 sm:$0xff]   ;;  %v10316_v48 = vld [vmem:[%s14296_s1 + $0xd24] ss:$12 sps:$4 sm:$0xff]  }
 0x111   : > { %v6076_v58 = vadd.f32 %v6075_v54, %v11954_v36  ;;  %v11991_v59 = vadd.f32 %v6126_v55, %v6074_v50  ;;  %6464 = vmatpush1.bf16.msra.mxu0 %v10248_v43  ;;  %v6128_v61 = vpop.f32.mrf.mxu1  ;;  %v10302_v43 = vld [vmem:[%s14296_s1 + $0xd50] ss:$12 sps:$4 sm:$0xff]   ;;  %v10317_v54 = vld [vmem:[%s14296_s1 + $0xea0] ss:$12 sps:$4 sm:$0xff]  }
 0x112   : > { %6465 = vmatprep.subr.bf16.mxu0 %v10259_v49  ;;  %v12027_v10 = vpop.f32.mrf.mxu0  ;;  %v10310_v44 = vld [vmem:[%s14296_s1 + $0xd3c] ss:$12 sps:$4 sm:$0xff]   ;;  %v10311_v49 = vld [vmem:[%s14296_s1 + $0xeb8] ss:$12 sps:$4 sm:$0xff]  }
 0x113   : > { %v11997_v63 = vadd.f32 %v6128_v61, %v6076_v58  ;;  %6517 = vmatpush1.bf16.msra.mxu1 %v10251_v46  ;;  %v12035_v13 = vpop.f32.mrf.mxu1  ;;  %v10313_v46 = vld [vmem:[%s14296_s1 + $0xebc] ss:$12 sps:$4 sm:$0xff]   ;;  %v10319_v50 = vld [vmem:[%s14296_s1 + $0xea4] ss:$12 sps:$4 sm:$0xff]   ;;  %v10325_v55 = vld [vmem:[%s14296_s1 + $0xe8c] ss:$12 sps:$4 sm:$0xff]  }
 0x114   : > { %6398 = vmatmul.mubr.bf16.gmra.mxu0 %v10256_v52  ;;  %6518 = vmatprep.subr.bf16.mxu1 %v10265_v57  ;;  %v6081_v15 = vpop.f32.mrf.mxu0  ;;  %v10314_v52 = vld [vmem:[%s14296_s1 + $0xd20] ss:$12 sps:$4 sm:$0xff]   ;;  %v10323_v58 = vld [vmem:[%s14296_s1 + $0xe88] ss:$12 sps:$4 sm:$0xff]   ;;  %v10326_v61 = vld [vmem:[%s14296_s1 + $0xcf0] ss:$12 sps:$4 sm:$0xff]  }
 0x115   : > { %6466 = vmatpush1.bf16.msra.mxu0 %v10257_v53  ;;  %6493 = vmatprep.mubr.bf16.mxu0 %v10346_v60  ;;  %v6082_v17 = vadd.f32 %v6081_v15, %v11954_v36  ;;  %v6134_v20 = vpop.f32.mrf.mxu1  ;;  %v10322_v53 = vld [vmem:[%s14296_s1 + $0xd0c] ss:$12 sps:$4 sm:$0xff]   ;;  %v10328_v57 = vld [vmem:[%s14296_s1 + $0xcf4] ss:$12 sps:$4 sm:$0xff]  }
 0x116   : > { %6451 = vmatmul.mubr.bf16.gmra.mxu1 %v10262_v56  ;;  %6467 = vmatprep.subr.bf16.mxu0 %v10268_v62  ;;  %v6083_v19 = vpop.f32.mrf.mxu0  ;;  %v10320_v56 = vld [vmem:[%s14296_s1 + $0xd08] ss:$12 sps:$4 sm:$0xff]   ;;  %v10362_v15 = vld [vmem:[%s11272_s26 + $0x14c] ss:$132 sps:$4 sm:$0xff]  }
 0x117   : > { %6519 = vmatpush1.bf16.msra.mxu1 %v10263_v0  ;;  %6546 = vmatprep.mubr.bf16.mxu1 %v10352_v1  ;;  %v6084_v23 = vadd.f32 %v6083_v19, %v11960_v39  ;;  %v12051_v24 = vadd.f32 %v6134_v20, %v6082_v17  ;;  %v6136_v27 = vpop.f32.mrf.mxu1  ;;  %v10331_v60 = vld [vmem:[%s14296_s1 + $0xe74] ss:$12 sps:$4 sm:$0xff]   ;;  %v10334_v62 = vld [vmem:[%s14296_s1 + $0xcdc] ss:$12 sps:$4 sm:$0xff]  }
 0x118   : > { %6520 = vmatprep.subr.bf16.mxu1 %v10271_v2  ;;  %v6085_v26 = vpop.f32.mrf.mxu0  ;;  %v10329_v0 = vld [vmem:[%s14296_s1 + $0xe70] ss:$12 sps:$4 sm:$0xff]   ;;  %v10332_v2 = vld [vmem:[%s14296_s1 + $0xcd8] ss:$12 sps:$4 sm:$0xff]   ;;  %v10358_v17 = vld [vmem:[%s14296_s1 + $0xf94] ss:$12 sps:$4 sm:$0xff]  }
 0x119   : > { %6468 = vmatpush1.bf16.msra.mxu0 %v10266_v3  ;;  %v6086_v29 = vadd.f32 %v6085_v26, %v11954_v36  ;;  %v12060_v30 = vadd.f32 %v6136_v27, %v6084_v23  ;;  %v6138_v32 = vpop.f32.mrf.mxu1  ;;  %v10293_v36 = vld [vmem:[%s14296_s1 + $0xd80] ss:$12 sps:$4 sm:$0xff]   ;;  %v10337_v1 = vld [vmem:[%s14296_s1 + $0xe5c] ss:$12 sps:$4 sm:$0xff]   ;;  %v10340_v3 = vld [vmem:[%s14296_s1 + $0xcc4] ss:$12 sps:$4 sm:$0xff]  }
 0x11a   : > { %6469 = vmatprep.subr.bf16.mxu0 %v10274_v4  ;;  %v10335_v4 = vld [vmem:[%s14296_s1 + $0xe58] ss:$12 sps:$4 sm:$0xff]   ;;  %v10356_v23 = vld [vmem:[%s14296_s1 + $0xf90] ss:$12 sps:$4 sm:$0xff]  }
 0x11b   : > { %6521 = vmatpush1.bf16.msra.mxu1 %v10269_v5  ;;  %v12068_v34 = vadd.f32 %v6138_v32, %v6086_v29  ;;  %v10338_v5 = vld [vmem:[%s14296_s1 + $0xcc0] ss:$12 sps:$4 sm:$0xff]   ;;  %v10368_v19 = vld [vmem:[%s11272_s26 + $0x154] ss:$132 sps:$4 sm:$0xff]   ;;  %v12190_v20 = vpop.f32.mrf.mxu1  ;;  %v10359_v27 = vld [vmem:[%s14296_s1 + $0x1110] ss:$12 sps:$4 sm:$0xff]  }
 0x11c   : > { %6522 = vmatprep.subr.bf16.mxu1 %v10277_v6  ;;  %v10343_v6 = vld [vmem:[%s14296_s1 + $0xe44] ss:$12 sps:$4 sm:$0xff]  }
 0x11d   : > { %6470 = vmatpush1.bf16.msra.mxu0 %v10272_v7  ;;  %v10341_v7 = vld [vmem:[%s14296_s1 + $0xe40] ss:$12 sps:$4 sm:$0xff]  }
 0x11e   : > { %6471 = vmatprep.subr.bf16.mxu0 %v10280_v8  ;;  %v10349_v8 = vld [vmem:[%s14296_s1 + $0xfac] ss:$12 sps:$4 sm:$0xff]  }
 0x11f   : > { %6523 = vmatpush1.bf16.msra.mxu1 %v10275_v9  ;;  %v10344_v9 = vld [vmem:[%s11272_s26 + $0x40] ss:$132 sps:$4 sm:$0xff]  }
 0x120   : > { %6524 = vmatprep.subr.bf16.mxu1 %v10283_v11  ;;  %v10347_v11 = vld [vmem:[%s14296_s1 + $0xfa8] ss:$12 sps:$4 sm:$0xff]  }
 0x121   : > { %6472 = vmatpush1.bf16.msra.mxu0 %v10278_v12  ;;  %v10350_v12 = vld [vmem:[%s11272_s26 + $0x48] ss:$132 sps:$4 sm:$0xff]  }
 0x122   : > { %6473 = vmatprep.subr.bf16.mxu0 %v10286_v14  ;;  %v10355_v14 = vld [vmem:[%s14296_s1 + $0x112c] ss:$12 sps:$4 sm:$0xff]  }
 0x123   : > { %6525 = vmatpush1.bf16.msra.mxu1 %v10281_v16  ;;  %v12181_v16 = vpop.f32.mrf.mxu0 }
 0x124   : > { %6526 = vmatprep.subr.bf16.mxu1 %v10289_v18  ;;  %v10353_v18 = vld [vmem:[%s14296_s1 + $0x1128] ss:$12 sps:$4 sm:$0xff]  }
 0x125   : > { %6474 = vmatpush1.bf16.msra.mxu0 %v10284_v21 }
 0x126   : > { %6475 = vmatprep.subr.bf16.mxu0 %v10292_v25  ;;  %v10361_v25 = vld [vmem:[%s14296_s1 + $0x1114] ss:$12 sps:$4 sm:$0xff]  }
 0x127   : > { %6527 = vmatpush1.bf16.msra.mxu1 %v10287_v28 }
 0x128   : > { %6528 = vmatprep.subr.bf16.mxu1 %v10295_v31  ;;  %v10367_v31 = vld [vmem:[%s14296_s1 + $0xf7c] ss:$12 sps:$4 sm:$0xff]  }
 0x129   : > { %6476 = vmatpush1.bf16.msra.mxu0 %v10290_v33 }
 0x12a   : > { %6477 = vmatprep.subr.bf16.mxu0 %v10298_v35  ;;  %v10365_v35 = vld [vmem:[%s14296_s1 + $0xf78] ss:$12 sps:$4 sm:$0xff]  }
 0x12b   : > { %6529 = vmatpush1.bf16.msra.mxu1 %v10293_v36 }
 0x12c   : > { %6530 = vmatprep.subr.bf16.mxu1 %v10301_v37 }
 0x12d   : > { %6478 = vmatpush2.bf16.msra.mxu0 %v10296_v38  ;;  %v10370_v38 = vld [vmem:[%s11272_s26 + $0x150] ss:$132 sps:$4 sm:$0xff]  }
 0x12e   : > { %6479 = vmatprep.subr.bf16.mxu0 %v10304_v40  ;;  %v10373_v40 = vld [vmem:[%s14296_s1 + $0x10fc] ss:$12 sps:$4 sm:$0xff]  }
 0x12f   : > { %6531 = vmatpush2.bf16.msra.mxu1 %v10299_v41 }
 0x130   : > { %6532 = vmatprep.subr.bf16.mxu1 %v10307_v42  ;;  %v10454_v42 = vld [vmem:[%s11272_s26 + $0x54] ss:$132 sps:$4 sm:$0xff]  }
 0x131   : > { %6480 = vmatpush2.bf16.msra.mxu0 %v10302_v43 }
 0x132   : > { %6481 = vmatprep.subr.bf16.mxu0 %v10310_v44 }
 0x133   : > { %6533 = vmatpush2.bf16.msra.mxu1 %v10305_v45  ;;  %v10376_v45 = vld [vmem:[%s14296_s1 + $0xf64] ss:$12 sps:$4 sm:$0xff]  }
 0x134   : > { %6534 = vmatprep.subr.bf16.mxu1 %v10313_v46 }
 0x135   : > { %6482 = vmatpush2.bf16.msra.mxu0 %v10308_v47  ;;  %v10371_v47 = vld [vmem:[%s14296_s1 + $0x10f8] ss:$12 sps:$4 sm:$0xff]  }
 0x136   : > { %6483 = vmatprep.subr.bf16.mxu0 %v10316_v48 }
 0x137   : > { %6535 = vmatpush2.bf16.msra.mxu1 %v10311_v49 }
 0x138   : > { %6536 = vmatprep.subr.bf16.mxu1 %v10319_v50  ;;  %v10379_v50 = vld [vmem:[%s14296_s1 + $0x10e4] ss:$12 sps:$4 sm:$0xff]  }
 0x139   : > { %6484 = vmatpush2.bf16.msra.mxu0 %v10314_v52 }
 0x13a   : > { %6485 = vmatprep.subr.bf16.mxu0 %v10322_v53  ;;  %v10374_v53 = vld [vmem:[%s14296_s1 + $0xf60] ss:$12 sps:$4 sm:$0xff]  }
 0x13b   : > { %6537 = vmatpush2.bf16.msra.mxu1 %v10317_v54 }
 0x13c   : > { %6538 = vmatprep.subr.bf16.mxu1 %v10325_v55 }
 0x13d   : > { %6486 = vmatpush2.bf16.msra.mxu0 %v10320_v56  ;;  %v10382_v56 = vld [vmem:[%s14296_s1 + $0xf4c] ss:$12 sps:$4 sm:$0xff]  }
 0x13e   : > { %6487 = vmatprep.subr.bf16.mxu0 %v10328_v57 }
 0x13f   : > { %6539 = vmatpush2.bf16.msra.mxu1 %v10323_v58 }
 0x140   : > { %6540 = vmatprep.subr.bf16.mxu1 %v10331_v60 }
 0x141   : > { %6488 = vmatpush2.bf16.msra.mxu0 %v10326_v61 }
 0x142   : > { %6489 = vmatprep.subr.bf16.mxu0 %v10334_v62  ;;  %v10385_v62 = vld [vmem:[%s14296_s1 + $0x10cc] ss:$12 sps:$4 sm:$0xff]  }
 0x143   : > { %6541 = vmatpush2.bf16.msra.mxu1 %v10329_v0 }
 0x144   : > { %6542 = vmatprep.subr.bf16.mxu1 %v10337_v1 }
 0x145   : > { %6490 = vmatpush2.bf16.msra.mxu0 %v10332_v2 }
 0x146   : > { %6491 = vmatprep.subr.bf16.mxu0 %v10340_v3  ;;  %v10388_v3 = vld [vmem:[%s14296_s1 + $0xf34] ss:$12 sps:$4 sm:$0xff]  }
 0x147   : > { %6543 = vmatpush2.bf16.msra.mxu1 %v10335_v4 }
 0x148   : > { %6544 = vmatprep.subr.bf16.mxu1 %v10343_v6  ;;  %v10386_v6 = vld [vmem:[%s14296_s1 + $0xf30] ss:$12 sps:$4 sm:$0xff]  }
 0x149   : > { %6492 = vmatpush2.bf16.msra.mxu0 %v10338_v5  ;;  %v10391_v5 = vld [vmem:[%s14296_s1 + $0x10b4] ss:$12 sps:$4 sm:$0xff]  }
 0x14a   : > { %6567 = vmatprep.subr.bf16.mxu0 %v10349_v8  ;;  %v10389_v8 = vld [vmem:[%s14296_s1 + $0x10b0] ss:$12 sps:$4 sm:$0xff]  }
 0x14b   : > { %6545 = vmatpush2.bf16.msra.mxu1 %v10341_v7  ;;  %v10394_v7 = vld [vmem:[%s14296_s1 + $0xf1c] ss:$12 sps:$4 sm:$0xff]  }
 0x14c   : > { %v6177_v21 = vpop.f32.mrf.mxu0  ;;  %6494 = vmatmul.mubr.bf16.vlgmr.msra.gmra.mxu0 %v10344_v9  ;;  %6620 = vmatprep.subr.bf16.mxu1 %v10355_v14  ;;  %v10397_v9 = vld [vmem:[%s14296_s1 + $0x109c] ss:$12 sps:$4 sm:$0xff]   ;;  %v10395_v14 = vld [vmem:[%s14296_s1 + $0x1098] ss:$12 sps:$4 sm:$0xff]  }
 0x14d   : > { %v6178_v26 = vadd.f32 %v6177_v21, %v11980_v51  ;;  %6568 = vmatpush1.bf16.msra.mxu0 %v10347_v11  ;;  %6503 = vmatprep.mubr.bf16.mxu0 %v10362_v15  ;;  %v10364_v51 = vld [vmem:[%s11272_s26 + $0x148] ss:$132 sps:$4 sm:$0xff]   ;;  %v10392_v11 = vld [vmem:[%s14296_s1 + $0xf18] ss:$12 sps:$4 sm:$0xff]  }
 0x14e   : > { %v6179_v28 = vpop.f32.mrf.mxu0  ;;  %v6230_v29 = vpop.f32.mrf.mxu1  ;;  %6547 = vmatmul.mubr.bf16.vlgmr.msra.gmra.mxu1 %v10350_v12  ;;  %6569 = vmatprep.subr.bf16.mxu0 %v10358_v17  ;;  %v10400_v12 = vld [vmem:[%s14296_s1 + $0xf04] ss:$12 sps:$4 sm:$0xff]   ;;  %v10398_v17 = vld [vmem:[%s14296_s1 + $0xf00] ss:$12 sps:$4 sm:$0xff]  }
 0x14f   : > { %v6180_v32 = vadd.f32 %v6179_v28, %v11991_v59  ;;  %v12206_v33 = vadd.f32 %v6230_v29, %v6178_v26  ;;  %6621 = vmatpush1.bf16.msra.mxu1 %v10353_v18  ;;  %6556 = vmatprep.mubr.bf16.mxu1 %v10368_v19  ;;  %v10403_v15 = vld [vmem:[%s14296_s1 + $0x1084] ss:$12 sps:$4 sm:$0xff]   ;;  %v10406_v18 = vld [vmem:[%s14296_s1 + $0x106c] ss:$12 sps:$4 sm:$0xff]   ;;  %v10407_v26 = vld [vmem:[%s14296_s1 + $0x11e8] ss:$12 sps:$4 sm:$0xff]  }
 0x150   : > { %v6181_v36 = vpop.f32.mrf.mxu0  ;;  %v6232_v37 = vpop.f32.mrf.mxu1  ;;  %6622 = vmatprep.subr.bf16.mxu1 %v10361_v25  ;;  %v10401_v19 = vld [vmem:[%s14296_s1 + $0x1080] ss:$12 sps:$4 sm:$0xff]   ;;  %v10410_v28 = vld [vmem:[%s14296_s1 + $0x1050] ss:$12 sps:$4 sm:$0xff]  }
 0x151   : > { %v6182_v59 = vadd.f32 %v6181_v36, %v11997_v63  ;;  %v12217_v41 = vadd.f32 %v6232_v37, %v6180_v32  ;;  %6570 = vmatpush1.bf16.msra.mxu0 %v10356_v23  ;;  %v10460_v63 = vld [vmem:[%s11272_s26 + $0x5c] ss:$132 sps:$4 sm:$0xff]   ;;  %v10409_v21 = vld [vmem:[%s14296_s1 + $0x11ec] ss:$12 sps:$4 sm:$0xff]   ;;  %v10404_v23 = vld [vmem:[%s14296_s1 + $0x1068] ss:$12 sps:$4 sm:$0xff]  }
 0x152   : > { %v12220_v43 = vpop.f32.mrf.mxu0  ;;  %v6234_v44 = vpop.f32.mrf.mxu1  ;;  %6571 = vmatprep.subr.bf16.mxu0 %v10367_v31  ;;  %v10412_v25 = vld [vmem:[%s14296_s1 + $0x1054] ss:$12 sps:$4 sm:$0xff]   ;;  %v10418_v29 = vld [vmem:[%s14296_s1 + $0x103c] ss:$12 sps:$4 sm:$0xff]   ;;  %v10419_v36 = vld [vmem:[%s14296_s1 + $0x11b8] ss:$12 sps:$4 sm:$0xff]  }
 0x153   : > { %v12225_v46 = vadd.f32 %v6234_v44, %v6182_v59  ;;  %6623 = vmatpush1.bf16.msra.mxu1 %v10359_v27  ;;  %v10415_v27 = vld [vmem:[%s14296_s1 + $0x11d4] ss:$12 sps:$4 sm:$0xff]   ;;  %v10413_v31 = vld [vmem:[%s14296_s1 + $0x11d0] ss:$12 sps:$4 sm:$0xff]  }
 0x154   : > { %v6187_v48 = vpop.f32.mrf.mxu0  ;;  %v12231_v49 = vpop.f32.mrf.mxu1  ;;  %6504 = vmatmul.mubr.bf16.gmra.mxu0 %v10364_v51  ;;  %6624 = vmatprep.subr.bf16.mxu1 %v10373_v40  ;;  %v10421_v32 = vld [vmem:[%s14296_s1 + $0x11bc] ss:$12 sps:$4 sm:$0xff]   ;;  %v10416_v51 = vld [vmem:[%s14296_s1 + $0x1038] ss:$12 sps:$4 sm:$0xff]   ;;  %v10425_v59 = vld [vmem:[%s14296_s1 + $0x11a0] ss:$12 sps:$4 sm:$0xff]  }
 0x155   : > { %v6188_v52 = vadd.f32 %v6187_v48, %v12051_v24  ;;  %6572 = vmatpush1.bf16.msra.mxu0 %v10365_v35  ;;  %6599 = vmatprep.mubr.bf16.mxu0 %v10454_v42  ;;  %v10377_v24 = vld [vmem:[%s14296_s1 + $0x10e0] ss:$12 sps:$4 sm:$0xff]   ;;  %v10424_v35 = vld [vmem:[%s14296_s1 + $0x1024] ss:$12 sps:$4 sm:$0xff]   ;;  %v10428_v44 = vld [vmem:[%s14296_s1 + $0x1008] ss:$12 sps:$4 sm:$0xff]  }
 0x156   : > { %v6189_v54 = vpop.f32.mrf.mxu0  ;;  %v6240_v55 = vpop.f32.mrf.mxu1  ;;  %6557 = vmatmul.mubr.bf16.gmra.mxu1 %v10370_v38  ;;  %6573 = vmatprep.subr.bf16.mxu0 %v10376_v45  ;;  %v10427_v37 = vld [vmem:[%s14296_s1 + $0x11a4] ss:$12 sps:$4 sm:$0xff]   ;;  %v10422_v38 = vld [vmem:[%s14296_s1 + $0x1020] ss:$12 sps:$4 sm:$0xff]  }
 0x157   : > { %v6190_v57 = vadd.f32 %v6189_v54, %v12060_v30  ;;  %v12244_v58 = vadd.f32 %v6240_v55, %v6188_v52  ;;  %6625 = vmatpush1.bf16.msra.mxu1 %v10371_v47  ;;  %6652 = vmatprep.mubr.bf16.mxu1 %v10460_v63  ;;  %v10380_v30 = vld [vmem:[%s14296_s1 + $0xf48] ss:$12 sps:$4 sm:$0xff]   ;;  %v10430_v40 = vld [vmem:[%s14296_s1 + $0x100c] ss:$12 sps:$4 sm:$0xff]   ;;  %v10434_v63 = vld [vmem:[%s14296_s1 + $0xff0] ss:$12 sps:$4 sm:$0xff]  }
 0x158   : > { %v6191_v60 = vpop.f32.mrf.mxu0  ;;  %v6242_v61 = vpop.f32.mrf.mxu1  ;;  %6626 = vmatprep.subr.bf16.mxu1 %v10379_v50  ;;  %v10433_v42 = vld [vmem:[%s14296_s1 + $0x118c] ss:$12 sps:$4 sm:$0xff]   ;;  %v10436_v45 = vld [vmem:[%s14296_s1 + $0xff4] ss:$12 sps:$4 sm:$0xff]   ;;  %v10437_v50 = vld [vmem:[%s14296_s1 + $0x1170] ss:$12 sps:$4 sm:$0xff]  }
 0x159   : > { %v6192_v0 = vadd.f32 %v6191_v60, %v12068_v34  ;;  %v12253_v1 = vadd.f32 %v6242_v61, %v6190_v57  ;;  %6574 = vmatpush1.bf16.msra.mxu0 %v10374_v53  ;;  %v10383_v34 = vld [vmem:[%s14296_s1 + $0x10c8] ss:$12 sps:$4 sm:$0xff]   ;;  %v10440_v53 = vld [vmem:[%s14296_s1 + $0xfd8] ss:$12 sps:$4 sm:$0xff]   ;;  %v10446_v57 = vld [vmem:[%s14296_s1 + $0xfc0] ss:$12 sps:$4 sm:$0xff]  }
 0x15a   : > { %v6244_v2 = vpop.f32.mrf.mxu1  ;;  %6575 = vmatprep.subr.bf16.mxu0 %v10382_v56  ;;  %v10431_v47 = vld [vmem:[%s14296_s1 + $0x1188] ss:$12 sps:$4 sm:$0xff]   ;;  %v10443_v55 = vld [vmem:[%s14296_s1 + $0x1158] ss:$12 sps:$4 sm:$0xff]   ;;  %v10449_v60 = vld [vmem:[%s14296_s1 + $0x1140] ss:$12 sps:$4 sm:$0xff]  }
 0x15b   : > { %v12261_v4 = vadd.f32 %v6244_v2, %v6192_v0  ;;  %6627 = vmatpush1.bf16.msra.mxu1 %v10377_v24  ;;  %v10439_v48 = vld [vmem:[%s14296_s1 + $0x1174] ss:$12 sps:$4 sm:$0xff]   ;;  %v10442_v52 = vld [vmem:[%s14296_s1 + $0xfdc] ss:$12 sps:$4 sm:$0xff]   ;;  %v10448_v56 = vld [vmem:[%s14296_s1 + $0xfc4] ss:$12 sps:$4 sm:$0xff]  }
 0x15c   : > { %6628 = vmatprep.subr.bf16.mxu1 %v10385_v62  ;;  %v10445_v54 = vld [vmem:[%s14296_s1 + $0x115c] ss:$12 sps:$4 sm:$0xff]   ;;  %v10451_v24 = vld [vmem:[%s14296_s1 + $0x1144] ss:$12 sps:$4 sm:$0xff]   ;;  %v10457_v61 = vld [vmem:[%s14296_s1 + $0x12ac] ss:$12 sps:$4 sm:$0xff]  }
 0x15d   : > { %6576 = vmatpush1.bf16.msra.mxu0 %v10380_v30  ;;  %v10452_v62 = vld [vmem:[%s11272_s26 + $0x50] ss:$132 sps:$4 sm:$0xff]   ;;  %v10463_v0 = vld [vmem:[%s14296_s1 + $0x142c] ss:$12 sps:$4 sm:$0xff]  }
 0x15e   : > { %6577 = vmatprep.subr.bf16.mxu0 %v10388_v3  ;;  %v10455_v30 = vld [vmem:[%s14296_s1 + $0x12a8] ss:$12 sps:$4 sm:$0xff]   ;;  %v10458_v2 = vld [vmem:[%s11272_s26 + $0x58] ss:$132 sps:$4 sm:$0xff]  }
 0x15f   : > { %6629 = vmatpush1.bf16.msra.mxu1 %v10383_v34  ;;  %v10470_v3 = vld [vmem:[%s11272_s26 + $0x15c] ss:$132 sps:$4 sm:$0xff]   ;;  %v12407_v34 = vpop.f32.mrf.mxu0 }
 0x160   : > { %6630 = vmatprep.subr.bf16.mxu1 %v10391_v5  ;;  %v10466_v5 = vld [vmem:[%s14296_s1 + $0x1294] ss:$12 sps:$4 sm:$0xff]  }
 0x161   : > { %6578 = vmatpush1.bf16.msra.mxu0 %v10386_v6  ;;  %v10461_v6 = vld [vmem:[%s14296_s1 + $0x1428] ss:$12 sps:$4 sm:$0xff]  }
 0x162   : > { %6579 = vmatprep.subr.bf16.mxu0 %v10394_v7  ;;  %v10476_v7 = vld [vmem:[%s11272_s26 + $0x164] ss:$132 sps:$4 sm:$0xff]  }
 0x163   : > { %6631 = vmatpush1.bf16.msra.mxu1 %v10389_v8  ;;  %v12416_v8 = vpop.f32.mrf.mxu1 }
 0x164   : > { %6632 = vmatprep.subr.bf16.mxu1 %v10397_v9 }
 0x165   : > { %6580 = vmatpush1.bf16.msra.mxu0 %v10392_v11  ;;  %v10464_v11 = vld [vmem:[%s14296_s1 + $0x1290] ss:$12 sps:$4 sm:$0xff]  }
 0x166   : > { %6581 = vmatprep.subr.bf16.mxu0 %v10400_v12  ;;  %v10469_v12 = vld [vmem:[%s14296_s1 + $0x1414] ss:$12 sps:$4 sm:$0xff]  }
 0x167   : > { %6633 = vmatpush1.bf16.msra.mxu1 %v10395_v14 }
 0x168   : > { %6634 = vmatprep.subr.bf16.mxu1 %v10403_v15  ;;  %v10467_v15 = vld [vmem:[%s14296_s1 + $0x1410] ss:$12 sps:$4 sm:$0xff]  }
 0x169   : > { %6582 = vmatpush1.bf16.msra.mxu0 %v10398_v17 }
 0x16a   : > { %6583 = vmatprep.subr.bf16.mxu0 %v10406_v18 }
 0x16b   : > { %6635 = vmatpush1.bf16.msra.mxu1 %v10401_v19  ;;  %v10475_v19 = vld [vmem:[%s14296_s1 + $0x127c] ss:$12 sps:$4 sm:$0xff]  }
 0x16c   : > { %6636 = vmatprep.subr.bf16.mxu1 %v10409_v21 }
 0x16d   : > { %6584 = vmatpush2.bf16.msra.mxu0 %v10404_v23 }
 0x16e   : > { %6585 = vmatprep.subr.bf16.mxu0 %v10412_v25 }
 0x16f   : > { %6637 = vmatpush2.bf16.msra.mxu1 %v10407_v26 }
 0x170   : > { %6638 = vmatprep.subr.bf16.mxu1 %v10415_v27  ;;  %v10481_v27 = vld [vmem:[%s14296_s1 + $0x13fc] ss:$12 sps:$4 sm:$0xff]  }
 0x171   : > { %6586 = vmatpush2.bf16.msra.mxu0 %v10410_v28 }
 0x172   : > { %6587 = vmatprep.subr.bf16.mxu0 %v10418_v29 }
 0x173   : > { %6639 = vmatpush2.bf16.msra.mxu1 %v10413_v31  ;;  %v10562_v31 = vld [vmem:[%s11272_s26 + $0x64] ss:$132 sps:$4 sm:$0xff]  }
 0x174   : > { %6640 = vmatprep.subr.bf16.mxu1 %v10421_v32 }
 0x175   : > { %6588 = vmatpush2.bf16.msra.mxu0 %v10416_v51 }
 0x176   : > { %6589 = vmatprep.subr.bf16.mxu0 %v10424_v35  ;;  %v10478_v35 = vld [vmem:[%s11272_s26 + $0x160] ss:$132 sps:$4 sm:$0xff]  }
 0x177   : > { %6641 = vmatpush2.bf16.msra.mxu1 %v10419_v36  ;;  %v10484_v36 = vld [vmem:[%s14296_s1 + $0x1264] ss:$12 sps:$4 sm:$0xff]  }
 0x178   : > { %6642 = vmatprep.subr.bf16.mxu1 %v10427_v37 }
 0x179   : > { %6590 = vmatpush2.bf16.msra.mxu0 %v10422_v38  ;;  %v10568_v38 = vld [vmem:[%s11272_s26 + $0x6c] ss:$132 sps:$4 sm:$0xff]  }
 0x17a   : > { %6591 = vmatprep.subr.bf16.mxu0 %v10430_v40 }
 0x17b   : > { %6643 = vmatpush2.bf16.msra.mxu1 %v10425_v59 }
 0x17c   : > { %6644 = vmatprep.subr.bf16.mxu1 %v10433_v42  ;;  %v10487_v42 = vld [vmem:[%s14296_s1 + $0x13e4] ss:$12 sps:$4 sm:$0xff]  }
 0x17d   : > { %6592 = vmatpush2.bf16.msra.mxu0 %v10428_v44 }
 0x17e   : > { %6593 = vmatprep.subr.bf16.mxu0 %v10436_v45  ;;  %v10482_v45 = vld [vmem:[%s14296_s1 + $0x1260] ss:$12 sps:$4 sm:$0xff]  }
 0x17f   : > { %6645 = vmatpush2.bf16.msra.mxu1 %v10431_v47 }
 0x180   : > { %6646 = vmatprep.subr.bf16.mxu1 %v10439_v48  ;;  %v10490_v48 = vld [vmem:[%s14296_s1 + $0x124c] ss:$12 sps:$4 sm:$0xff]  }
 0x181   : > { %6594 = vmatpush2.bf16.msra.mxu0 %v10434_v63 }
 0x182   : > { %6595 = vmatprep.subr.bf16.mxu0 %v10442_v52 }
 0x183   : > { %6647 = vmatpush2.bf16.msra.mxu1 %v10437_v50 }
 0x184   : > { %6648 = vmatprep.subr.bf16.mxu1 %v10445_v54 }
 0x185   : > { %6596 = vmatpush2.bf16.msra.mxu0 %v10440_v53 }
 0x186   : > { %6597 = vmatprep.subr.bf16.mxu0 %v10448_v56 }
 0x187   : > { %6649 = vmatpush2.bf16.msra.mxu1 %v10443_v55  ;;  %v10493_v55 = vld [vmem:[%s14296_s1 + $0x13cc] ss:$12 sps:$4 sm:$0xff]  }
 0x188   : > { %6650 = vmatprep.subr.bf16.mxu1 %v10451_v24 }
 0x189   : > { %6598 = vmatpush2.bf16.msra.mxu0 %v10446_v57 }
 0x18a   : > { %6673 = vmatprep.subr.bf16.mxu0 %v10457_v61 }
 0x18b   : > { %6651 = vmatpush2.bf16.msra.mxu1 %v10449_v60  ;;  %v10496_v60 = vld [vmem:[%s14296_s1 + $0x1234] ss:$12 sps:$4 sm:$0xff]  }
 0x18c   : > { %v6283_v9 = vpop.f32.mrf.mxu0  ;;  %6600 = vmatmul.mubr.bf16.vlgmr.msra.gmra.mxu0 %v10452_v62  ;;  %6726 = vmatprep.subr.bf16.mxu1 %v10463_v0  ;;  %v10499_v62 = vld [vmem:[%s14296_s1 + $0x13b4] ss:$12 sps:$4 sm:$0xff]   ;;  %v10494_v0 = vld [vmem:[%s14296_s1 + $0x1230] ss:$12 sps:$4 sm:$0xff]  }
 0x18d   : > { %v6284_v14 = vadd.f32 %v6283_v9, %v12206_v33  ;;  %6674 = vmatpush1.bf16.msra.mxu0 %v10455_v30  ;;  %6609 = vmatprep.mubr.bf16.mxu0 %v10470_v3  ;;  %v10472_v33 = vld [vmem:[%s11272_s26 + $0x158] ss:$132 sps:$4 sm:$0xff]   ;;  %v10511_v9 = vld [vmem:[%s14296_s1 + $0x1384] ss:$12 sps:$4 sm:$0xff]  }
 0x18e   : > { %v6285_v17 = vpop.f32.mrf.mxu0  ;;  %v6336_v18 = vpop.f32.mrf.mxu1  ;;  %6653 = vmatmul.mubr.bf16.vlgmr.msra.gmra.mxu1 %v10458_v2  ;;  %6675 = vmatprep.subr.bf16.mxu0 %v10466_v5  ;;  %v10502_v30 = vld [vmem:[%s14296_s1 + $0x121c] ss:$12 sps:$4 sm:$0xff]   ;;  %v10500_v5 = vld [vmem:[%s14296_s1 + $0x1218] ss:$12 sps:$4 sm:$0xff]  }
 0x18f   : > { %v6286_v21 = vadd.f32 %v6285_v17, %v12217_v41  ;;  %v12432_v23 = vadd.f32 %v6336_v18, %v6284_v14  ;;  %6727 = vmatpush1.bf16.msra.mxu1 %v10461_v6  ;;  %6662 = vmatprep.mubr.bf16.mxu1 %v10476_v7  ;;  %v10473_v41 = vld [vmem:[%s14296_s1 + $0x1278] ss:$12 sps:$4 sm:$0xff]   ;;  %v10497_v2 = vld [vmem:[%s14296_s1 + $0x13b0] ss:$12 sps:$4 sm:$0xff]   ;;  %v10509_v14 = vld [vmem:[%s14296_s1 + $0x1380] ss:$12 sps:$4 sm:$0xff]  }
 0x190   : > { %v6287_v25 = vpop.f32.mrf.mxu0  ;;  %v6338_v26 = vpop.f32.mrf.mxu1  ;;  %6728 = vmatprep.subr.bf16.mxu1 %v10469_v12  ;;  %v10505_v3 = vld [vmem:[%s14296_s1 + $0x139c] ss:$12 sps:$4 sm:$0xff]   ;;  %v10508_v6 = vld [vmem:[%s14296_s1 + $0x1204] ss:$12 sps:$4 sm:$0xff]   ;;  %v10514_v12 = vld [vmem:[%s14296_s1 + $0x136c] ss:$12 sps:$4 sm:$0xff]  }
 0x191   : > { %v6288_v28 = vadd.f32 %v6287_v25, %v12225_v46  ;;  %v12439_v29 = vadd.f32 %v6338_v26, %v6286_v21  ;;  %6676 = vmatpush1.bf16.msra.mxu0 %v10464_v11  ;;  %v10479_v46 = vld [vmem:[%s14296_s1 + $0x13f8] ss:$12 sps:$4 sm:$0xff]   ;;  %v10506_v11 = vld [vmem:[%s14296_s1 + $0x1200] ss:$12 sps:$4 sm:$0xff]   ;;  %v10512_v17 = vld [vmem:[%s14296_s1 + $0x1368] ss:$12 sps:$4 sm:$0xff]  }
 0x192   : > { %v12445_v32 = vpop.f32.mrf.mxu0  ;;  %v6340_v51 = vpop.f32.mrf.mxu1  ;;  %6677 = vmatprep.subr.bf16.mxu0 %v10475_v19  ;;  %v10503_v7 = vld [vmem:[%s14296_s1 + $0x1398] ss:$12 sps:$4 sm:$0xff]   ;;  %v10520_v18 = vld [vmem:[%s14296_s1 + $0x1354] ss:$12 sps:$4 sm:$0xff]   ;;  %v10526_v25 = vld [vmem:[%s14296_s1 + $0x133c] ss:$12 sps:$4 sm:$0xff]  }
 0x193   : > { %v12451_v37 = vadd.f32 %v6340_v51, %v6288_v28  ;;  %6729 = vmatpush1.bf16.msra.mxu1 %v10467_v15  ;;  %v10517_v15 = vld [vmem:[%s14296_s1 + $0x14ec] ss:$12 sps:$4 sm:$0xff]   ;;  %v10515_v19 = vld [vmem:[%s14296_s1 + $0x14e8] ss:$12 sps:$4 sm:$0xff]   ;;  %v10521_v26 = vld [vmem:[%s14296_s1 + $0x14d0] ss:$12 sps:$4 sm:$0xff]  }
 0x194   : > { %v6293_v40 = vpop.f32.mrf.mxu0  ;;  %v12457_v59 = vpop.f32.mrf.mxu1  ;;  %6610 = vmatmul.mubr.bf16.gmra.mxu0 %v10472_v33  ;;  %6730 = vmatprep.subr.bf16.mxu1 %v10481_v27  ;;  %v10523_v21 = vld [vmem:[%s14296_s1 + $0x14d4] ss:$12 sps:$4 sm:$0xff]   ;;  %v10518_v33 = vld [vmem:[%s14296_s1 + $0x1350] ss:$12 sps:$4 sm:$0xff]   ;;  %v10524_v28 = vld [vmem:[%s14296_s1 + $0x1338] ss:$12 sps:$4 sm:$0xff]  }
 0x195   : > { %v6294_v44 = vadd.f32 %v6293_v40, %v12244_v58  ;;  %6678 = vmatpush1.bf16.msra.mxu0 %v10473_v41  ;;  %6705 = vmatprep.mubr.bf16.mxu0 %v10562_v31  ;;  %v10485_v58 = vld [vmem:[%s14296_s1 + $0x13e0] ss:$12 sps:$4 sm:$0xff]   ;;  %v10529_v27 = vld [vmem:[%s14296_s1 + $0x14bc] ss:$12 sps:$4 sm:$0xff]   ;;  %v10527_v41 = vld [vmem:[%s14296_s1 + $0x14b8] ss:$12 sps:$4 sm:$0xff]  }
 0x196   : > { %v6295_v47 = vpop.f32.mrf.mxu0  ;;  %v6346_v63 = vpop.f32.mrf.mxu1  ;;  %6663 = vmatmul.mubr.bf16.gmra.mxu1 %v10478_v35  ;;  %6679 = vmatprep.subr.bf16.mxu0 %v10484_v36  ;;  %v10532_v31 = vld [vmem:[%s14296_s1 + $0x1324] ss:$12 sps:$4 sm:$0xff]   ;;  %v10530_v51 = vld [vmem:[%s14296_s1 + $0x1320] ss:$12 sps:$4 sm:$0xff]  }
 0x197   : > { %v6296_v50 = vadd.f32 %v6295_v47, %v12253_v1  ;;  %v12470_v52 = vadd.f32 %v6346_v63, %v6294_v44  ;;  %6731 = vmatpush1.bf16.msra.mxu1 %v10479_v46  ;;  %6758 = vmatprep.mubr.bf16.mxu1 %v10568_v38  ;;  %v10488_v1 = vld [vmem:[%s14296_s1 + $0x1248] ss:$12 sps:$4 sm:$0xff]   ;;  %v10535_v35 = vld [vmem:[%s14296_s1 + $0x14a4] ss:$12 sps:$4 sm:$0xff]   ;;  %v10533_v36 = vld [vmem:[%s14296_s1 + $0x14a0] ss:$12 sps:$4 sm:$0xff]  }
 0x198   : > { %v6297_v53 = vpop.f32.mrf.mxu0  ;;  %v6348_v54 = vpop.f32.mrf.mxu1  ;;  %6732 = vmatprep.subr.bf16.mxu1 %v10487_v42  ;;  %v10538_v46 = vld [vmem:[%s14296_s1 + $0x130c] ss:$12 sps:$4 sm:$0xff]   ;;  %v10536_v38 = vld [vmem:[%s14296_s1 + $0x1308] ss:$12 sps:$4 sm:$0xff]   ;;  %v10545_v63 = vld [vmem:[%s14296_s1 + $0x1470] ss:$12 sps:$4 sm:$0xff]  }
 0x199   : > { %v6298_v56 = vadd.f32 %v6297_v53, %v12261_v4  ;;  %v12479_v57 = vadd.f32 %v6348_v54, %v6296_v50  ;;  %6680 = vmatpush1.bf16.msra.mxu0 %v10482_v45  ;;  %v10491_v4 = vld [vmem:[%s14296_s1 + $0x13c8] ss:$12 sps:$4 sm:$0xff]   ;;  %v10541_v40 = vld [vmem:[%s14296_s1 + $0x148c] ss:$12 sps:$4 sm:$0xff]   ;;  %v10542_v45 = vld [vmem:[%s14296_s1 + $0x12f0] ss:$12 sps:$4 sm:$0xff]  }
 0x19a   : > { %v6350_v24 = vpop.f32.mrf.mxu1  ;;  %6681 = vmatprep.subr.bf16.mxu0 %v10490_v48  ;;  %v10539_v42 = vld [vmem:[%s14296_s1 + $0x1488] ss:$12 sps:$4 sm:$0xff]   ;;  %v10548_v50 = vld [vmem:[%s14296_s1 + $0x12d8] ss:$12 sps:$4 sm:$0xff]  }
 0x19b   : > { %v12487_v61 = vadd.f32 %v6350_v24, %v6298_v56  ;;  %6733 = vmatpush1.bf16.msra.mxu1 %v10485_v58  ;;  %v10544_v44 = vld [vmem:[%s14296_s1 + $0x12f4] ss:$12 sps:$4 sm:$0xff]   ;;  %v10550_v48 = vld [vmem:[%s14296_s1 + $0x12dc] ss:$12 sps:$4 sm:$0xff]   ;;  %v10551_v53 = vld [vmem:[%s14296_s1 + $0x1458] ss:$12 sps:$4 sm:$0xff]  }
 0x19c   : > { %6734 = vmatprep.subr.bf16.mxu1 %v10493_v55  ;;  %v10547_v47 = vld [vmem:[%s14296_s1 + $0x1474] ss:$12 sps:$4 sm:$0xff]   ;;  %v10553_v58 = vld [vmem:[%s14296_s1 + $0x145c] ss:$12 sps:$4 sm:$0xff]   ;;  %v10556_v54 = vld [vmem:[%s14296_s1 + $0x12c4] ss:$12 sps:$4 sm:$0xff]  }
 0x19d   : > { %6682 = vmatpush1.bf16.msra.mxu0 %v10488_v1  ;;  %v10554_v55 = vld [vmem:[%s14296_s1 + $0x12c0] ss:$12 sps:$4 sm:$0xff]   ;;  %v10559_v56 = vld [vmem:[%s14296_s1 + $0x1444] ss:$12 sps:$4 sm:$0xff]  }
 0x19e   : > { %6683 = vmatprep.subr.bf16.mxu0 %v10496_v60  ;;  %v10557_v1 = vld [vmem:[%s14296_s1 + $0x1440] ss:$12 sps:$4 sm:$0xff]  }
 0x19f   : > { %6735 = vmatpush1.bf16.msra.mxu1 %v10491_v4  ;;  %v10560_v24 = vld [vmem:[%s11272_s26 + $0x60] ss:$132 sps:$4 sm:$0xff]   ;;  %v10565_v60 = vld [vmem:[%s14296_s1 + $0x15ac] ss:$12 sps:$4 sm:$0xff]   ;;  %v10563_v4 = vld [vmem:[%s14296_s1 + $0x15a8] ss:$12 sps:$4 sm:$0xff]  }
 0x1a0   : > { %6736 = vmatprep.subr.bf16.mxu1 %v10499_v62  ;;  %v10566_v62 = vld [vmem:[%s11272_s26 + $0x68] ss:$132 sps:$4 sm:$0xff]  }
 0x1a1   : > { %6684 = vmatpush1.bf16.msra.mxu0 %v10494_v0  ;;  %v10571_v0 = vld [vmem:[%s14296_s1 + $0x172c] ss:$12 sps:$4 sm:$0xff]  }
 0x1a2   : > { %6685 = vmatprep.subr.bf16.mxu0 %v10502_v30  ;;  %v10569_v30 = vld [vmem:[%s14296_s1 + $0x1728] ss:$12 sps:$4 sm:$0xff]  }
 0x1a3   : > { %6737 = vmatpush1.bf16.msra.mxu1 %v10497_v2  ;;  %v10578_v2 = vld [vmem:[%s11272_s26 + $0x16c] ss:$132 sps:$4 sm:$0xff]  }
 0x1a4   : > { %6738 = vmatprep.subr.bf16.mxu1 %v10505_v3  ;;  %v12636_v3 = vpop.f32.mrf.mxu0 }
 0x1a5   : > { %6686 = vmatpush1.bf16.msra.mxu0 %v10500_v5  ;;  %v10574_v5 = vld [vmem:[%s14296_s1 + $0x1594] ss:$12 sps:$4 sm:$0xff]  }
 0x1a6   : > { %6687 = vmatprep.subr.bf16.mxu0 %v10508_v6  ;;  %v10572_v6 = vld [vmem:[%s14296_s1 + $0x1590] ss:$12 sps:$4 sm:$0xff]  }
 0x1a7   : > { %6739 = vmatpush1.bf16.msra.mxu1 %v10503_v7  ;;  %v10584_v7 = vld [vmem:[%s11272_s26 + $0x174] ss:$132 sps:$4 sm:$0xff]  }
 0x1a8   : > { %6740 = vmatprep.subr.bf16.mxu1 %v10511_v9  ;;  %v12645_v9 = vpop.f32.mrf.mxu1 }
 0x1a9   : > { %6688 = vmatpush1.bf16.msra.mxu0 %v10506_v11 }
 0x1aa   : > { %6689 = vmatprep.subr.bf16.mxu0 %v10514_v12  ;;  %v10577_v12 = vld [vmem:[%s14296_s1 + $0x1714] ss:$12 sps:$4 sm:$0xff]  }
 0x1ab   : > { %6741 = vmatpush1.bf16.msra.mxu1 %v10509_v14 }
 0x1ac   : > { %6742 = vmatprep.subr.bf16.mxu1 %v10517_v15  ;;  %v10575_v15 = vld [vmem:[%s14296_s1 + $0x1710] ss:$12 sps:$4 sm:$0xff]  }
 0x1ad   : > { %6690 = vmatpush2.bf16.msra.mxu0 %v10512_v17 }
 0x1ae   : > { %6691 = vmatprep.subr.bf16.mxu0 %v10520_v18 }
 0x1af   : > { %6743 = vmatpush2.bf16.msra.mxu1 %v10515_v19  ;;  %v10580_v19 = vld [vmem:[%s11272_s26 + $0x168] ss:$132 sps:$4 sm:$0xff]  }
 0x1b0   : > { %6744 = vmatprep.subr.bf16.mxu1 %v10523_v21  ;;  %v10583_v21 = vld [vmem:[%s14296_s1 + $0x157c] ss:$12 sps:$4 sm:$0xff]  }
 0x1b1   : > { %6692 = vmatpush2.bf16.msra.mxu0 %v10518_v33 }
 0x1b2   : > { %6693 = vmatprep.subr.bf16.mxu0 %v10526_v25  ;;  %v10581_v25 = vld [vmem:[%s14296_s1 + $0x1578] ss:$12 sps:$4 sm:$0xff]  }
 0x1b3   : > { %6745 = vmatpush2.bf16.msra.mxu1 %v10521_v26 }
 0x1b4   : > { %6746 = vmatprep.subr.bf16.mxu1 %v10529_v27 }
 0x1b5   : > { %6694 = vmatpush2.bf16.msra.mxu0 %v10524_v28  ;;  %v10586_v28 = vld [vmem:[%s11272_s26 + $0x170] ss:$132 sps:$4 sm:$0xff]  }
 0x1b6   : > { %6695 = vmatprep.subr.bf16.mxu0 %v10532_v31  ;;  %v10587_v31 = vld [vmem:[%s14296_s1 + $0x16f8] ss:$12 sps:$4 sm:$0xff]  }
 0x1b7   : > { %6747 = vmatpush2.bf16.msra.mxu1 %v10527_v41  ;;  %v10589_v41 = vld [vmem:[%s14296_s1 + $0x16fc] ss:$12 sps:$4 sm:$0xff]  }
 0x1b8   : > { %6748 = vmatprep.subr.bf16.mxu1 %v10535_v35 }
 0x1b9   : > { %6696 = vmatpush2.bf16.msra.mxu0 %v10530_v51  ;;  %v10670_v51 = vld [vmem:[%s11272_s26 + $0x74] ss:$132 sps:$4 sm:$0xff]  }
 0x1ba   : > { %6697 = vmatprep.subr.bf16.mxu0 %v10538_v46  ;;  %v10592_v46 = vld [vmem:[%s14296_s1 + $0x1564] ss:$12 sps:$4 sm:$0xff]  }
 0x1bb   : > { %6749 = vmatpush2.bf16.msra.mxu1 %v10533_v36 }
 0x1bc   : > { %6750 = vmatprep.subr.bf16.mxu1 %v10541_v40  ;;  %v10676_v40 = vld [vmem:[%s11272_s26 + $0x7c] ss:$132 sps:$4 sm:$0xff]  }
 0x1bd   : > { %6698 = vmatpush2.bf16.msra.mxu0 %v10536_v38 }
 0x1be   : > { %6699 = vmatprep.subr.bf16.mxu0 %v10544_v44 }
 0x1bf   : > { %6751 = vmatpush2.bf16.msra.mxu1 %v10539_v42 }
 0x1c0   : > { %6752 = vmatprep.subr.bf16.mxu1 %v10547_v47 }
 0x1c1   : > { %6700 = vmatpush2.bf16.msra.mxu0 %v10542_v45  ;;  %v10595_v45 = vld [vmem:[%s14296_s1 + $0x16e4] ss:$12 sps:$4 sm:$0xff]  }
 0x1c2   : > { %6701 = vmatprep.subr.bf16.mxu0 %v10550_v48 }
 0x1c3   : > { %6753 = vmatpush2.bf16.msra.mxu1 %v10545_v63  ;;  %v10593_v63 = vld [vmem:[%s14296_s1 + $0x16e0] ss:$12 sps:$4 sm:$0xff]  }
 0x1c4   : > { %6754 = vmatprep.subr.bf16.mxu1 %v10553_v58  ;;  %v10598_v58 = vld [vmem:[%s14296_s1 + $0x154c] ss:$12 sps:$4 sm:$0xff]  }
 0x1c5   : > { %6702 = vmatpush2.bf16.msra.mxu0 %v10548_v50 }
 0x1c6   : > { %6703 = vmatprep.subr.bf16.mxu0 %v10556_v54 }
 0x1c7   : > { %6755 = vmatpush2.bf16.msra.mxu1 %v10551_v53 }
 0x1c8   : > { %6756 = vmatprep.subr.bf16.mxu1 %v10559_v56 }
 0x1c9   : > { %6704 = vmatpush2.bf16.msra.mxu0 %v10554_v55 }
 0x1ca   : > { %6779 = vmatprep.subr.bf16.mxu0 %v10565_v60 }
 0x1cb   : > { %6757 = vmatpush2.bf16.msra.mxu1 %v10557_v1  ;;  %v10601_v1 = vld [vmem:[%s14296_s1 + $0x16cc] ss:$12 sps:$4 sm:$0xff]  }
 0x1cc   : > { %v6389_v11 = vpop.f32.mrf.mxu0  ;;  %6706 = vmatmul.mubr.bf16.vlgmr.msra.gmra.mxu0 %v10560_v24  ;;  %6832 = vmatprep.subr.bf16.mxu1 %v10571_v0 }
 0x1cd   : > { %v6390_v14 = vadd.f32 %v6389_v11, %v12432_v23  ;;  %6780 = vmatpush1.bf16.msra.mxu0 %v10563_v4  ;;  %6715 = vmatprep.mubr.bf16.mxu0 %v10578_v2  ;;  %v10605_v2 = vld [vmem:[%s14296_s1 + $0x16b0] ss:$12 sps:$4 sm:$0xff]   ;;  %v10611_v11 = vld [vmem:[%s14296_s1 + $0x1698] ss:$12 sps:$4 sm:$0xff]  }
 0x1ce   : > { %v6391_v17 = vpop.f32.mrf.mxu0  ;;  %v6442_v18 = vpop.f32.mrf.mxu1  ;;  %6759 = vmatmul.mubr.bf16.vlgmr.msra.gmra.mxu1 %v10566_v62  ;;  %6781 = vmatprep.subr.bf16.mxu0 %v10574_v5  ;;  %v10604_v62 = vld [vmem:[%s14296_s1 + $0x1534] ss:$12 sps:$4 sm:$0xff]   ;;  %v10610_v5 = vld [vmem:[%s14296_s1 + $0x151c] ss:$12 sps:$4 sm:$0xff]  }
 0x1cf   : > { %v12659_v33 = vadd.f32 %v6391_v17, %v12439_v29  ;;  %v12661_v23 = vadd.f32 %v6442_v18, %v6390_v14  ;;  %6833 = vmatpush1.bf16.msra.mxu1 %v10569_v30  ;;  %6768 = vmatprep.mubr.bf16.mxu1 %v10584_v7  ;;  %v10607_v30 = vld [vmem:[%s14296_s1 + $0x16b4] ss:$12 sps:$4 sm:$0xff]   ;;  %v10613_v7 = vld [vmem:[%s14296_s1 + $0x169c] ss:$12 sps:$4 sm:$0xff]   ;;  %v10622_v18 = vld [vmem:[%s14296_s1 + $0x166c] ss:$12 sps:$4 sm:$0xff]  }
 0x1d0   : > { %v6393_v26 = vpop.f32.mrf.mxu0  ;;  %v12666_v27 = vpop.f32.mrf.mxu1  ;;  %6834 = vmatprep.subr.bf16.mxu1 %v10577_v12  ;;  %v10616_v12 = vld [vmem:[%s14296_s1 + $0x1504] ss:$12 sps:$4 sm:$0xff]   ;;  %v10614_v14 = vld [vmem:[%s14296_s1 + $0x1500] ss:$12 sps:$4 sm:$0xff]  }
 0x1d1   : > { %v6394_v29 = vadd.f32 %v6393_v26, %v12451_v37  ;;  %6782 = vmatpush1.bf16.msra.mxu0 %v10572_v6  ;;  %v10590_v37 = vld [vmem:[%s14296_s1 + $0x1560] ss:$12 sps:$4 sm:$0xff]   ;;  %v10608_v6 = vld [vmem:[%s14296_s1 + $0x1518] ss:$12 sps:$4 sm:$0xff]  }
 0x1d2   : > { %v12677_v35 = vpop.f32.mrf.mxu0  ;;  %v6446_v36 = vpop.f32.mrf.mxu1  ;;  %6783 = vmatprep.subr.bf16.mxu0 %v10583_v21  ;;  %v10617_v17 = vld [vmem:[%s14296_s1 + $0x1680] ss:$12 sps:$4 sm:$0xff]  }
 0x1d3   : > { %v12682_v38 = vadd.f32 %v6446_v36, %v6394_v29  ;;  %6835 = vmatpush1.bf16.msra.mxu1 %v10575_v15  ;;  %v10619_v15 = vld [vmem:[%s14296_s1 + $0x1684] ss:$12 sps:$4 sm:$0xff]   ;;  %v10625_v21 = vld [vmem:[%s14296_s1 + $0x17ec] ss:$12 sps:$4 sm:$0xff]   ;;  %v10628_v26 = vld [vmem:[%s14296_s1 + $0x1654] ss:$12 sps:$4 sm:$0xff]  }
 0x1d4   : > { %v6399_v42 = vpop.f32.mrf.mxu0  ;;  %v12688_v44 = vpop.f32.mrf.mxu1  ;;  %6716 = vmatmul.mubr.bf16.gmra.mxu0 %v10580_v19  ;;  %6836 = vmatprep.subr.bf16.mxu1 %v10589_v41  ;;  %v10620_v19 = vld [vmem:[%s14296_s1 + $0x1668] ss:$12 sps:$4 sm:$0xff]   ;;  %v10629_v29 = vld [vmem:[%s14296_s1 + $0x17d0] ss:$12 sps:$4 sm:$0xff]  }
 0x1d5   : > { %v6400_v47 = vadd.f32 %v6399_v42, %v12470_v52  ;;  %6784 = vmatpush1.bf16.msra.mxu0 %v10581_v25  ;;  %6811 = vmatprep.mubr.bf16.mxu0 %v10670_v51  ;;  %v10596_v52 = vld [vmem:[%s14296_s1 + $0x1548] ss:$12 sps:$4 sm:$0xff]   ;;  %v10632_v51 = vld [vmem:[%s14296_s1 + $0x1638] ss:$12 sps:$4 sm:$0xff]  }
 0x1d6   : > { %v6401_v48 = vpop.f32.mrf.mxu0  ;;  %v6452_v50 = vpop.f32.mrf.mxu1  ;;  %6769 = vmatmul.mubr.bf16.gmra.mxu1 %v10586_v28  ;;  %6785 = vmatprep.subr.bf16.mxu0 %v10592_v46  ;;  %v10623_v25 = vld [vmem:[%s14296_s1 + $0x17e8] ss:$12 sps:$4 sm:$0xff]   ;;  %v10626_v28 = vld [vmem:[%s14296_s1 + $0x1650] ss:$12 sps:$4 sm:$0xff]   ;;  %v10635_v46 = vld [vmem:[%s14296_s1 + $0x17b8] ss:$12 sps:$4 sm:$0xff]  }
 0x1d7   : > { %v6402_v53 = vadd.f32 %v6401_v48, %v12479_v57  ;;  %v12701_v54 = vadd.f32 %v6452_v50, %v6400_v47  ;;  %6837 = vmatpush1.bf16.msra.mxu1 %v10587_v31  ;;  %6864 = vmatprep.mubr.bf16.mxu1 %v10676_v40  ;;  %v10599_v57 = vld [vmem:[%s14296_s1 + $0x16c8] ss:$12 sps:$4 sm:$0xff]   ;;  %v10638_v40 = vld [vmem:[%s14296_s1 + $0x1620] ss:$12 sps:$4 sm:$0xff]   ;;  %v10643_v42 = vld [vmem:[%s14296_s1 + $0x17a4] ss:$12 sps:$4 sm:$0xff]  }
 0x1d8   : > { %v6403_v55 = vpop.f32.mrf.mxu0  ;;  %v6454_v56 = vpop.f32.mrf.mxu1  ;;  %6838 = vmatprep.subr.bf16.mxu1 %v10595_v45  ;;  %v10631_v41 = vld [vmem:[%s14296_s1 + $0x17d4] ss:$12 sps:$4 sm:$0xff]   ;;  %v10634_v31 = vld [vmem:[%s14296_s1 + $0x163c] ss:$12 sps:$4 sm:$0xff]   ;;  %v10646_v47 = vld [vmem:[%s14296_s1 + $0x160c] ss:$12 sps:$4 sm:$0xff]  }
 0x1d9   : > { %v6404_v24 = vadd.f32 %v6403_v55, %v12487_v61  ;;  %v12710_v60 = vadd.f32 %v6454_v56, %v6402_v53  ;;  %6786 = vmatpush1.bf16.msra.mxu0 %v10590_v37  ;;  %v10602_v61 = vld [vmem:[%s14296_s1 + $0x1530] ss:$12 sps:$4 sm:$0xff]   ;;  %v10641_v45 = vld [vmem:[%s14296_s1 + $0x17a0] ss:$12 sps:$4 sm:$0xff]   ;;  %v10647_v50 = vld [vmem:[%s14296_s1 + $0x1788] ss:$12 sps:$4 sm:$0xff]  }
 0x1da   : > { %v6456_v4 = vpop.f32.mrf.mxu1  ;;  %6787 = vmatprep.subr.bf16.mxu0 %v10598_v58  ;;  %v10637_v36 = vld [vmem:[%s14296_s1 + $0x17bc] ss:$12 sps:$4 sm:$0xff]   ;;  %v10640_v37 = vld [vmem:[%s14296_s1 + $0x1624] ss:$12 sps:$4 sm:$0xff]   ;;  %v10649_v48 = vld [vmem:[%s14296_s1 + $0x178c] ss:$12 sps:$4 sm:$0xff]  }
 0x1db   : > { %v12718_v0 = vadd.f32 %v6456_v4, %v6404_v24  ;;  %6839 = vmatpush1.bf16.msra.mxu1 %v10593_v63  ;;  %v10644_v63 = vld [vmem:[%s14296_s1 + $0x1608] ss:$12 sps:$4 sm:$0xff]   ;;  %v10650_v53 = vld [vmem:[%s14296_s1 + $0x15f0] ss:$12 sps:$4 sm:$0xff]  }
 0x1dc   : > { %6840 = vmatprep.subr.bf16.mxu1 %v10601_v1  ;;  %v10652_v58 = vld [vmem:[%s14296_s1 + $0x15f4] ss:$12 sps:$4 sm:$0xff]   ;;  %v10653_v55 = vld [vmem:[%s14296_s1 + $0x1770] ss:$12 sps:$4 sm:$0xff]   ;;  %v10656_v1 = vld [vmem:[%s14296_s1 + $0x15d8] ss:$12 sps:$4 sm:$0xff]  }
 0x1dd   : > { %6788 = vmatpush1.bf16.msra.mxu0 %v10596_v52  ;;  %v10655_v52 = vld [vmem:[%s14296_s1 + $0x1774] ss:$12 sps:$4 sm:$0xff]   ;;  %v10658_v56 = vld [vmem:[%s14296_s1 + $0x15dc] ss:$12 sps:$4 sm:$0xff]   ;;  %v10664_v4 = vld [vmem:[%s14296_s1 + $0x15c4] ss:$12 sps:$4 sm:$0xff]  }
 0x1de   : > { %6789 = vmatprep.subr.bf16.mxu0 %v10604_v62  ;;  %v10661_v24 = vld [vmem:[%s14296_s1 + $0x175c] ss:$12 sps:$4 sm:$0xff]   ;;  %v10662_v62 = vld [vmem:[%s14296_s1 + $0x15c0] ss:$12 sps:$4 sm:$0xff]  }
 0x1df   : > { %6841 = vmatpush1.bf16.msra.mxu1 %v10599_v57  ;;  %v10659_v57 = vld [vmem:[%s14296_s1 + $0x1758] ss:$12 sps:$4 sm:$0xff]  }
 0x1e0   : > { %6842 = vmatprep.subr.bf16.mxu1 %v10607_v30  ;;  %v10665_v30 = vld [vmem:[%s14296_s1 + $0x1740] ss:$12 sps:$4 sm:$0xff]  }
 0x1e1   : > { %6790 = vmatpush1.bf16.msra.mxu0 %v10602_v61  ;;  %v10667_v61 = vld [vmem:[%s14296_s1 + $0x1744] ss:$12 sps:$4 sm:$0xff]  }
 0x1e2   : > { %6791 = vmatprep.subr.bf16.mxu0 %v10610_v5  ;;  %v10673_v5 = vld [vmem:[%s14296_s1 + $0x18ac] ss:$12 sps:$4 sm:$0xff]  }
 0x1e3   : > { %6843 = vmatpush1.bf16.msra.mxu1 %v10605_v2  ;;  %v10668_v2 = vld [vmem:[%s11272_s26 + $0x70] ss:$132 sps:$4 sm:$0xff]  }
 0x1e4   : > { %6844 = vmatprep.subr.bf16.mxu1 %v10613_v7  ;;  %v10674_v7 = vld [vmem:[%s11272_s26 + $0x78] ss:$132 sps:$4 sm:$0xff]  }
 0x1e5   : > { %6792 = vmatpush1.bf16.msra.mxu0 %v10608_v6  ;;  %v10671_v6 = vld [vmem:[%s14296_s1 + $0x18a8] ss:$12 sps:$4 sm:$0xff]  }
 0x1e6   : > { %6793 = vmatprep.subr.bf16.mxu0 %v10616_v12  ;;  %v10678_v12 = vld [vmem:[%s14296_s1 + $0xb0] ss:$12 sps:$4 sm:$0xff]  }
 0x1e7   : > { %6845 = vmatpush1.bf16.msra.mxu1 %v10611_v11  ;;  %v10677_v11 = vld [vmem:[%s14296_s1 + $0x170] ss:$12 sps:$4 sm:$0xff]  }
 0x1e8   : > { %6846 = vmatprep.subr.bf16.mxu1 %v10619_v15  ;;  %v12864_v15 = vpop.f32.mrf.mxu0 }
 0x1e9   : > { %6794 = vmatpush1.bf16.msra.mxu0 %v10614_v14  ;;  %v10683_v14 = vld [vmem:[%s11272_s26 + $0x17c] ss:$132 sps:$4 sm:$0xff]  }
 0x1ea   : > { %6795 = vmatprep.subr.bf16.mxu0 %v10622_v18  ;;  %v10679_v18 = vld [vmem:[%s14296_s1 + $0x1890] ss:$12 sps:$4 sm:$0xff]  }
 0x1eb   : > { %6847 = vmatpush1.bf16.msra.mxu1 %v10617_v17  ;;  %v10681_v17 = vld [vmem:[%s14296_s1 + $0x1894] ss:$12 sps:$4 sm:$0xff]  }
 0x1ec   : > { %6848 = vmatprep.subr.bf16.mxu1 %v10625_v21  ;;  %v12873_v21 = vpop.f32.mrf.mxu1 }
 0x1ed   : > { %6796 = vmatpush2.bf16.msra.mxu0 %v10620_v19  ;;  %v10690_v19 = vld [vmem:[%s11272_s26 + $0x184] ss:$132 sps:$4 sm:$0xff]  }
 0x1ee   : > { %6797 = vmatprep.subr.bf16.mxu0 %v10628_v26  ;;  %v10682_v26 = vld [vmem:[%s14296_s1 + $0x158] ss:$12 sps:$4 sm:$0xff]  }
 0x1ef   : > { %6849 = vmatpush2.bf16.msra.mxu1 %v10623_v25 }
 0x1f0   : > { %6850 = vmatprep.subr.bf16.mxu1 %v10631_v41  ;;  %v10685_v41 = vld [vmem:[%s14296_s1 + $0x98] ss:$12 sps:$4 sm:$0xff]  }
 0x1f1   : > { %6798 = vmatpush2.bf16.msra.mxu0 %v10626_v28 }
 0x1f2   : > { %6799 = vmatprep.subr.bf16.mxu0 %v10634_v31 }
 0x1f3   : > { %6851 = vmatpush2.bf16.msra.mxu1 %v10629_v29 }
 0x1f4   : > { %6852 = vmatprep.subr.bf16.mxu1 %v10637_v36  ;;  %v10689_v36 = vld [vmem:[%s14296_s1 + $0x187c] ss:$12 sps:$4 sm:$0xff]  }
 0x1f5   : > { %6800 = vmatpush2.bf16.msra.mxu0 %v10632_v51  ;;  %v10686_v51 = vld [vmem:[%s11272_s26 + $0x178] ss:$132 sps:$4 sm:$0xff]  }
 0x1f6   : > { %6801 = vmatprep.subr.bf16.mxu0 %v10640_v37 }
 0x1f7   : > { %6853 = vmatpush2.bf16.msra.mxu1 %v10635_v46 }
 0x1f8   : > { %6854 = vmatprep.subr.bf16.mxu1 %v10643_v42  ;;  %v10692_v42 = vld [vmem:[%s11272_s26 + $0x180] ss:$132 sps:$4 sm:$0xff]  }
 0x1f9   : > { %6802 = vmatpush2.bf16.msra.mxu0 %v10638_v40 }
 0x1fa   : > { %6803 = vmatprep.subr.bf16.mxu0 %v10646_v47 }
 0x1fb   : > { %6855 = vmatpush2.bf16.msra.mxu1 %v10641_v45  ;;  %v10693_v45 = vld [vmem:[%s14296_s1 + $0x140] ss:$12 sps:$4 sm:$0xff]  }
 0x1fc   : > { %6856 = vmatprep.subr.bf16.mxu1 %v10649_v48  ;;  %v10697_v48 = vld [vmem:[%s14296_s1 + $0x1864] ss:$12 sps:$4 sm:$0xff]  }
 0x1fd   : > { %6804 = vmatpush2.bf16.msra.mxu0 %v10644_v63  ;;  %v10694_v63 = vld [vmem:[%s14296_s1 + $0x80] ss:$12 sps:$4 sm:$0xff]  }
 0x1fe   : > { %6805 = vmatprep.subr.bf16.mxu0 %v10652_v58 }
 0x1ff   : > { %6857 = vmatpush2.bf16.msra.mxu1 %v10647_v50 }
 0x200   : > { %6858 = vmatprep.subr.bf16.mxu1 %v10655_v52 }
 0x201   : > { %6806 = vmatpush2.bf16.msra.mxu0 %v10650_v53 }
 0x202   : > { %6807 = vmatprep.subr.bf16.mxu0 %v10658_v56 }
 0x203   : > { %6859 = vmatpush2.bf16.msra.mxu1 %v10653_v55  ;;  %v10698_v55 = vld [vmem:[%s14296_s1 + $0x128] ss:$12 sps:$4 sm:$0xff]  }
 0x204   : > { %6860 = vmatprep.subr.bf16.mxu1 %v10661_v24  ;;  %v11071_v24 = vmov 0  }
 0x205   : > { %6808 = vmatpush2.bf16.msra.mxu0 %v10656_v1  ;;  %v10699_v1 = vld [vmem:[%s14296_s1 + $0x68] ss:$12 sps:$4 sm:$0xff]  }
 0x206   : > { %6809 = vmatprep.subr.bf16.mxu0 %v10664_v4 }
 0x207   : > { %6861 = vmatpush2.bf16.msra.mxu1 %v10659_v57 }
 0x208   : > { %6862 = vmatprep.subr.bf16.mxu1 %v10667_v61 }
 0x209   : > { %6810 = vmatpush2.bf16.msra.mxu0 %v10662_v62  ;;  %v10702_v62 = vld [vmem:[%s14296_s1 + $0x184c] ss:$12 sps:$4 sm:$0xff]  }
 0x20a   : > { %6885 = vmatprep.subr.bf16.mxu0 %v10673_v5 }
 0x20b   : > { %6863 = vmatpush2.bf16.msra.mxu1 %v10665_v30 }
 0x20c   : > { %v6495_v25 = vpop.f32.mrf.mxu0  ;;  %6812 = vmatmul.mubr.bf16.vlgmr.msra.gmra.mxu0 %v10668_v2  ;;  %9250 = vmatprep.subr.bf16.mxu1 %v10677_v11  ;;  %v10996_v2 = vld [vmem:[%s11272_s26 + $0x4] ss:$132 sps:$4 sm:$0xff]   ;;  %v10707_v11 = vld [vmem:[%s14296_s1 + $0x1834] ss:$12 sps:$4 sm:$0xff]  }
 0x20d   : > { %v6496_v28 = vadd.f32 %v6495_v25, %v12661_v23  ;;  %6886 = vmatpush1.bf16.msra.mxu0 %v10671_v6  ;;  %6821 = vmatprep.mubr.bf16.mxu0 %v10683_v14  ;;  %v10687_v23 = vld [vmem:[%s14296_s1 + $0x1878] ss:$12 sps:$4 sm:$0xff]   ;;  %v10703_v6 = vld [vmem:[%s14296_s1 + $0x110] ss:$12 sps:$4 sm:$0xff]   ;;  %v10714_v25 = vld [vmem:[%s14296_s1 + $0x20] ss:$12 sps:$4 sm:$0xff]  }
 0x20e   : > { %v12882_v29 = vpop.f32.mrf.mxu0  ;;  %v6548_v31 = vpop.f32.mrf.mxu1  ;;  %6865 = vmatmul.mubr.bf16.vlgmr.msra.gmra.mxu1 %v10674_v7  ;;  %6887 = vmatprep.subr.bf16.mxu0 %v10681_v17  ;;  %v10709_v14 = vld [vmem:[%s14296_s1 + $0x38] ss:$12 sps:$4 sm:$0xff]   ;;  %v10712_v17 = vld [vmem:[%s14296_s1 + $0x181c] ss:$12 sps:$4 sm:$0xff]  }
 0x20f   : > { %v12888_v46 = vadd.f32 %v6548_v31, %v6496_v28  ;;  %9251 = vmatpush3.bf16.msra.mxu1 %v10678_v12  ;;  %6874 = vmatprep.mubr.bf16.mxu1 %v10690_v19  ;;  %v10705_v12 = vld [vmem:[%s14296_s1 + $0x1830] ss:$12 sps:$4 sm:$0xff]   ;;  %v10713_v19 = vld [vmem:[%s14296_s1 + $0xe0] ss:$12 sps:$4 sm:$0xff]   ;;  %v10719_v31 = vld [vmem:[%s14296_s1 + $0x8] ss:$12 sps:$4 sm:$0xff]  }
 0x210   : > { %v6499_v37 = vpop.f32.mrf.mxu0  ;;  %v12893_v40 = vpop.f32.mrf.mxu1  ;;  %9252 = vmatprep.subr.bf16.mxu1 %v10682_v26  ;;  %v10717_v26 = vld [vmem:[%s14296_s1 + $0x1804] ss:$12 sps:$4 sm:$0xff]   ;;  %v10715_v28 = vld [vmem:[%s14296_s1 + $0x1800] ss:$12 sps:$4 sm:$0xff]  }
 0x211   : > { %v12900_v47 = vadd.f32 %v6499_v37, %v12682_v38  ;;  %6888 = vmatpush1.bf16.msra.mxu0 %v10679_v18  ;;  %v10695_v38 = vld [vmem:[%s14296_s1 + $0x1860] ss:$12 sps:$4 sm:$0xff]   ;;  %v10710_v18 = vld [vmem:[%s14296_s1 + $0x1818] ss:$12 sps:$4 sm:$0xff]   ;;  %v10723_v37 = vld [vmem:[%s14296_s1 + $0x470] ss:$12 sps:$4 sm:$0xff]  }
 0x212   : > { %v12908_v50 = vpop.f32.mrf.mxu0  ;;  %v12910_v58 = vpop.f32.mrf.mxu1  ;;  %6889 = vmatprep.subr.bf16.mxu0 %v10689_v36  ;;  %v10721_v36 = vld [vmem:[%s14296_s1 + $0x2f0] ss:$12 sps:$4 sm:$0xff]  }
 0x213   : > { %9253 = vmatpush3.bf16.msra.mxu1 %v10685_v41  ;;  %v10718_v41 = vld [vmem:[%s14296_s1 + $0xc8] ss:$12 sps:$4 sm:$0xff]  }
 0x214   : > { %v6505_v53 = vpop.f32.mrf.mxu0  ;;  %v12915_v52 = vpop.f32.mrf.mxu1  ;;  %6822 = vmatmul.mubr.bf16.gmra.mxu0 %v10686_v51  ;;  %9254 = vmatprep.subr.bf16.mxu1 %v10693_v45  ;;  %v10720_v51 = vld [vmem:[%s11272_s26 + $0x80] ss:$132 sps:$4 sm:$0xff]  }
 0x215   : > { %v6506_v56 = vadd.f32 %v6505_v53, %v12701_v54  ;;  %6890 = vmatpush1.bf16.msra.mxu0 %v10687_v23  ;;  %6917 = vmatprep.mubr.bf16.mxu0 %v11071_v24  ;;  %v10700_v54 = vld [vmem:[%s14296_s1 + $0x1848] ss:$12 sps:$4 sm:$0xff]   ;;  %v10722_v23 = vld [vmem:[%s14296_s1 + $0x230] ss:$12 sps:$4 sm:$0xff]   ;;  %v10725_v45 = vld [vmem:[%s14296_s1 + $0x2d8] ss:$12 sps:$4 sm:$0xff]  }
 0x216   : > { %v6507_v57 = vpop.f32.mrf.mxu0  ;;  %v6558_v4 = vpop.f32.mrf.mxu1  ;;  %6875 = vmatmul.mubr.bf16.gmra.mxu1 %v10692_v42  ;;  %6891 = vmatprep.subr.bf16.mxu0 %v10697_v48  ;;  %v10724_v42 = vld [vmem:[%s14296_s1 + $0x3b0] ss:$12 sps:$4 sm:$0xff]   ;;  %v10727_v48 = vld [vmem:[%s14296_s1 + $0x458] ss:$12 sps:$4 sm:$0xff]  }
 0x217   : > { %v12928_v61 = vadd.f32 %v6507_v57, %v12710_v60  ;;  %v12930_v30 = vadd.f32 %v6558_v4, %v6506_v56  ;;  %9255 = vmatpush3.bf16.msra.mxu1 %v10694_v63  ;;  %6970 = vmatprep.mubr.bf16.mxu1 %v10996_v2  ;;  %v10704_v60 = vld [vmem:[%s14296_s1 + $0x50] ss:$12 sps:$4 sm:$0xff]   ;;  %v10726_v63 = vld [vmem:[%s14296_s1 + $0x218] ss:$12 sps:$4 sm:$0xff]   ;;  %v10729_v56 = vld [vmem:[%s11272_s26 + $0x188] ss:$132 sps:$4 sm:$0xff]  }
 0x218   : > { %v6509_v5 = vpop.f32.mrf.mxu0  ;;  %9256 = vmatprep.subr.bf16.mxu1 %v10698_v55  ;;  %v10997_v53 = vld [vmem:[%s11272_s26] ss:$132 sps:$4 sm:$0xff]   ;;  %v10734_v4 = vld [vmem:[%s14296_s1 + $0x2a8] ss:$12 sps:$4 sm:$0xff]  }
 0x219   : > { %v12940_v7 = vadd.f32 %v6509_v5, %v12718_v0  ;;  %6892 = vmatpush1.bf16.msra.mxu0 %v10695_v38  ;;  %v10708_v0 = vld [vmem:[%s14296_s1 + $0xf8] ss:$12 sps:$4 sm:$0xff]   ;;  %v10730_v55 = vld [vmem:[%s14296_s1 + $0x2c0] ss:$12 sps:$4 sm:$0xff]   ;;  %v10735_v2 = vld [vmem:[%s14296_s1 + $0x1e8] ss:$12 sps:$4 sm:$0xff]  }
 0x21a   : > { %6893 = vmatprep.subr.bf16.mxu0 %v10702_v62  ;;  %v10728_v38 = vld [vmem:[%s14296_s1 + $0x398] ss:$12 sps:$4 sm:$0xff]   ;;  %v10731_v57 = vld [vmem:[%s14296_s1 + $0x200] ss:$12 sps:$4 sm:$0xff]  }
 0x21b   : > { %9257 = vmatpush3.bf16.msra.mxu1 %v10699_v1  ;;  %v10998_v1 = vld [vmem:[%s11272_s26 + $0x10c] ss:$132 sps:$4 sm:$0xff]  }
 0x21c   : > { %9258 = vmatprep.subr.bf16.mxu1 %v10703_v6  ;;  %v10733_v62 = vld [vmem:[%s14296_s1 + $0x380] ss:$12 sps:$4 sm:$0xff]   ;;  %v10738_v6 = vld [vmem:[%s14296_s1 + $0x290] ss:$12 sps:$4 sm:$0xff]  }
 0x21d   : > { %6894 = vmatpush1.bf16.msra.mxu0 %v10700_v54  ;;  %v10736_v54 = vld [vmem:[%s14296_s1 + $0x428] ss:$12 sps:$4 sm:$0xff]   ;;  %v10999_v5 = vld [vmem:[%s11272_s26 + $0xc] ss:$132 sps:$4 sm:$0xff]  }
 0x21e   : > { %6895 = vmatprep.subr.bf16.mxu0 %v10707_v11  ;;  %v10737_v11 = vld [vmem:[%s14296_s1 + $0x368] ss:$12 sps:$4 sm:$0xff]  }
 0x21f   : > { %9259 = vmatpush3.bf16.msra.mxu1 %v10704_v60  ;;  %v11000_v60 = vld [vmem:[%s11272_s26 + $0x108] ss:$132 sps:$4 sm:$0xff]  }
 0x220   : > { %9260 = vmatprep.subr.bf16.mxu1 %v10708_v0  ;;  %v10740_v0 = vld [vmem:[%s14296_s1 + $0x410] ss:$12 sps:$4 sm:$0xff]  }
 0x221   : > { %6896 = vmatpush1.bf16.msra.mxu0 %v10705_v12  ;;  %v11001_v12 = vld [vmem:[%s11272_s26 + $0x14] ss:$132 sps:$4 sm:$0xff]  }
 0x222   : > { %6897 = vmatprep.subr.bf16.mxu0 %v10712_v17  ;;  %v10742_v17 = vld [vmem:[%s14296_s1 + $0x278] ss:$12 sps:$4 sm:$0xff]  }
 0x223   : > { %9261 = vmatpush3.bf16.msra.mxu1 %v10709_v14  ;;  %v10739_v14 = vld [vmem:[%s14296_s1 + $0x1d0] ss:$12 sps:$4 sm:$0xff]  }
 0x224   : > { %9262 = vmatprep.subr.bf16.mxu1 %v10713_v19  ;;  %v10744_v19 = vld [vmem:[%s14296_s1 + $0x3f8] ss:$12 sps:$4 sm:$0xff]  }
 0x225   : > { %6898 = vmatpush1.bf16.msra.mxu0 %v10710_v18  ;;  %v10741_v18 = vld [vmem:[%s14296_s1 + $0x350] ss:$12 sps:$4 sm:$0xff]  }
 0x226   : > { %6899 = vmatprep.subr.bf16.mxu0 %v10717_v26  ;;  %v10746_v26 = vld [vmem:[%s14296_s1 + $0x260] ss:$12 sps:$4 sm:$0xff]  }
 0x227   : > { %9263 = vmatpush3.bf16.msra.mxu1 %v10714_v25  ;;  %v10743_v25 = vld [vmem:[%s14296_s1 + $0x1b8] ss:$12 sps:$4 sm:$0xff]  }
 0x228   : > { %9264 = vmatprep.subr.bf16.mxu1 %v10718_v41  ;;  %v10748_v41 = vld [vmem:[%s14296_s1 + $0x3e0] ss:$12 sps:$4 sm:$0xff]  }
 0x229   : > { %6900 = vmatpush1.bf16.msra.mxu0 %v10715_v28  ;;  %v10745_v28 = vld [vmem:[%s14296_s1 + $0x338] ss:$12 sps:$4 sm:$0xff]  }
 0x22a   : > { %9278 = vmatprep.subr.bf16.mxu0 %v10721_v36  ;;  %v10749_v36 = vld [vmem:[%s14296_s1 + $0x320] ss:$12 sps:$4 sm:$0xff]  }
 0x22b   : > { %9265 = vmatpush3.bf16.msra.mxu1 %v10719_v31  ;;  %v10747_v31 = vld [vmem:[%s14296_s1 + $0x1a0] ss:$12 sps:$4 sm:$0xff]  }
 0x22c   : > { %6918 = vmatmul.mubr.bf16.vlgmr.msra.gmra.mxu0 %v10720_v51  ;;  %9306 = vmatprep.subr.bf16.mxu1 %v10723_v37  ;;  %v10750_v51 = vld [vmem:[%s14296_s1 + $0x248] ss:$12 sps:$4 sm:$0xff]  }
 0x22d   : > { %9279 = vmatpush3.bf16.msra.mxu0 %v10722_v23  ;;  %6927 = vmatprep.mubr.bf16.mxu0 %v11071_v24  ;;  %v10732_v24 = vld [vmem:[%s14296_s1 + $0x440] ss:$12 sps:$4 sm:$0xff]   ;;  %v10752_v23 = vld [vmem:[%s14296_s1 + $0x3c8] ss:$12 sps:$4 sm:$0xff]  }
 0x22e   : > { %6971 = vmatmul.mubr.bf16.vlgmr.msra.gmra.mxu1 %v10997_v53  ;;  %9280 = vmatprep.subr.bf16.mxu0 %v10725_v45  ;;  %v10751_v37 = vld [vmem:[%s14296_s1 + $0x188] ss:$12 sps:$4 sm:$0xff]   ;;  %v10758_v53 = vld [vmem:[%s14296_s1 + $0x5d8] ss:$12 sps:$4 sm:$0xff]  }
 0x22f   : > { %9307 = vmatpush3.bf16.msra.mxu1 %v10724_v42  ;;  %6978 = vmatprep.mubr.bf16.mxu1 %v10998_v1  ;;  %v10754_v42 = vld [vmem:[%s14296_s1 + $0x5f0] ss:$12 sps:$4 sm:$0xff]   ;;  %v10753_v45 = vld [vmem:[%s14296_s1 + $0x308] ss:$12 sps:$4 sm:$0xff]  }
 0x230   : > { %9308 = vmatprep.subr.bf16.mxu1 %v10727_v48  ;;  %v10755_v48 = vld [vmem:[%s14296_s1 + $0x530] ss:$12 sps:$4 sm:$0xff]   ;;  %v11002_v1 = vld [vmem:[%s11272_s26 + $0x8] ss:$132 sps:$4 sm:$0xff]  }
 0x231   : > { %9281 = vmatpush3.bf16.msra.mxu0 %v10726_v63  ;;  %v10756_v63 = vld [vmem:[%s14296_s1 + $0x770] ss:$12 sps:$4 sm:$0xff]  }
 0x232   : > { %9282 = vmatprep.subr.bf16.mxu0 %v10730_v55  ;;  %v10757_v55 = vld [vmem:[%s14296_s1 + $0x6b0] ss:$12 sps:$4 sm:$0xff]  }
 0x233   : > { %9309 = vmatpush3.bf16.msra.mxu1 %v10728_v38  ;;  %v13093_v38 = vpop.f32.mrf.mxu0 }
 0x234   : > { %6928 = vmatmul.mubr.bf16.gmra.mxu0 %v10729_v56  ;;  %9310 = vmatprep.subr.bf16.mxu1 %v10732_v24  ;;  %v10760_v24 = vld [vmem:[%s14296_s1 + $0x758] ss:$12 sps:$4 sm:$0xff]  }
 0x235   : > { %9283 = vmatpush3.bf16.msra.mxu0 %v10731_v57  ;;  %7019 = vmatprep.mubr.bf16.mxu0 %v10999_v5  ;;  %v10762_v5 = vld [vmem:[%s14296_s1 + $0x5c0] ss:$12 sps:$4 sm:$0xff]  }
 0x236   : > { %9284 = vmatprep.subr.bf16.mxu0 %v10734_v4  ;;  %6979 = vmatmul.mubr.bf16.gmra.mxu1 %v11000_v60  ;;  %v10759_v4 = vld [vmem:[%s14296_s1 + $0x518] ss:$12 sps:$4 sm:$0xff]  }
 0x237   : > { %9311 = vmatpush3.bf16.msra.mxu1 %v10733_v62  ;;  %7068 = vmatprep.mubr.bf16.mxu1 %v11001_v12  ;;  %v11003_v62 = vld [vmem:[%s11272_s26 + $0x114] ss:$132 sps:$4 sm:$0xff]   ;;  %v10763_v12 = vld [vmem:[%s14296_s1 + $0x500] ss:$12 sps:$4 sm:$0xff]  }
 0x238   : > { %9312 = vmatprep.subr.bf16.mxu1 %v10736_v54 }
 0x239   : > { %9285 = vmatpush3.bf16.msra.mxu0 %v10735_v2  ;;  %v11004_v2 = vld [vmem:[%s11272_s26 + $0x10] ss:$132 sps:$4 sm:$0xff]  }
 0x23a   : > { %9286 = vmatprep.subr.bf16.mxu0 %v10738_v6  ;;  %v11005_v6 = vld [vmem:[%s11272_s26 + $0x11c] ss:$132 sps:$4 sm:$0xff]  }
 0x23b   : > { %9313 = vmatpush3.bf16.msra.mxu1 %v10737_v11  ;;  %v10764_v11 = vld [vmem:[%s14296_s1 + $0x740] ss:$12 sps:$4 sm:$0xff]  }
 0x23c   : > { %9314 = vmatprep.subr.bf16.mxu1 %v10740_v0 }
 0x23d   : > { %9287 = vmatpush3.bf16.msra.mxu0 %v10739_v14  ;;  %v10766_v14 = vld [vmem:[%s14296_s1 + $0x5a8] ss:$12 sps:$4 sm:$0xff]  }
 0x23e   : > { %9288 = vmatprep.subr.bf16.mxu0 %v10742_v17  ;;  %v10765_v17 = vld [vmem:[%s14296_s1 + $0x680] ss:$12 sps:$4 sm:$0xff]  }
 0x23f   : > { %9315 = vmatpush3.bf16.msra.mxu1 %v10741_v18 }
 0x240   : > { %9316 = vmatprep.subr.bf16.mxu1 %v10744_v19  ;;  %v11006_v19 = vld [vmem:[%s11272_s26 + $0x110] ss:$132 sps:$4 sm:$0xff]  }
 0x241   : > { %9289 = vmatpush3.bf16.msra.mxu0 %v10743_v25  ;;  %v10768_v25 = vld [vmem:[%s14296_s1 + $0x728] ss:$12 sps:$4 sm:$0xff]  }
 0x242   : > { %9290 = vmatprep.subr.bf16.mxu0 %v10746_v26 }
 0x243   : > { %9317 = vmatpush3.bf16.msra.mxu1 %v10745_v28  ;;  %v10767_v28 = vld [vmem:[%s14296_s1 + $0x4e8] ss:$12 sps:$4 sm:$0xff]  }
 0x244   : > { %9318 = vmatprep.subr.bf16.mxu1 %v10748_v41  ;;  %v11007_v41 = vld [vmem:[%s11272_s26 + $0x1c] ss:$132 sps:$4 sm:$0xff]  }
 0x245   : > { %9291 = vmatpush3.bf16.msra.mxu0 %v10747_v31  ;;  %v11008_v31 = vld [vmem:[%s11272_s26 + $0x118] ss:$132 sps:$4 sm:$0xff]  }
 0x246   : > { %9292 = vmatprep.subr.bf16.mxu0 %v10750_v51  ;;  %v10770_v51 = vld [vmem:[%s14296_s1 + $0x590] ss:$12 sps:$4 sm:$0xff]  }
 0x247   : > { %9319 = vmatpush3.bf16.msra.mxu1 %v10749_v36  ;;  %v11009_v36 = vld [vmem:[%s11272_s26 + $0x24] ss:$132 sps:$4 sm:$0xff]  }
 0x248   : > { %9320 = vmatprep.subr.bf16.mxu1 %v10752_v23  ;;  %v10772_v23 = vld [vmem:[%s14296_s1 + $0x710] ss:$12 sps:$4 sm:$0xff]  }
 0x249   : > { %9293 = vmatpush3.bf16.msra.mxu0 %v10751_v37  ;;  %v10771_v37 = vld [vmem:[%s14296_s1 + $0x4d0] ss:$12 sps:$4 sm:$0xff]  }
 0x24a   : > { %9334 = vmatprep.subr.bf16.mxu0 %v10754_v42  ;;  %v10774_v42 = vld [vmem:[%s14296_s1 + $0x578] ss:$12 sps:$4 sm:$0xff]  }
 0x24b   : > { %9321 = vmatpush3.bf16.msra.mxu1 %v10753_v45  ;;  %v10773_v45 = vld [vmem:[%s14296_s1 + $0x650] ss:$12 sps:$4 sm:$0xff]  }
 0x24c   : > { %v6601_v56 = vpop.f32.mrf.mxu0  ;;  %7020 = vmatmul.mubr.bf16.vlgmr.msra.gmra.mxu0 %v11002_v1  ;;  %9362 = vmatprep.subr.bf16.mxu1 %v10756_v63  ;;  %v10776_v63 = vld [vmem:[%s14296_s1 + $0x6f8] ss:$12 sps:$4 sm:$0xff]   ;;  %v10779_v1 = vld [vmem:[%s14296_s1 + $0x4a0] ss:$12 sps:$4 sm:$0xff]  }
 0x24d   : > { %v13106_v57 = vadd.f32 %v6601_v56, %v12888_v46  ;;  %9335 = vmatpush3.bf16.msra.mxu0 %v10755_v48  ;;  %7027 = vmatprep.mubr.bf16.mxu0 %v11003_v62  ;;  %v10761_v46 = vld [vmem:[%s14296_s1 + $0x698] ss:$12 sps:$4 sm:$0xff]   ;;  %v10780_v56 = vld [vmem:[%s14296_s1 + $0x6e0] ss:$12 sps:$4 sm:$0xff]   ;;  %v10784_v62 = vld [vmem:[%s14296_s1 + $0x6c8] ss:$12 sps:$4 sm:$0xff]  }
 0x24e   : > { %v13112_v54 = vpop.f32.mrf.mxu0  ;;  %7069 = vmatmul.mubr.bf16.vlgmr.msra.gmra.mxu1 %v11004_v2  ;;  %9336 = vmatprep.subr.bf16.mxu0 %v10758_v53  ;;  %v10775_v48 = vld [vmem:[%s14296_s1 + $0x4b8] ss:$12 sps:$4 sm:$0xff]   ;;  %v10778_v53 = vld [vmem:[%s14296_s1 + $0x560] ss:$12 sps:$4 sm:$0xff]   ;;  %v10783_v2 = vld [vmem:[%s14296_s1 + $0x488] ss:$12 sps:$4 sm:$0xff]  }
 0x24f   : > { %9363 = vmatpush3.bf16.msra.mxu1 %v10757_v55  ;;  %7076 = vmatprep.mubr.bf16.mxu1 %v11005_v6  ;;  %v10777_v55 = vld [vmem:[%s14296_s1 + $0x638] ss:$12 sps:$4 sm:$0xff]   ;;  %v10788_v6 = vld [vmem:[%s14296_s1 + $0xa70] ss:$12 sps:$4 sm:$0xff]  }
 0x250   : > { %v13122_v60 = vpop.f32.mrf.mxu0  ;;  %9364 = vmatprep.subr.bf16.mxu1 %v10760_v24  ;;  %v10782_v24 = vld [vmem:[%s14296_s1 + $0x548] ss:$12 sps:$4 sm:$0xff]  }
 0x251   : > { %9337 = vmatpush3.bf16.msra.mxu0 %v10759_v4  ;;  %v10781_v4 = vld [vmem:[%s14296_s1 + $0x620] ss:$12 sps:$4 sm:$0xff]  }
 0x252   : > { %v13130_v0 = vpop.f32.mrf.mxu0  ;;  %9338 = vmatprep.subr.bf16.mxu0 %v10762_v5  ;;  %v10786_v5 = vld [vmem:[%s14296_s1 + $0x8f0] ss:$12 sps:$4 sm:$0xff]  }
 0x253   : > { %9365 = vmatpush3.bf16.msra.mxu1 %v10761_v46  ;;  %v10785_v46 = vld [vmem:[%s14296_s1 + $0x608] ss:$12 sps:$4 sm:$0xff]  }
 0x254   : > { %v6611_v18 = vpop.f32.mrf.mxu0  ;;  %7028 = vmatmul.mubr.bf16.gmra.mxu0 %v11006_v19  ;;  %9366 = vmatprep.subr.bf16.mxu1 %v10764_v11  ;;  %v10787_v11 = vld [vmem:[%s14296_s1 + $0x830] ss:$12 sps:$4 sm:$0xff]   ;;  %v10791_v19 = vld [vmem:[%s14296_s1 + $0x818] ss:$12 sps:$4 sm:$0xff]  }
 0x255   : > { %v13143_v26 = vadd.f32 %v6611_v18, %v12930_v30  ;;  %9339 = vmatpush3.bf16.msra.mxu0 %v10763_v12  ;;  %7117 = vmatprep.mubr.bf16.mxu0 %v11007_v41  ;;  %v10769_v30 = vld [vmem:[%s14296_s1 + $0x668] ss:$12 sps:$4 sm:$0xff]   ;;  %v10790_v12 = vld [vmem:[%s14296_s1 + $0x8d8] ss:$12 sps:$4 sm:$0xff]   ;;  %v10794_v41 = vld [vmem:[%s14296_s1 + $0x8c0] ss:$12 sps:$4 sm:$0xff]  }
 0x256   : > { %7077 = vmatmul.mubr.bf16.gmra.mxu1 %v11008_v31  ;;  %9340 = vmatprep.subr.bf16.mxu0 %v10766_v14  ;;  %v10789_v14 = vld [vmem:[%s14296_s1 + $0x9b0] ss:$12 sps:$4 sm:$0xff]   ;;  %v10792_v18 = vld [vmem:[%s14296_s1 + $0xa58] ss:$12 sps:$4 sm:$0xff]  }
 0x257   : > { %14313 = vst [vmem:[#allocation2_spill] sm:$0xff] %v13143_v26  ;;  %9367 = vmatpush3.bf16.msra.mxu1 %v10765_v17  ;;  %7166 = vmatprep.mubr.bf16.mxu1 %v11009_v36  ;;  %v11010_v17 = vld [vmem:[%s11272_s26 + $0x18] ss:$132 sps:$4 sm:$0xff]   ;;  %v10795_v36 = vld [vmem:[%s14296_s1 + $0x800] ss:$12 sps:$4 sm:$0xff]  }
 0x258   : > { %9368 = vmatprep.subr.bf16.mxu1 %v10768_v25  ;;  %v11011_v25 = vld [vmem:[%s11272_s26 + $0x124] ss:$132 sps:$4 sm:$0xff]  }
 0x259   : > { %9341 = vmatpush3.bf16.msra.mxu0 %v10767_v28  ;;  %v11012_v28 = vld [vmem:[%s11272_s26 + $0x20] ss:$132 sps:$4 sm:$0xff]  }
 0x25a   : > { %9342 = vmatprep.subr.bf16.mxu0 %v10770_v51  ;;  %v10793_v31 = vld [vmem:[%s14296_s1 + $0x998] ss:$12 sps:$4 sm:$0xff]   ;;  %v11013_v51 = vld [vmem:[%s11272_s26 + $0x12c] ss:$132 sps:$4 sm:$0xff]  }
 0x25b   : > { %9369 = vmatpush3.bf16.msra.mxu1 %v10769_v30  ;;  %v10796_v30 = vld [vmem:[%s14296_s1 + $0xa40] ss:$12 sps:$4 sm:$0xff]  }
 0x25c   : > { %9370 = vmatprep.subr.bf16.mxu1 %v10772_v23  ;;  %v10798_v23 = vld [vmem:[%s14296_s1 + $0x8a8] ss:$12 sps:$4 sm:$0xff]  }
 0x25d   : > { %9343 = vmatpush3.bf16.msra.mxu0 %v10771_v37  ;;  %v10797_v37 = vld [vmem:[%s14296_s1 + $0x980] ss:$12 sps:$4 sm:$0xff]  }
 0x25e   : > { %9344 = vmatprep.subr.bf16.mxu0 %v10774_v42  ;;  %v11014_v42 = vld [vmem:[%s11272_s26 + $0x120] ss:$132 sps:$4 sm:$0xff]  }
 0x25f   : > { %9371 = vmatpush3.bf16.msra.mxu1 %v10773_v45  ;;  %v10800_v45 = vld [vmem:[%s14296_s1 + $0xa28] ss:$12 sps:$4 sm:$0xff]  }
 0x260   : > { %9372 = vmatprep.subr.bf16.mxu1 %v10776_v63  ;;  %v10799_v63 = vld [vmem:[%s14296_s1 + $0x7e8] ss:$12 sps:$4 sm:$0xff]  }
 0x261   : > { %9345 = vmatpush3.bf16.msra.mxu0 %v10775_v48  ;;  %v11015_v48 = vld [vmem:[%s11272_s26 + $0x2c] ss:$132 sps:$4 sm:$0xff]  }
 0x262   : > { %9346 = vmatprep.subr.bf16.mxu0 %v10778_v53  ;;  %v11016_v53 = vld [vmem:[%s11272_s26 + $0x128] ss:$132 sps:$4 sm:$0xff]  }
 0x263   : > { %9373 = vmatpush3.bf16.msra.mxu1 %v10777_v55  ;;  %v10802_v55 = vld [vmem:[%s14296_s1 + $0x890] ss:$12 sps:$4 sm:$0xff]  }
 0x264   : > { %9374 = vmatprep.subr.bf16.mxu1 %v10780_v56  ;;  %v10801_v56 = vld [vmem:[%s14296_s1 + $0x968] ss:$12 sps:$4 sm:$0xff]  }
 0x265   : > { %9347 = vmatpush3.bf16.msra.mxu0 %v10779_v1  ;;  %v10803_v1 = vld [vmem:[%s14296_s1 + $0x7d0] ss:$12 sps:$4 sm:$0xff]  }
 0x266   : > { %9348 = vmatprep.subr.bf16.mxu0 %v10782_v24  ;;  %v11017_v24 = vld [vmem:[%s11272_s26 + $0x34] ss:$132 sps:$4 sm:$0xff]  }
 0x267   : > { %9375 = vmatpush3.bf16.msra.mxu1 %v10781_v4  ;;  %v10804_v4 = vld [vmem:[%s14296_s1 + $0xa10] ss:$12 sps:$4 sm:$0xff]  }
 0x268   : > { %9376 = vmatprep.subr.bf16.mxu1 %v10784_v62  ;;  %v10805_v62 = vld [vmem:[%s14296_s1 + $0x950] ss:$12 sps:$4 sm:$0xff]  }
 0x269   : > { %9349 = vmatpush3.bf16.msra.mxu0 %v10783_v2  ;;  %v10806_v2 = vld [vmem:[%s14296_s1 + $0x878] ss:$12 sps:$4 sm:$0xff]  }
 0x26a   : > { %9390 = vmatprep.subr.bf16.mxu0 %v10786_v5  ;;  %v10807_v5 = vld [vmem:[%s14296_s1 + $0x7b8] ss:$12 sps:$4 sm:$0xff]  }
 0x26b   : > { %9377 = vmatpush3.bf16.msra.mxu1 %v10785_v46  ;;  %v10808_v46 = vld [vmem:[%s14296_s1 + $0x9f8] ss:$12 sps:$4 sm:$0xff]  }
 0x26c   : > { %7118 = vmatmul.mubr.bf16.vlgmr.msra.gmra.mxu0 %v11010_v17  ;;  %9418 = vmatprep.subr.bf16.mxu1 %v10788_v6  ;;  %v10809_v6 = vld [vmem:[%s14296_s1 + $0x938] ss:$12 sps:$4 sm:$0xff]   ;;  %v10813_v17 = vld [vmem:[%s14296_s1 + $0x920] ss:$12 sps:$4 sm:$0xff]  }
 0x26d   : > { %9391 = vmatpush3.bf16.msra.mxu0 %v10787_v11  ;;  %7125 = vmatprep.mubr.bf16.mxu0 %v11011_v25  ;;  %v10810_v11 = vld [vmem:[%s14296_s1 + $0x860] ss:$12 sps:$4 sm:$0xff]   ;;  %v10816_v25 = vld [vmem:[%s14296_s1 + $0x9c8] ss:$12 sps:$4 sm:$0xff]  }
 0x26e   : > { %7167 = vmatmul.mubr.bf16.vlgmr.msra.gmra.mxu1 %v11012_v28  ;;  %9392 = vmatprep.subr.bf16.mxu0 %v10790_v12  ;;  %v10811_v12 = vld [vmem:[%s14296_s1 + $0x7a0] ss:$12 sps:$4 sm:$0xff]   ;;  %v10817_v28 = vld [vmem:[%s14296_s1 + $0x908] ss:$12 sps:$4 sm:$0xff]  }
 0x26f   : > { %9419 = vmatpush3.bf16.msra.mxu1 %v10789_v14  ;;  %7174 = vmatprep.mubr.bf16.mxu1 %v11013_v51  ;;  %v10812_v14 = vld [vmem:[%s14296_s1 + $0x9e0] ss:$12 sps:$4 sm:$0xff]   ;;  %v10820_v51 = vld [vmem:[%s14296_s1 + $0xd70] ss:$12 sps:$4 sm:$0xff]  }
 0x270   : > { %9420 = vmatprep.subr.bf16.mxu1 %v10792_v18  ;;  %v10814_v18 = vld [vmem:[%s14296_s1 + $0x848] ss:$12 sps:$4 sm:$0xff]  }
 0x271   : > { %9393 = vmatpush3.bf16.msra.mxu0 %v10791_v19  ;;  %v10815_v19 = vld [vmem:[%s14296_s1 + $0x788] ss:$12 sps:$4 sm:$0xff]  }
 0x272   : > { %9394 = vmatprep.subr.bf16.mxu0 %v10794_v41  ;;  %v10818_v41 = vld [vmem:[%s14296_s1 + $0xbf0] ss:$12 sps:$4 sm:$0xff]  }
 0x273   : > { %9421 = vmatpush3.bf16.msra.mxu1 %v10793_v31  ;;  %v10819_v31 = vld [vmem:[%s14296_s1 + $0xb30] ss:$12 sps:$4 sm:$0xff]  }
 0x274   : > { %7126 = vmatmul.mubr.bf16.gmra.mxu0 %v11014_v42  ;;  %9422 = vmatprep.subr.bf16.mxu1 %v10796_v30  ;;  %v10821_v30 = vld [vmem:[%s14296_s1 + $0xcb0] ss:$12 sps:$4 sm:$0xff]   ;;  %v10824_v42 = vld [vmem:[%s14296_s1 + $0xd58] ss:$12 sps:$4 sm:$0xff]  }
 0x275   : > { %9395 = vmatpush3.bf16.msra.mxu0 %v10795_v36  ;;  %7215 = vmatprep.mubr.bf16.mxu0 %v11015_v48  ;;  %v13318_v36 = vpop.f32.mrf.mxu1 }
 0x276   : > { %7175 = vmatmul.mubr.bf16.gmra.mxu1 %v11016_v53  ;;  %9396 = vmatprep.subr.bf16.mxu0 %v10798_v23  ;;  %v10822_v23 = vld [vmem:[%s14296_s1 + $0xbd8] ss:$12 sps:$4 sm:$0xff]   ;;  %v11020_v53 = vld [vmem:[%s11272_s26 + $0x30] ss:$132 sps:$4 sm:$0xff]  }
 0x277   : > { %9423 = vmatpush3.bf16.msra.mxu1 %v10797_v37  ;;  %7264 = vmatprep.mubr.bf16.mxu1 %v11017_v24  ;;  %v10823_v37 = vld [vmem:[%s14296_s1 + $0xb18] ss:$12 sps:$4 sm:$0xff]   ;;  %v13331_v48 = vpop.f32.mrf.mxu1  ;;  %v10827_v24 = vld [vmem:[%s14296_s1 + $0xb00] ss:$12 sps:$4 sm:$0xff]  }
 0x278   : > { %9424 = vmatprep.subr.bf16.mxu1 %v10800_v45  ;;  %v11018_v45 = vld [vmem:[%s11272_s26 + $0x28] ss:$132 sps:$4 sm:$0xff]  }
 0x279   : > { %9397 = vmatpush3.bf16.msra.mxu0 %v10799_v63  ;;  %v11019_v63 = vld [vmem:[%s11272_s26 + $0x134] ss:$132 sps:$4 sm:$0xff]  }
 0x27a   : > { %9398 = vmatprep.subr.bf16.mxu0 %v10802_v55  ;;  %v10825_v55 = vld [vmem:[%s14296_s1 + $0xc98] ss:$12 sps:$4 sm:$0xff]  }
 0x27b   : > { %9425 = vmatpush3.bf16.msra.mxu1 %v10801_v56  ;;  %v10826_v56 = vld [vmem:[%s14296_s1 + $0xbc0] ss:$12 sps:$4 sm:$0xff]  }
 0x27c   : > { %9426 = vmatprep.subr.bf16.mxu1 %v10804_v4  ;;  %v10828_v4 = vld [vmem:[%s14296_s1 + $0xd40] ss:$12 sps:$4 sm:$0xff]  }
 0x27d   : > { %9399 = vmatpush3.bf16.msra.mxu0 %v10803_v1  ;;  %v11021_v1 = vld [vmem:[%s11272_s26 + $0x13c] ss:$132 sps:$4 sm:$0xff]  }
 0x27e   : > { %9400 = vmatprep.subr.bf16.mxu0 %v10806_v2  ;;  %v10829_v2 = vld [vmem:[%s14296_s1 + $0xc80] ss:$12 sps:$4 sm:$0xff]  }
 0x27f   : > { %9427 = vmatpush3.bf16.msra.mxu1 %v10805_v62  ;;  %v13347_v62 = vpop.f32.mrf.mxu1 }
 0x280   : > { %9428 = vmatprep.subr.bf16.mxu1 %v10808_v46  ;;  %v10831_v46 = vld [vmem:[%s14296_s1 + $0xae8] ss:$12 sps:$4 sm:$0xff]  }
 0x281   : > { %9401 = vmatpush3.bf16.msra.mxu0 %v10807_v5  ;;  %v10830_v5 = vld [vmem:[%s14296_s1 + $0xba8] ss:$12 sps:$4 sm:$0xff]  }
 0x282   : > { %9402 = vmatprep.subr.bf16.mxu0 %v10810_v11  ;;  %v13361_v11 = vpop.f32.mrf.mxu1 }
 0x283   : > { %9429 = vmatpush3.bf16.msra.mxu1 %v10809_v6  ;;  %v10832_v6 = vld [vmem:[%s14296_s1 + $0xd28] ss:$12 sps:$4 sm:$0xff]  }
 0x284   : > { %9430 = vmatprep.subr.bf16.mxu1 %v10812_v14  ;;  %v11023_v14 = vld [vmem:[%s11272_s26 + $0x3c] ss:$132 sps:$4 sm:$0xff]  }
 0x285   : > { %9403 = vmatpush3.bf16.msra.mxu0 %v10811_v12  ;;  %v11022_v12 = vld [vmem:[%s11272_s26 + $0x130] ss:$132 sps:$4 sm:$0xff]  }
 0x286   : > { %9404 = vmatprep.subr.bf16.mxu0 %v10814_v18  ;;  %v10833_v18 = vld [vmem:[%s14296_s1 + $0xc68] ss:$12 sps:$4 sm:$0xff]  }
 0x287   : > { %9431 = vmatpush3.bf16.msra.mxu1 %v10813_v17  ;;  %v11024_v17 = vld [vmem:[%s11272_s26 + $0x138] ss:$132 sps:$4 sm:$0xff]  }
 0x288   : > { %9432 = vmatprep.subr.bf16.mxu1 %v10816_v25  ;;  %v10835_v25 = vld [vmem:[%s14296_s1 + $0xad0] ss:$12 sps:$4 sm:$0xff]  }
 0x289   : > { %9405 = vmatpush3.bf16.msra.mxu0 %v10815_v19  ;;  %v10834_v19 = vld [vmem:[%s14296_s1 + $0xb90] ss:$12 sps:$4 sm:$0xff]  }
 0x28a   : > { %9446 = vmatprep.subr.bf16.mxu0 %v10818_v41  ;;  %v11025_v41 = vld [vmem:[%s11272_s26 + $0x44] ss:$132 sps:$4 sm:$0xff]  }
 0x28b   : > { %9433 = vmatpush3.bf16.msra.mxu1 %v10817_v28  ;;  %v10836_v28 = vld [vmem:[%s14296_s1 + $0xd10] ss:$12 sps:$4 sm:$0xff]  }
 0x28c   : > { %7216 = vmatmul.mubr.bf16.vlgmr.msra.gmra.mxu0 %v11018_v45  ;;  %9474 = vmatprep.subr.bf16.mxu1 %v10820_v51  ;;  %v10837_v51 = vld [vmem:[%s14296_s1 + $0xc50] ss:$12 sps:$4 sm:$0xff]   ;;  %v10841_v45 = vld [vmem:[%s14296_s1 + $0xc38] ss:$12 sps:$4 sm:$0xff]  }
 0x28d   : > { %9447 = vmatpush3.bf16.msra.mxu0 %v10819_v31  ;;  %7223 = vmatprep.mubr.bf16.mxu0 %v11019_v63  ;;  %v13379_v31 = vpop.f32.mrf.mxu1  ;;  %v10842_v63 = vld [vmem:[%s14296_s1 + $0xb60] ss:$12 sps:$4 sm:$0xff]  }
 0x28e   : > { %7265 = vmatmul.mubr.bf16.vlgmr.msra.gmra.mxu1 %v11020_v53  ;;  %9448 = vmatprep.subr.bf16.mxu0 %v10822_v23  ;;  %v10839_v23 = vld [vmem:[%s14296_s1 + $0xab8] ss:$12 sps:$4 sm:$0xff]   ;;  %v10843_v53 = vld [vmem:[%s14296_s1 + $0xaa0] ss:$12 sps:$4 sm:$0xff]  }
 0x28f   : > { %9475 = vmatpush3.bf16.msra.mxu1 %v10821_v30  ;;  %7272 = vmatprep.mubr.bf16.mxu1 %v11021_v1  ;;  %v10838_v30 = vld [vmem:[%s14296_s1 + $0xb78] ss:$12 sps:$4 sm:$0xff]   ;;  %v10845_v1 = vld [vmem:[%s14296_s1 + $0xc20] ss:$12 sps:$4 sm:$0xff]  }
 0x290   : > { %9476 = vmatprep.subr.bf16.mxu1 %v10824_v42  ;;  %v13393_v42 = vpop.f32.mrf.mxu1 }
 0x291   : > { %9449 = vmatpush3.bf16.msra.mxu0 %v10823_v37  ;;  %v10840_v37 = vld [vmem:[%s14296_s1 + $0xcf8] ss:$12 sps:$4 sm:$0xff]  }
 0x292   : > { %9450 = vmatprep.subr.bf16.mxu0 %v10826_v56  ;;  %v13407_v56 = vpop.f32.mrf.mxu1 }
 0x293   : > { %9477 = vmatpush3.bf16.msra.mxu1 %v10825_v55  ;;  %v10844_v55 = vld [vmem:[%s14296_s1 + $0xce0] ss:$12 sps:$4 sm:$0xff]  }
 0x294   : > { %7224 = vmatmul.mubr.bf16.gmra.mxu0 %v11022_v12  ;;  %9478 = vmatprep.subr.bf16.mxu1 %v10828_v4  ;;  %v10848_v4 = vld [vmem:[%s14296_s1 + $0xcc8] ss:$12 sps:$4 sm:$0xff]   ;;  %v10850_v12 = vld [vmem:[%s14296_s1 + $0xef0] ss:$12 sps:$4 sm:$0xff]  }
 0x295   : > { %9451 = vmatpush3.bf16.msra.mxu0 %v10827_v24  ;;  %7313 = vmatprep.mubr.bf16.mxu0 %v11023_v14  ;;  %v10846_v24 = vld [vmem:[%s14296_s1 + $0xb48] ss:$12 sps:$4 sm:$0xff]   ;;  %v10852_v14 = vld [vmem:[%s14296_s1 + $0x1070] ss:$12 sps:$4 sm:$0xff]  }
 0x296   : > { %7273 = vmatmul.mubr.bf16.gmra.mxu1 %v11024_v17  ;;  %9452 = vmatprep.subr.bf16.mxu0 %v10830_v5  ;;  %v13421_v5 = vpop.f32.mrf.mxu1  ;;  %v10851_v17 = vld [vmem:[%s14296_s1 + $0xe30] ss:$12 sps:$4 sm:$0xff]  }
 0x297   : > { %9479 = vmatpush3.bf16.msra.mxu1 %v10829_v2  ;;  %7362 = vmatprep.mubr.bf16.mxu1 %v11025_v41  ;;  %v10847_v2 = vld [vmem:[%s14296_s1 + $0xa88] ss:$12 sps:$4 sm:$0xff]   ;;  %14314 = vst [vmem:[#allocation3_spill] sm:$0xff] %v13421_v5  ;;  %v10855_v41 = vld [vmem:[%s14296_s1 + $0xe18] ss:$12 sps:$4 sm:$0xff]  }
 0x298   : > { %9480 = vmatprep.subr.bf16.mxu1 %v10832_v6  ;;  %v13426_v6 = vpop.f32.mrf.mxu0 }
 0x299   : > { %9453 = vmatpush3.bf16.msra.mxu0 %v10831_v46  ;;  %v10849_v46 = vld [vmem:[%s14296_s1 + $0xc08] ss:$12 sps:$4 sm:$0xff]  }
 0x29a   : > { %9454 = vmatprep.subr.bf16.mxu0 %v10834_v19  ;;  %v13439_v19 = vpop.f32.mrf.mxu0 }
 0x29b   : > { %9481 = vmatpush3.bf16.msra.mxu1 %v10833_v18  ;;  %v13437_v18 = vpop.f32.mrf.mxu1  ;;  %14315 = vst [vmem:[#allocation4_spill] sm:$0xff] %v13439_v19 }
 0x29c   : > { %9482 = vmatprep.subr.bf16.mxu1 %v10836_v28  ;;  %v10854_v28 = vld [vmem:[%s14296_s1 + $0xed8] ss:$12 sps:$4 sm:$0xff]  }
 0x29d   : > { %9455 = vmatpush3.bf16.msra.mxu0 %v10835_v25  ;;  %v10853_v25 = vld [vmem:[%s14296_s1 + $0xfb0] ss:$12 sps:$4 sm:$0xff]  }
 0x29e   : > { %9456 = vmatprep.subr.bf16.mxu0 %v10838_v30  ;;  %v13453_v30 = vpop.f32.mrf.mxu1 }
 0x29f   : > { %9483 = vmatpush3.bf16.msra.mxu1 %v10837_v51  ;;  %v10856_v51 = vld [vmem:[%s14296_s1 + $0x1058] ss:$12 sps:$4 sm:$0xff]   ;;  %14316 = vst [vmem:[#allocation5_spill] sm:$0xff] %v13453_v30  ;;  %v11034_v30 = vld [vmem:[%s11272_s26 + $0x48] ss:$132 sps:$4 sm:$0xff]  }
 0x2a0   : > { %9484 = vmatprep.subr.bf16.mxu1 %v10840_v37  ;;  %v11027_v37 = vld [vmem:[%s11272_s26 + $0x144] ss:$132 sps:$4 sm:$0xff]  }
 0x2a1   : > { %9457 = vmatpush3.bf16.msra.mxu0 %v10839_v23  ;;  %v11026_v23 = vld [vmem:[%s11272_s26 + $0x38] ss:$132 sps:$4 sm:$0xff]  }
 0x2a2   : > { %9458 = vmatprep.subr.bf16.mxu0 %v10842_v63  ;;  %v13460_v63 = vpop.f32.mrf.mxu0 }
 0x2a3   : > { %9485 = vmatpush3.bf16.msra.mxu1 %v10841_v45  ;;  %v10857_v45 = vld [vmem:[%s14296_s1 + $0xf98] ss:$12 sps:$4 sm:$0xff]  }
 0x2a4   : > { %9486 = vmatprep.subr.bf16.mxu1 %v10844_v55  ;;  %v10858_v55 = vld [vmem:[%s14296_s1 + $0xec0] ss:$12 sps:$4 sm:$0xff]  }
 0x2a5   : > { %9459 = vmatpush3.bf16.msra.mxu0 %v10843_v53  ;;  %v11028_v53 = vld [vmem:[%s11272_s26 + $0x40] ss:$132 sps:$4 sm:$0xff]  }
 0x2a6   : > { %9460 = vmatprep.subr.bf16.mxu0 %v10846_v24  ;;  %v10859_v24 = vld [vmem:[%s14296_s1 + $0xe00] ss:$12 sps:$4 sm:$0xff]  }
 0x2a7   : > { %9487 = vmatpush3.bf16.msra.mxu1 %v10845_v1  ;;  %v11029_v1 = vld [vmem:[%s11272_s26 + $0x14c] ss:$132 sps:$4 sm:$0xff]  }
 0x2a8   : > { %9488 = vmatprep.subr.bf16.mxu1 %v10848_v4  ;;  %v10860_v4 = vld [vmem:[%s14296_s1 + $0x1040] ss:$12 sps:$4 sm:$0xff]  }
 0x2a9   : > { %9461 = vmatpush3.bf16.msra.mxu0 %v10847_v2  ;;  %v13473_v2 = vpop.f32.mrf.mxu1 }
 0x2aa   : > { %9502 = vmatprep.subr.bf16.mxu0 %v10850_v12 }
 0x2ab   : > { %9489 = vmatpush3.bf16.msra.mxu1 %v10849_v46  ;;  %v13475_v46 = vpop.f32.mrf.mxu0  ;;  %v13477_v12 = vpop.f32.mrf.mxu1 }
 0x2ac   : > { %7314 = vmatmul.mubr.bf16.vlgmr.msra.gmra.mxu0 %v11026_v23  ;;  %9530 = vmatprep.subr.bf16.mxu1 %v10852_v14  ;;  %14317 = vst [vmem:[#allocation6_spill] sm:$0xff] %v13475_v46  ;;  %14318 = vst [vmem:[#allocation7_spill] sm:$0xff] %v13477_v12  ;;  %v10862_v14 = vld [vmem:[%s14296_s1 + $0xea8] ss:$12 sps:$4 sm:$0xff]   ;;  %v11031_v23 = vld [vmem:[%s11272_s26 + $0x4c] ss:$132 sps:$4 sm:$0xff]  }
 0x2ad   : > { %9503 = vmatpush3.bf16.msra.mxu0 %v10851_v17  ;;  %7321 = vmatprep.mubr.bf16.mxu0 %v11027_v37  ;;  %v10861_v17 = vld [vmem:[%s14296_s1 + $0xf80] ss:$12 sps:$4 sm:$0xff]   ;;  %v13495_v37 = vpop.f32.mrf.mxu1  ;;  %v11036_v46 = vld [vmem:[%s11272_s26 + $0x50] ss:$132 sps:$4 sm:$0xff]  }
 0x2ae   : > { %7363 = vmatmul.mubr.bf16.vlgmr.msra.gmra.mxu1 %v11028_v53  ;;  %9504 = vmatprep.subr.bf16.mxu0 %v10854_v28  ;;  %v11030_v28 = vld [vmem:[%s11272_s26 + $0x140] ss:$132 sps:$4 sm:$0xff]   ;;  %v10866_v53 = vld [vmem:[%s14296_s1 + $0xe90] ss:$12 sps:$4 sm:$0xff]  }
 0x2af   : > { %9531 = vmatpush3.bf16.msra.mxu1 %v10853_v25  ;;  %7370 = vmatprep.mubr.bf16.mxu1 %v11029_v1  ;;  %v13485_v25 = vpop.f32.mrf.mxu0  ;;  %v11033_v1 = vld [vmem:[%s11272_s26 + $0x54] ss:$132 sps:$4 sm:$0xff]  }
 0x2b0   : > { %9532 = vmatprep.subr.bf16.mxu1 %v10856_v51  ;;  %v10863_v51 = vld [vmem:[%s14296_s1 + $0xde8] ss:$12 sps:$4 sm:$0xff]  }
 0x2b1   : > { %9505 = vmatpush3.bf16.msra.mxu0 %v10855_v41  ;;  %v10864_v41 = vld [vmem:[%s14296_s1 + $0x1028] ss:$12 sps:$4 sm:$0xff]  }
 0x2b2   : > { %9506 = vmatprep.subr.bf16.mxu0 %v10858_v55  ;;  %v10865_v55 = vld [vmem:[%s14296_s1 + $0xf68] ss:$12 sps:$4 sm:$0xff]  }
 0x2b3   : > { %9533 = vmatpush3.bf16.msra.mxu1 %v10857_v45  ;;  %v11032_v45 = vld [vmem:[%s11272_s26 + $0x148] ss:$132 sps:$4 sm:$0xff]  }
 0x2b4   : > { %7322 = vmatmul.mubr.bf16.gmra.mxu0 %v11030_v28  ;;  %9534 = vmatprep.subr.bf16.mxu1 %v10860_v4  ;;  %v10868_v4 = vld [vmem:[%s14296_s1 + $0x1010] ss:$12 sps:$4 sm:$0xff]   ;;  %v13513_v28 = vpop.f32.mrf.mxu1 }
 0x2b5   : > { %9507 = vmatpush3.bf16.msra.mxu0 %v10859_v24  ;;  %7411 = vmatprep.mubr.bf16.mxu0 %v11031_v23  ;;  %v13505_v24 = vpop.f32.mrf.mxu0  ;;  %14319 = vst [vmem:[#allocation8_spill] sm:$0xff] %v13513_v28 }
 0x2b6   : > { %7371 = vmatmul.mubr.bf16.gmra.mxu1 %v11032_v45  ;;  %9508 = vmatprep.subr.bf16.mxu0 %v10862_v14  ;;  %v10867_v14 = vld [vmem:[%s14296_s1 + $0xdd0] ss:$12 sps:$4 sm:$0xff]   ;;  %v10871_v45 = vld [vmem:[%s14296_s1 + $0xdb8] ss:$12 sps:$4 sm:$0xff]  }
 0x2b7   : > { %9535 = vmatpush3.bf16.msra.mxu1 %v10861_v17  ;;  %7460 = vmatprep.mubr.bf16.mxu1 %v11033_v1  ;;  %v10870_v17 = vld [vmem:[%s14296_s1 + $0xe78] ss:$12 sps:$4 sm:$0xff]   ;;  %v13521_v23 = vpop.f32.mrf.mxu0 }
 0x2b8   : > { %9536 = vmatprep.subr.bf16.mxu1 %v10864_v41  ;;  %v10869_v41 = vld [vmem:[%s14296_s1 + $0xf50] ss:$12 sps:$4 sm:$0xff]   ;;  %v10873_v1 = vld [vmem:[%s14296_s1 + $0xf38] ss:$12 sps:$4 sm:$0xff]  }
 0x2b9   : > { %9509 = vmatpush3.bf16.msra.mxu0 %v10863_v51  ;;  %v10872_v51 = vld [vmem:[%s14296_s1 + $0xff8] ss:$12 sps:$4 sm:$0xff]  }
 0x2ba   : > { %9510 = vmatprep.subr.bf16.mxu0 %v10866_v53  ;;  %v13529_v53 = vpop.f32.mrf.mxu1 }
 0x2bb   : > { %9537 = vmatpush3.bf16.msra.mxu1 %v10865_v55  ;;  %v10874_v55 = vld [vmem:[%s14296_s1 + $0xe60] ss:$12 sps:$4 sm:$0xff]  }
 0x2bc   : > { %9538 = vmatprep.subr.bf16.mxu1 %v10868_v4  ;;  %v13537_v4 = vpop.f32.mrf.mxu0  ;;  %v13545_v5 = vpop.f32.mrf.mxu1 }
 0x2bd   : > { %9511 = vmatpush3.bf16.msra.mxu0 %v10867_v14  ;;  %14320 = vst [vmem:[#allocation9_spill] sm:$0xff] %v13537_v4  ;;  %v10876_v14 = vld [vmem:[%s14296_s1 + $0xfe0] ss:$12 sps:$4 sm:$0xff]   ;;  %14321 = vst [vmem:[#allocation10_spill] sm:$0xff] %v13545_v5 }
 0x2be   : > { %9512 = vmatprep.subr.bf16.mxu0 %v10870_v17  ;;  %v10875_v17 = vld [vmem:[%s14296_s1 + $0xda0] ss:$12 sps:$4 sm:$0xff]   ;;  %v13553_v4 = vpop.f32.mrf.mxu0  ;;  %v13561_v5 = vpop.f32.mrf.mxu1 }
 0x2bf   : > { %9539 = vmatpush3.bf16.msra.mxu1 %v10869_v41  ;;  %v10878_v41 = vld [vmem:[%s14296_s1 + $0xe48] ss:$12 sps:$4 sm:$0xff]  }
 0x2c0   : > { %9540 = vmatprep.subr.bf16.mxu1 %v10872_v51  ;;  %v10877_v51 = vld [vmem:[%s14296_s1 + $0xf20] ss:$12 sps:$4 sm:$0xff]   ;;  %v13569_v26 = vpop.f32.mrf.mxu0  ;;  %v13577_v12 = vpop.f32.mrf.mxu1 }
 0x2c1   : > { %9513 = vmatpush3.bf16.msra.mxu0 %v10871_v45  ;;  %v10880_v45 = vld [vmem:[%s14296_s1 + $0xfc8] ss:$12 sps:$4 sm:$0xff]   ;;  %14322 = vst [vmem:[#allocation11_spill] sm:$0xff] %v13569_v26  ;;  %14323 = vst [vmem:[#allocation12_spill] sm:$0xff] %v13577_v12 }
 0x2c2   : > { %9514 = vmatprep.subr.bf16.mxu0 %v10874_v55  ;;  %v10879_v55 = vld [vmem:[%s14296_s1 + $0xd88] ss:$12 sps:$4 sm:$0xff]   ;;  %v13587_v26 = vpop.f32.mrf.mxu0  ;;  %v13597_v12 = vpop.f32.mrf.mxu1 }
 0x2c3   : > { %9541 = vmatpush3.bf16.msra.mxu1 %v10873_v1  ;;  %v10882_v1 = vld [vmem:[%s14296_s1 + $0x11f0] ss:$12 sps:$4 sm:$0xff]  }
 0x2c4   : > { %9542 = vmatprep.subr.bf16.mxu1 %v10876_v14  ;;  %v10881_v14 = vld [vmem:[%s14296_s1 + $0xf08] ss:$12 sps:$4 sm:$0xff]  }
 0x2c5   : > { %9515 = vmatpush3.bf16.msra.mxu0 %v10875_v17  ;;  %v10884_v17 = vld [vmem:[%s14296_s1 + $0x1370] ss:$12 sps:$4 sm:$0xff]  }
 0x2c6   : > { %9516 = vmatprep.subr.bf16.mxu0 %v10878_v41  ;;  %v10883_v41 = vld [vmem:[%s14296_s1 + $0x1130] ss:$12 sps:$4 sm:$0xff]  }
 0x2c7   : > { %9543 = vmatpush3.bf16.msra.mxu1 %v10877_v51  ;;  %v10886_v51 = vld [vmem:[%s14296_s1 + $0x11d8] ss:$12 sps:$4 sm:$0xff]  }
 0x2c8   : > { %9544 = vmatprep.subr.bf16.mxu1 %v10880_v45  ;;  %v6088_v45 = vadd.f32 %v12181_v16, %v11960_v39  ;;  %v10887_v16 = vld [vmem:[%s14296_s1 + $0x1118] ss:$12 sps:$4 sm:$0xff]  }
 0x2c9   : > { %9517 = vmatpush3.bf16.msra.mxu0 %v10879_v55  ;;  %v10885_v55 = vld [vmem:[%s14296_s1 + $0x12b0] ss:$12 sps:$4 sm:$0xff]  }
 0x2ca   : > { %9558 = vmatprep.subr.bf16.mxu0 %v10882_v1  ;;  %v10888_v1 = vld [vmem:[%s14296_s1 + $0x1358] ss:$12 sps:$4 sm:$0xff]  }
 0x2cb   : > { %9545 = vmatpush3.bf16.msra.mxu1 %v10881_v14  ;;  %v11035_v14 = vld [vmem:[%s11272_s26 + $0x154] ss:$132 sps:$4 sm:$0xff]  }
 0x2cc   : > { %7412 = vmatmul.mubr.bf16.vlgmr.msra.gmra.mxu0 %v11034_v30  ;;  %9586 = vmatprep.subr.bf16.mxu1 %v10884_v17  ;;  %v13599_v28 = vpop.f32.mrf.mxu0  ;;  %v10890_v30 = vld [vmem:[%s14296_s1 + $0x11c0] ss:$12 sps:$4 sm:$0xff]   ;;  %v6141_v17 = vadd.f32 %v12190_v20, %v6088_v45 }
 0x2cd   : > { %9559 = vmatpush3.bf16.msra.mxu0 %v10883_v41  ;;  %7419 = vmatprep.mubr.bf16.mxu0 %v11035_v14  ;;  %14324 = vst [vmem:[#allocation13_spill] sm:$0xff] %v13599_v28  ;;  %v10889_v41 = vld [vmem:[%s14296_s1 + $0x1298] ss:$12 sps:$4 sm:$0xff]   ;;  %v11037_v14 = vld [vmem:[%s11272_s26 + $0x15c] ss:$132 sps:$4 sm:$0xff]  }
 0x2ce   : > { %7461 = vmatmul.mubr.bf16.vlgmr.msra.gmra.mxu1 %v11036_v46  ;;  %9560 = vmatprep.subr.bf16.mxu0 %v10886_v51  ;;  %v13610_v19 = vpop.f32.mrf.mxu1  ;;  %v10892_v46 = vld [vmem:[%s14296_s1 + $0x1340] ss:$12 sps:$4 sm:$0xff]   ;;  %v6194_v51 = vadd.f32 %v12407_v34, %v6141_v17  ;;  %v13619_v45 = vpop.f32.mrf.mxu0  ;;  %v10896_v17 = vld [vmem:[%s14296_s1 + $0x1328] ss:$12 sps:$4 sm:$0xff]   ;;  %v11040_v28 = vld [vmem:[%s11272_s26 + $0x158] ss:$132 sps:$4 sm:$0xff]  }
 0x2cf   : > { %9587 = vmatpush3.bf16.msra.mxu1 %v10885_v55  ;;  %7468 = vmatprep.mubr.bf16.mxu1 %v11037_v14  ;;  %14325 = vst [vmem:[#allocation14_spill] sm:$0xff] %v13610_v19  ;;  %v10891_v20 = vld [vmem:[%s14296_s1 + $0x1100] ss:$12 sps:$4 sm:$0xff]   ;;  %v10894_v55 = vld [vmem:[%s14296_s1 + $0x11a8] ss:$12 sps:$4 sm:$0xff]  }
 0x2d0   : > { %9588 = vmatprep.subr.bf16.mxu1 %v10888_v1  ;;  %v10893_v1 = vld [vmem:[%s14296_s1 + $0x1280] ss:$12 sps:$4 sm:$0xff]   ;;  %v13627_v34 = vpop.f32.mrf.mxu1  ;;  %v13638_v19 = vpop.f32.mrf.mxu0 }
 0x2d1   : > { %9561 = vmatpush3.bf16.msra.mxu0 %v10887_v16  ;;  %v11038_v16 = vld [vmem:[%s11272_s26 + $0x150] ss:$132 sps:$4 sm:$0xff]   ;;  %v11039_v14 = vld [vmem:[%s11272_s26 + $0x5c] ss:$132 sps:$4 sm:$0xff]  }
 0x2d2   : > { %9562 = vmatprep.subr.bf16.mxu0 %v10890_v30  ;;  %v6247_v30 = vadd.f32 %v12416_v8, %v6194_v51  ;;  %v10897_v8 = vld [vmem:[%s14296_s1 + $0x1268] ss:$12 sps:$4 sm:$0xff]  }
 0x2d3   : > { %9589 = vmatpush3.bf16.msra.mxu1 %v10889_v41  ;;  %v10895_v41 = vld [vmem:[%s14296_s1 + $0x10e8] ss:$12 sps:$4 sm:$0xff]  }
 0x2d4   : > { %7420 = vmatmul.mubr.bf16.gmra.mxu0 %v11038_v16  ;;  %9590 = vmatprep.subr.bf16.mxu1 %v10892_v46  ;;  %v10898_v46 = vld [vmem:[%s14296_s1 + $0x1190] ss:$12 sps:$4 sm:$0xff]   ;;  %v6300_v16 = vadd.f32 %v12636_v3, %v6247_v30  ;;  %v11041_v51 = vld [vmem:[%s11272_s26 + $0x64] ss:$132 sps:$4 sm:$0xff]   ;;  %v13657_v3 = vpop.f32.mrf.mxu0 }
 0x2d5   : > { %9563 = vmatpush3.bf16.msra.mxu0 %v10891_v20  ;;  %7509 = vmatprep.mubr.bf16.mxu0 %v11039_v14  ;;  %v13649_v20 = vpop.f32.mrf.mxu1 }
 0x2d6   : > { %7469 = vmatmul.mubr.bf16.gmra.mxu1 %v11040_v28  ;;  %9564 = vmatprep.subr.bf16.mxu0 %v10894_v55  ;;  %v10900_v28 = vld [vmem:[%s14296_s1 + $0x1310] ss:$12 sps:$4 sm:$0xff]   ;;  %v6353_v30 = vadd.f32 %v12645_v9, %v6300_v16  ;;  %v13675_v9 = vpop.f32.mrf.mxu0  ;;  %v10906_v16 = vld [vmem:[%s14296_s1 + $0x1160] ss:$12 sps:$4 sm:$0xff]  }
 0x2d7   : > { %9591 = vmatpush3.bf16.msra.mxu1 %v10893_v1  ;;  %7558 = vmatprep.mubr.bf16.mxu1 %v11041_v51  ;;  %v10899_v55 = vld [vmem:[%s14296_s1 + $0x10d0] ss:$12 sps:$4 sm:$0xff]   ;;  %v10902_v1 = vld [vmem:[%s14296_s1 + $0x1178] ss:$12 sps:$4 sm:$0xff]   ;;  %v13666_v14 = vpop.f32.mrf.mxu1  ;;  %14326 = vst [vmem:[#allocation15_spill] sm:$0xff] %v13675_v9 }
 0x2d8   : > { %9592 = vmatprep.subr.bf16.mxu1 %v10896_v17  ;;  %v10901_v17 = vld [vmem:[%s14296_s1 + $0x1250] ss:$12 sps:$4 sm:$0xff]   ;;  %v10903_v51 = vld [vmem:[%s14296_s1 + $0x10b8] ss:$12 sps:$4 sm:$0xff]   ;;  %v10922_v9 = vld [vmem:[%s14296_s1 + $0x14c0] ss:$12 sps:$4 sm:$0xff]  }
 0x2d9   : > { %9565 = vmatpush3.bf16.msra.mxu0 %v10895_v41  ;;  %v10904_v41 = vld [vmem:[%s14296_s1 + $0x12f8] ss:$12 sps:$4 sm:$0xff]  }
 0x2da   : > { %9566 = vmatprep.subr.bf16.mxu0 %v10898_v46  ;;  %v6406_v46 = vadd.f32 %v12864_v15, %v6353_v30  ;;  %v10908_v15 = vld [vmem:[%s14296_s1 + $0x12e0] ss:$12 sps:$4 sm:$0xff]   ;;  %v13692_v30 = vpop.f32.mrf.mxu0 }
 0x2db   : > { %9593 = vmatpush3.bf16.msra.mxu1 %v10897_v8  ;;  %v10905_v8 = vld [vmem:[%s14296_s1 + $0x1238] ss:$12 sps:$4 sm:$0xff]  }
 0x2dc   : > { %9594 = vmatprep.subr.bf16.mxu1 %v10900_v28  ;;  %v13683_v28 = vpop.f32.mrf.mxu1 }
 0x2dd   : > { %9567 = vmatpush3.bf16.msra.mxu0 %v10899_v55  ;;  %14327 = vst [vmem:[#allocation16_spill] sm:$0xff] %v13683_v28  ;;  %v6459_v55 = vadd.f32 %v12873_v21, %v6406_v46  ;;  %v10909_v28 = vld [vmem:[%s14296_s1 + $0x1220] ss:$12 sps:$4 sm:$0xff]   ;;  %v10912_v46 = vld [vmem:[%s14296_s1 + $0x12c8] ss:$12 sps:$4 sm:$0xff]  }
 0x2de   : > { %9568 = vmatprep.subr.bf16.mxu0 %v10902_v1  ;;  %v10907_v1 = vld [vmem:[%s14296_s1 + $0x10a0] ss:$12 sps:$4 sm:$0xff]   ;;  %v13701_v21 = vpop.f32.mrf.mxu1 }
 0x2df   : > { %9595 = vmatpush3.bf16.msra.mxu1 %v10901_v17  ;;  %v10910_v17 = vld [vmem:[%s14296_s1 + $0x1148] ss:$12 sps:$4 sm:$0xff]  }
 0x2e0   : > { %9596 = vmatprep.subr.bf16.mxu1 %v10904_v41  ;;  %v6512_v41 = vadd.f32 %v13093_v38, %v6459_v55  ;;  %v10911_v38 = vld [vmem:[%s14296_s1 + $0x1088] ss:$12 sps:$4 sm:$0xff]  }
 0x2e1   : > { %9569 = vmatpush3.bf16.msra.mxu0 %v10903_v51  ;;  %v6561_v51 = vadd.f32 %v13318_v36, %v12928_v61  ;;  %v10913_v61 = vld [vmem:[%s14296_s1 + $0x1208] ss:$12 sps:$4 sm:$0xff]   ;;  %v13721_v36 = vpop.f32.mrf.mxu1 }
 0x2e2   : > { %9570 = vmatprep.subr.bf16.mxu0 %v10906_v16  ;;  %v13711_v16 = vpop.f32.mrf.mxu0  ;;  %14328 = vst [vmem:[#allocation17_spill] sm:$0xff] %v13721_v36 }
 0x2e3   : > { %9597 = vmatpush3.bf16.msra.mxu1 %v10905_v8  ;;  %v10914_v8 = vld [vmem:[%s14296_s1 + $0x14f0] ss:$12 sps:$4 sm:$0xff]   ;;  %v6614_v55 = vadd.f32 %v13426_v6, %v6561_v51 }
 0x2e4   : > { %9598 = vmatprep.subr.bf16.mxu1 %v10908_v15  ;;  %v6565_v15 = vadd.f32 %v13347_v62, %v6512_v41  ;;  %v10915_v62 = vld [vmem:[%s14296_s1 + $0x1430] ss:$12 sps:$4 sm:$0xff]   ;;  %v6829_v6 = vpop.f32.mrf.mxu0 }
 0x2e5   : > { %9571 = vmatpush3.bf16.msra.mxu0 %v10907_v1  ;;  %v10916_v1 = vld [vmem:[%s14296_s1 + $0x1670] ss:$12 sps:$4 sm:$0xff]   ;;  %v6667_v41 = vadd.f32 %v13437_v18, %v6614_v55  ;;  %v10919_v55 = vld [vmem:[%s14296_s1 + $0x1418] ss:$12 sps:$4 sm:$0xff]  }
 0x2e6   : > { %9572 = vmatprep.subr.bf16.mxu0 %v10910_v17  ;;  %v6618_v17 = vadd.f32 %v13460_v63, %v6565_v15  ;;  %v10917_v63 = vld [vmem:[%s14296_s1 + $0x15b0] ss:$12 sps:$4 sm:$0xff]  }
 0x2e7   : > { %9599 = vmatpush3.bf16.msra.mxu1 %v10909_v28  ;;  %v10918_v28 = vld [vmem:[%s14296_s1 + $0x14d8] ss:$12 sps:$4 sm:$0xff]   ;;  %v6720_v15 = vadd.f32 %v13553_v4, %v6667_v41 }
 0x2e8   : > { %9600 = vmatprep.subr.bf16.mxu1 %v10912_v46  ;;  %v13737_v46 = vpop.f32.mrf.mxu1  ;;  %v6671_v18 = vadd.f32 %v13473_v2, %v6618_v17  ;;  %v10921_v4 = vld [vmem:[%s14296_s1 + $0x1598] ss:$12 sps:$4 sm:$0xff]   ;;  %v11045_v17 = vld [vmem:[%s11272_s26 + $0x16c] ss:$132 sps:$4 sm:$0xff]  }
 0x2e9   : > { %9573 = vmatpush3.bf16.msra.mxu0 %v10911_v38  ;;  %v11042_v38 = vld [vmem:[%s11272_s26 + $0x58] ss:$132 sps:$4 sm:$0xff]  }
 0x2ea   : > { %9614 = vmatprep.subr.bf16.mxu0 %v10914_v8  ;;  %v10920_v8 = vld [vmem:[%s14296_s1 + $0x1658] ss:$12 sps:$4 sm:$0xff]   ;;  %v6724_v2 = vadd.f32 %v13587_v26, %v6671_v18 }
 0x2eb   : > { %9601 = vmatpush3.bf16.msra.mxu1 %v10913_v61  ;;  %v11043_v61 = vld [vmem:[%s11272_s26 + $0x164] ss:$132 sps:$4 sm:$0xff]  }
 0x2ec   : > { %v13739_v51 = vpop.f32.mrf.mxu0  ;;  %7510 = vmatmul.mubr.bf16.vlgmr.msra.gmra.mxu0 %v11042_v38  ;;  %9642 = vmatprep.subr.bf16.mxu1 %v10916_v1  ;;  %v11044_v38 = vld [vmem:[%s11272_s26 + $0x60] ss:$132 sps:$4 sm:$0xff]  }
 0x2ed   : > { %14329 = vst [vmem:[#allocation18_spill] sm:$0xff] %v13739_v51  ;;  %9615 = vmatpush3.bf16.msra.mxu0 %v10915_v62  ;;  %7517 = vmatprep.mubr.bf16.mxu0 %v11043_v61  ;;  %v6773_v61 = vadd.f32 %v13561_v5, %v6720_v15  ;;  %v10925_v15 = vld [vmem:[%s14296_s1 + $0x1580] ss:$12 sps:$4 sm:$0xff]  }
 0x2ee   : > { %v13751_v36 = vpop.f32.mrf.mxu0  ;;  %7559 = vmatmul.mubr.bf16.vlgmr.msra.gmra.mxu1 %v11044_v38  ;;  %9616 = vmatprep.subr.bf16.mxu0 %v10918_v28  ;;  %v9266_v1 = vpop.f32.mrf.mxu1  ;;  %v10924_v28 = vld [vmem:[%s14296_s1 + $0x1640] ss:$12 sps:$4 sm:$0xff]  }
 0x2ef   : > { %9643 = vmatpush3.bf16.msra.mxu1 %v10917_v63  ;;  %7566 = vmatprep.mubr.bf16.mxu1 %v11045_v17  ;;  %v10923_v63 = vld [vmem:[%s14296_s1 + $0x1400] ss:$12 sps:$4 sm:$0xff]   ;;  %v6777_v17 = vadd.f32 %v13597_v12, %v6724_v2  ;;  %v6826_v5 = vadd.f32 %v13692_v30, %v6773_v61  ;;  %v10927_v2 = vld [vmem:[%s14296_s1 + $0x13e8] ss:$12 sps:$4 sm:$0xff]  }
 0x2f0   : > { %v13762_v62 = vpop.f32.mrf.mxu0  ;;  %9644 = vmatprep.subr.bf16.mxu1 %v10920_v8  ;;  %v9267_v41 = vpop.f32.mrf.mxu1  ;;  %v10926_v8 = vld [vmem:[%s14296_s1 + $0x14a8] ss:$12 sps:$4 sm:$0xff]  }
 0x2f1   : > { %9617 = vmatpush3.bf16.msra.mxu0 %v10919_v55  ;;  %v13768_v26 = vadd.f32 %v9267_v41, %v9266_v1  ;;  %v11046_v1 = vld [vmem:[%s11272_s26 + $0x160] ss:$132 sps:$4 sm:$0xff]   ;;  %v10928_v41 = vld [vmem:[%s14296_s1 + $0x1628] ss:$12 sps:$4 sm:$0xff]   ;;  %v6830_v12 = vadd.f32 %v6829_v6, %v6777_v17  ;;  %v6879_v6 = vadd.f32 %v13701_v21, %v6826_v5  ;;  %v10931_v21 = vld [vmem:[%s14296_s1 + $0x13d0] ss:$12 sps:$4 sm:$0xff]  }
 0x2f2   : > { %v13773_v18 = vpop.f32.mrf.mxu0  ;;  %9618 = vmatprep.subr.bf16.mxu0 %v10922_v9  ;;  %v9269_v38 = vpop.f32.mrf.mxu1 }
 0x2f3   : > { %9645 = vmatpush3.bf16.msra.mxu1 %v10921_v4  ;;  %v11047_v4 = vld [vmem:[%s11272_s26 + $0x6c] ss:$132 sps:$4 sm:$0xff]  }
 0x2f4   : > { %v13783_v55 = vpop.f32.mrf.mxu0  ;;  %7518 = vmatmul.mubr.bf16.gmra.mxu0 %v11046_v1  ;;  %9646 = vmatprep.subr.bf16.mxu1 %v10924_v28  ;;  %v9270_v9 = vpop.f32.mrf.mxu1  ;;  %v10930_v28 = vld [vmem:[%s14296_s1 + $0x1490] ss:$12 sps:$4 sm:$0xff]  }
 0x2f5   : > { %14330 = vst [vmem:[#allocation19_spill] sm:$0xff] %v13783_v55  ;;  %9619 = vmatpush3.bf16.msra.mxu0 %v10923_v63  ;;  %v13789_v30 = vadd.f32 %v9270_v9, %v9269_v38  ;;  %7607 = vmatprep.mubr.bf16.mxu0 %v11047_v4  ;;  %v11048_v55 = vld [vmem:[%s11272_s26 + $0x168] ss:$132 sps:$4 sm:$0xff]   ;;  %v11049_v38 = vld [vmem:[%s11272_s26 + $0x74] ss:$132 sps:$4 sm:$0xff]   ;;  %v6883_v9 = vadd.f32 %v13737_v46, %v6830_v12 }
 0x2f6   : > { %v6931_v61 = vpop.f32.mrf.mxu0  ;;  %7567 = vmatmul.mubr.bf16.gmra.mxu1 %v11048_v55  ;;  %9620 = vmatprep.subr.bf16.mxu0 %v10926_v8  ;;  %v9272_v1 = vpop.f32.mrf.mxu1  ;;  %v10929_v63 = vld [vmem:[%s14296_s1 + $0x1568] ss:$12 sps:$4 sm:$0xff]   ;;  %v10932_v8 = vld [vmem:[%s14296_s1 + $0x1610] ss:$12 sps:$4 sm:$0xff]   ;;  %v10936_v12 = vld [vmem:[%s14296_s1 + $0x15f8] ss:$12 sps:$4 sm:$0xff]  }
 0x2f7   : > { %9647 = vmatpush3.bf16.msra.mxu1 %v10925_v15  ;;  %7656 = vmatprep.mubr.bf16.mxu1 %v11049_v38  ;;  %v6932_v4 = vadd.f32 %v6931_v61, %v6879_v6  ;;  %v6078_v15 = vadd.f32 %v12027_v10, %v11960_v39  ;;  %v10933_v46 = vld [vmem:[%s14296_s1 + $0x1550] ss:$12 sps:$4 sm:$0xff]   ;;  %v10935_v61 = vld [vmem:[%s14296_s1 + $0x13b8] ss:$12 sps:$4 sm:$0xff]   ;;  %v10938_v6 = vld [vmem:[%s14296_s1 + $0x1460] ss:$12 sps:$4 sm:$0xff]  }
 0x2f8   : > { %v13804_v17 = vpop.f32.mrf.mxu0  ;;  %9648 = vmatprep.subr.bf16.mxu1 %v10928_v41  ;;  %v9273_v55 = vpop.f32.mrf.mxu1  ;;  %v10934_v41 = vld [vmem:[%s14296_s1 + $0x1478] ss:$12 sps:$4 sm:$0xff]  }
 0x2f9   : > { %14331 = vst [vmem:[#allocation20_spill] sm:$0xff] %v13804_v17  ;;  %9621 = vmatpush3.bf16.msra.mxu0 %v10927_v2  ;;  %v13813_v5 = vadd.f32 %v9273_v55, %v9272_v1  ;;  %v7778_v39 = vmax.f32 %v6932_v4, 0.0  ;;  %v6131_v1 = vadd.f32 %v12035_v13, %v6078_v15  ;;  %v10939_v13 = vld [vmem:[%s14296_s1 + $0x13a0] ss:$12 sps:$4 sm:$0xff]   ;;  %v10942_v55 = vld [vmem:[%s14296_s1 + $0x1448] ss:$12 sps:$4 sm:$0xff]  }
 0x2fa   : > { %v6935_v38 = vpop.f32.mrf.mxu0  ;;  %9622 = vmatprep.subr.bf16.mxu0 %v10930_v28  ;;  %v9275_v17 = vpop.f32.mrf.mxu1  ;;  %v10944_v4 = vld [vmem:[%s14296_s1 + $0x15c8] ss:$12 sps:$4 sm:$0xff]  }
 0x2fb   : > { %v6936_v51 = vadd.f32 %v6935_v38, %v6883_v9  ;;  %9649 = vmatpush3.bf16.msra.mxu1 %v10929_v63  ;;  %v10946_v38 = vld [vmem:[%s14296_s1 + $0x17f0] ss:$12 sps:$4 sm:$0xff]  }
 0x2fc   : > { %9650 = vmatprep.subr.bf16.mxu1 %v10932_v8  ;;  %v9276_v2 = vpop.f32.mrf.mxu1  ;;  %v6184_v8 = vadd.f32 %v12220_v43, %v6131_v1  ;;  %v10941_v43 = vld [vmem:[%s14296_s1 + $0x1520] ss:$12 sps:$4 sm:$0xff]  }
 0x2fd   : > { %v7781_v10 = vmax.f32 %v6936_v51, 0.0  ;;  %9623 = vmatpush3.bf16.msra.mxu0 %v10931_v21  ;;  %v13829_v28 = vadd.f32 %v9276_v2, %v9275_v17  ;;  %v10937_v51 = vld [vmem:[%s14296_s1 + $0x1538] ss:$12 sps:$4 sm:$0xff]   ;;  %v10940_v17 = vld [vmem:[%s14296_s1 + $0x15e0] ss:$12 sps:$4 sm:$0xff]  }
 0x2fe   : > { %9624 = vmatprep.subr.bf16.mxu0 %v10934_v41  ;;  %v6237_v9 = vadd.f32 %v12231_v49, %v6184_v8  ;;  %v10943_v21 = vld [vmem:[%s14296_s1 + $0x1388] ss:$12 sps:$4 sm:$0xff]   ;;  %v1476_v49 = vsub.s32 2, %v11921_v22  ;;  %v10948_v22 = vld [vmem:[%s14296_s1 + $0x17d8] ss:$12 sps:$4 sm:$0xff]  }
 0x2ff   : > { %v13835_v63 = vpack.c.bf16 %v7781_v10, %v7778_v39  ;;  %9651 = vmatpush3.bf16.msra.mxu1 %v10933_v46  ;;  %v10945_v41 = vld [vmem:[%s14296_s1 + $0x1508] ss:$12 sps:$4 sm:$0xff]   ;;  %v10949_v46 = vld [vmem:[%s14296_s1 + $0x18b0] ss:$12 sps:$4 sm:$0xff]   ;;  %v11050_v2 = vld [vmem:[%s14297_s2] sm:$0x7] }
 0x300   : > { %9652 = vmatprep.subr.bf16.mxu1 %v10936_v12  ;;  %v6290_v15 = vadd.f32 %v12445_v32, %v6237_v9  ;;  %v10947_v32 = vld [vmem:[%s14296_s1 + $0x1730] ss:$12 sps:$4 sm:$0xff]   ;;  %v13881_v39 = vrot.slane %v11050_v2, %v1476_v49  ;;  %v11051_v1 = vld [vmem:[%s11272_s26 + $0x68] ss:$132 sps:$4 sm:$0xff]  }
 0x301   : > { %9625 = vmatpush3.bf16.msra.mxu0 %v10935_v61  ;;  %v11054_v9 = vld [vmem:[%s11272_s26 + $0x17c] ss:$132 sps:$4 sm:$0xff]  }
 0x302   : > { %9626 = vmatprep.subr.bf16.mxu0 %v10938_v6  ;;  %v6343_v12 = vadd.f32 %v12457_v59, %v6290_v15  ;;  %v10952_v59 = vld [vmem:[%s14296_s1 + $0x1898] ss:$12 sps:$4 sm:$0xff]   ;;  %v6976_v2 = vadd.f32 %v13789_v30, %v13881_v39  ;;  %v10956_v30 = vld [vmem:[%s14296_s1 + $0x16e8] ss:$12 sps:$4 sm:$0xff]  }
 0x303   : > { %9653 = vmatpush3.bf16.msra.mxu1 %v10937_v51  ;;  %v10950_v6 = vld [vmem:[%s14296_s1 + $0x1718] ss:$12 sps:$4 sm:$0xff]  }
 0x304   : > { %9654 = vmatprep.subr.bf16.mxu1 %v10940_v17  ;;  %v6396_v10 = vadd.f32 %v12677_v35, %v6343_v12  ;;  %v11052_v51 = vld [vmem:[%s11272_s26 + $0x174] ss:$132 sps:$4 sm:$0xff]   ;;  %v10951_v35 = vld [vmem:[%s14296_s1 + $0x17c0] ss:$12 sps:$4 sm:$0xff]  }
 0x305   : > { %9627 = vmatpush3.bf16.msra.mxu0 %v10939_v13  ;;  %v11053_v13 = vld [vmem:[%s11272_s26 + $0x70] ss:$132 sps:$4 sm:$0xff]  }
 0x306   : > { %9628 = vmatprep.subr.bf16.mxu0 %v10942_v55  ;;  %v6973_v55 = vadd.f32 %v13768_v26, %v13881_v39  ;;  %v10953_v26 = vld [vmem:[%s14296_s1 + $0x1700] ss:$12 sps:$4 sm:$0xff]  }
 0x307   : > { %9655 = vmatpush3.bf16.msra.mxu1 %v10941_v43 }
 0x308   : > { %9656 = vmatprep.subr.bf16.mxu1 %v10944_v4  ;;  %v6449_v4 = vadd.f32 %v12688_v44, %v6396_v10  ;;  %v10954_v44 = vld [vmem:[%s14296_s1 + $0x17a8] ss:$12 sps:$4 sm:$0xff]  }
 0x309   : > { %9629 = vmatpush3.bf16.msra.mxu0 %v10943_v21 }
 0x30a   : > { %9670 = vmatprep.subr.bf16.mxu0 %v10946_v38  ;;  %v10955_v38 = vld [vmem:[%s14296_s1 + $0x1880] ss:$12 sps:$4 sm:$0xff]  }
 0x30b   : > { %9657 = vmatpush3.bf16.msra.mxu1 %v10945_v41 }
 0x30c   : > { %v9294_v61 = vpop.f32.mrf.mxu0  ;;  %7608 = vmatmul.mubr.bf16.vlgmr.msra.gmra.mxu0 %v11051_v1  ;;  %9752 = vmatprep.subr.bf16.mxu1 %v10949_v46 }
 0x30d   : > { %9671 = vmatpush3.bf16.msra.mxu0 %v10947_v32  ;;  %7615 = vmatprep.mubr.bf16.mxu0 %v11052_v51  ;;  %v10958_v51 = vld [vmem:[%s14296_s1 + $0x1868] ss:$12 sps:$4 sm:$0xff]  }
 0x30e   : > { %v9295_v8 = vpop.f32.mrf.mxu0  ;;  %v9322_v17 = vpop.f32.mrf.mxu1  ;;  %7657 = vmatmul.mubr.bf16.vlgmr.msra.gmra.mxu1 %v11053_v13  ;;  %9672 = vmatprep.subr.bf16.mxu0 %v10948_v22  ;;  %v6445_v22 = vadd.f32 %v12666_v27, %v12659_v33 }
 0x30f   : > { %v9296_v43 = vadd.f32 %v9295_v8, %v9294_v61  ;;  %9753 = vmatpush3.bf16.msra.mxu1 %v10949_v46  ;;  %7664 = vmatprep.mubr.bf16.mxu1 %v11054_v9  ;;  %v6502_v46 = vadd.f32 %v12908_v50, %v6449_v4 }
 0x310   : > { %v9297_v21 = vpop.f32.mrf.mxu0  ;;  %v9323_v15 = vpop.f32.mrf.mxu1  ;;  %9754 = vmatprep.subr.bf16.mxu1 %v10952_v59  ;;  %v6498_v33 = vadd.f32 %v12882_v29, %v6445_v22  ;;  %v10957_v29 = vld [vmem:[%s14296_s1 + $0x1790] ss:$12 sps:$4 sm:$0xff]  }
 0x311   : > { %v7022_v49 = vadd.f32 %v9296_v43, %v6973_v55  ;;  %v9324_v41 = vadd.f32 %v9323_v15, %v9322_v17  ;;  %9673 = vmatpush3.bf16.msra.mxu0 %v10950_v6  ;;  %v11055_v6 = vld [vmem:[%s11272_s26 + $0x170] ss:$132 sps:$4 sm:$0xff]   ;;  %v6555_v17 = vadd.f32 %v12915_v52, %v6502_v46  ;;  %v11057_v55 = vld [vmem:[%s11272_s26 + $0x178] ss:$132 sps:$4 sm:$0xff]   ;;  %v6981_v43 = vadd.f32 %v13813_v5, %v13881_v39 }
 0x312   : > { %v9298_v32 = vpop.f32.mrf.mxu0  ;;  %v9325_v12 = vpop.f32.mrf.mxu1  ;;  %9674 = vmatprep.subr.bf16.mxu0 %v10951_v35  ;;  %v10959_v5 = vld [vmem:[%s14296_s1 + $0x16d0] ss:$12 sps:$4 sm:$0xff]  }
 0x313   : > { %v13914_v10 = vadd.f32 %v9324_v41, %v7022_v49  ;;  %v9299_v61 = vadd.f32 %v9298_v32, %v9297_v21  ;;  %9755 = vmatpush3.bf16.msra.mxu1 %v10952_v59  ;;  %v11056_v59 = vld [vmem:[%s11272_s26 + $0x7c] ss:$132 sps:$4 sm:$0xff]   ;;  %v6551_v41 = vadd.f32 %v12893_v40, %v6498_v33  ;;  %v6984_v40 = vadd.f32 %v13829_v28, %v13881_v39 }
 0x314   : > { %v9300_v1 = vpop.f32.mrf.mxu0  ;;  %v9326_v50 = vpop.f32.mrf.mxu1  ;;  %7616 = vmatmul.mubr.bf16.gmra.mxu0 %v11055_v6  ;;  %9756 = vmatprep.subr.bf16.mxu1 %v10955_v38  ;;  %v11058_v21 = vld [vmem:[%s11272_s26 + $0x80] ss:$132 sps:$4 sm:$0xff]   ;;  %v10961_v49 = vld [vmem:[%s14296_s1 + $0x1850] ss:$12 sps:$4 sm:$0xff]  }
 0x315   : > { %v7025_v27 = vadd.f32 %v9299_v61, %v6976_v2  ;;  %v9327_v8 = vadd.f32 %v9326_v50, %v9325_v12  ;;  %9675 = vmatpush3.bf16.msra.mxu0 %v10953_v26  ;;  %7705 = vmatprep.mubr.bf16.mxu0 %v11056_v59  ;;  %v6608_v26 = vadd.f32 %v13130_v0, %v6555_v17  ;;  %v10963_v28 = vld [vmem:[%s14296_s1 + $0x1760] ss:$12 sps:$4 sm:$0xff]   ;;  %v10969_v59 = vld [vmem:[%s14296_s1 + $0x1808] ss:$12 sps:$4 sm:$0xff]  }
 0x316   : > { %v9301_v13 = vpop.f32.mrf.mxu0  ;;  %v9328_v35 = vpop.f32.mrf.mxu1  ;;  %7665 = vmatmul.mubr.bf16.gmra.mxu1 %v11057_v55  ;;  %9676 = vmatprep.subr.bf16.mxu0 %v10954_v44  ;;  %v10960_v44 = vld [vmem:[%s14296_s1 + $0x1778] ss:$12 sps:$4 sm:$0xff]   ;;  %v6604_v22 = vadd.f32 %v13112_v54, %v6551_v41  ;;  %v10972_v55 = vld [vmem:[%s14298_s3 + $0x70] sm:$0xff]   ;;  %v11061_v41 = vld [vmem:[%s11272_s26 + $0x188] ss:$132 sps:$4 sm:$0xff]  }
 0x317   : > { %v13932_v9 = vadd.f32 %v9327_v8, %v7025_v27  ;;  %v9302_v4 = vadd.f32 %v9301_v13, %v9300_v1  ;;  %9757 = vmatpush3.bf16.msra.mxu1 %v10955_v38  ;;  %9768 = vmatprep.mubr.bf16.mxu1 %v11058_v21  ;;  %v10964_v1 = vld [vmem:[%s14296_s1 + $0x1838] ss:$12 sps:$4 sm:$0xff]   ;;  %v6661_v50 = vadd.f32 %v13407_v56, %v6608_v26  ;;  %v10967_v56 = vld [vmem:[%s14296_s1 + $0x1820] ss:$12 sps:$4 sm:$0xff]   ;;  %v10968_v13 = vld [vmem:[%s14296_s1 + $0x1688] ss:$12 sps:$4 sm:$0xff]  }
 0x318   : > { %v9303_v15 = vpop.f32.mrf.mxu0  ;;  %v9329_v52 = vpop.f32.mrf.mxu1  ;;  %9758 = vmatprep.subr.bf16.mxu1 %v10958_v51  ;;  %v10962_v54 = vld [vmem:[%s14296_s1 + $0x16b8] ss:$12 sps:$4 sm:$0xff]   ;;  %v6657_v39 = vadd.f32 %v13379_v31, %v6604_v22  ;;  %v10966_v31 = vld [vmem:[%s14296_s1 + $0x1748] ss:$12 sps:$4 sm:$0xff]  }
 0x319   : > { %v7030_v46 = vadd.f32 %v9302_v4, %v6981_v43  ;;  %v9330_v32 = vadd.f32 %v9329_v52, %v9328_v35  ;;  %9677 = vmatpush3.bf16.msra.mxu0 %v10956_v30  ;;  %v10965_v30 = vld [vmem:[%s14296_s1 + $0x16a0] ss:$12 sps:$4 sm:$0xff]   ;;  %v11059_v4 = vld [vmem:[%s11272_s26 + $0x78] ss:$132 sps:$4 sm:$0xff]   ;;  %v10973_v21 = vld [vmem:[%s14298_s3 + $0x30] sm:$0xff]   ;;  %v6553_v52 = vadd.f32 %v12910_v58, %v12900_v47 }
 0x31a   : > { %v9304_v38 = vpop.f32.mrf.mxu0  ;;  %v9331_v12 = vpop.f32.mrf.mxu1  ;;  %9678 = vmatprep.subr.bf16.mxu0 %v10957_v29  ;;  %v6710_v8 = vadd.f32 %v13485_v25, %v6657_v39  ;;  %v10975_v58 = vld [vmem:[%s14298_s3 + $0x28] sm:$0xff]   ;;  %v6563_v39 = vadd.f32 %v13331_v48, %v12940_v7 }
 0x31b   : > { %v13949_v0 = vadd.f32 %v9330_v32, %v7030_v46  ;;  %v9305_v2 = vadd.f32 %v9304_v38, %v9303_v15  ;;  %9759 = vmatpush3.bf16.msra.mxu1 %v10958_v51  ;;  %v6714_v51 = vadd.f32 %v13521_v23, %v6661_v50  ;;  %v11060_v15 = vld [vmem:[%s11272_s26 + $0x184] ss:$132 sps:$4 sm:$0xff]   ;;  %v6606_v46 = vadd.f32 %v13122_v60, %v6553_v52 }
 0x31c   : > { %v9332_v61 = vpop.f32.mrf.mxu1  ;;  %9760 = vmatprep.subr.bf16.mxu1 %v10961_v49  ;;  %v6763_v25 = vadd.f32 %v13495_v37, %v6710_v8 }
 0x31d   : > { %v7033_v6 = vadd.f32 %v9305_v2, %v6984_v40  ;;  %v9333_v33 = vadd.f32 %v9332_v61, %v9331_v12  ;;  %9679 = vmatpush3.bf16.msra.mxu0 %v10959_v5  ;;  %v6767_v23 = vadd.f32 %v13529_v53, %v6714_v51  ;;  %v10970_v53 = vld [vmem:[%s14298_s3 + $0x78] sm:$0xff]   ;;  %v10976_v40 = vld [vmem:[%s14298_s3 + $0x60] sm:$0xff]   ;;  %v6655_v51 = vadd.f32 %v13361_v11, %v13106_v57 }
 0x31e   : > { %9680 = vmatprep.subr.bf16.mxu0 %v10960_v44  ;;  %v6816_v35 = vadd.f32 %v13619_v45, %v6763_v25  ;;  %v14333_v25 = vld [vmem:[#allocation6_spill] sm:$0xff] }
 0x31f   : > { %v13963_v27 = vadd.f32 %v9333_v33, %v7033_v6  ;;  %9761 = vmatpush3.bf16.msra.mxu1 %v10961_v49  ;;  %v6820_v17 = vadd.f32 %v13657_v3, %v6767_v23  ;;  %v10971_v3 = vld [vmem:[%s14298_s3 + $0x38] sm:$0xff]   ;;  %v11062_v6 = vld [vmem:[%s11272_s26 + $0x180] ss:$132 sps:$4 sm:$0xff]   ;;  %v14332_v23 = vld [vmem:[#allocation4_spill] sm:$0xff] }
 0x320   : > { %9762 = vmatprep.subr.bf16.mxu1 %v10964_v1  ;;  %v6869_v29 = vadd.f32 %v13627_v34, %v6816_v35 }
 0x321   : > { %9681 = vmatpush3.bf16.msra.mxu0 %v10962_v54  ;;  %v6873_v37 = vadd.f32 %v13666_v14, %v6820_v17  ;;  %v6708_v17 = vadd.f32 %v14333_v25, %v6655_v51 }
 0x322   : > { %9682 = vmatprep.subr.bf16.mxu0 %v10963_v28  ;;  %v6922_v14 = vadd.f32 %v13751_v36, %v6869_v29  ;;  %v10977_v28 = vld [vmem:[%s14298_s3 + $0x20] sm:$0xff]  }
 0x323   : > { %9763 = vmatpush3.bf16.msra.mxu1 %v10964_v1  ;;  %v6926_v45 = vadd.f32 %v13773_v18, %v6873_v37  ;;  %v10974_v18 = vld [vmem:[%s14298_s3 + $0x68] sm:$0xff]   ;;  %v6659_v1 = vadd.f32 %v13393_v42, %v6606_v46  ;;  %v14340_v46 = vld [vmem:[#allocation13_spill] sm:$0xff] }
 0x324   : > { %9764 = vmatprep.subr.bf16.mxu1 %v10967_v56  ;;  %v7772_v38 = vmax.f32 %v6922_v14, 0.0 }
 0x325   : > { %9683 = vmatpush3.bf16.msra.mxu0 %v10965_v30  ;;  %v7775_v36 = vmax.f32 %v6926_v45, 0.0  ;;  %v6712_v42 = vadd.f32 %v13505_v24, %v6659_v1  ;;  %v10979_v24 = vld [vmem:[%s14298_s3 + $0x18] sm:$0xff]   ;;  %v14345_v1 = vld [vmem:[#allocation10_spill] sm:$0xff] }
 0x326   : > { %9684 = vmatprep.subr.bf16.mxu0 %v10966_v31  ;;  %v14335_v45 = vld [vmem:[#allocation5_spill] sm:$0xff] }
 0x327   : > { %9765 = vmatpush3.bf16.msra.mxu1 %v10967_v56  ;;  %v7784_v60 = vpack.c.bf16 %v7775_v36, %v7772_v38  ;;  %v14339_v36 = vld [vmem:[#allocation11_spill] sm:$0xff] }
 0x328   : > { %9766 = vmatprep.subr.bf16.mxu1 %v10969_v59 }
 0x329   : > { %9685 = vmatpush3.bf16.msra.mxu0 %v10968_v13  ;;  %v14334_v13 = vld [vmem:[#allocation8_spill] sm:$0xff] }
 0x32a   : > { %9708 = vmatprep.subr.bf16.mxu0 %v10970_v53  ;;  %v6765_v53 = vadd.f32 %v14334_v13, %v6712_v42 }
 0x32b   : > { %9767 = vmatpush3.bf16.msra.mxu1 %v10969_v59  ;;  %v6616_v59 = vadd.f32 %v14332_v23, %v6563_v39  ;;  %v14349_v39 = vld [vmem:[#allocation17_spill] sm:$0xff]  ;;  %v14353_v23 = vld [vmem:[#allocation19_spill] sm:$0xff] }
 0x32c   : > { %v9350_v43 = vpop.f32.mrf.mxu0  ;;  %7706 = vmatmul.mubr.bf16.vlgmr.msra.gmra.mxu0 %v11059_v4  ;;  %v6818_v14 = vadd.f32 %v13638_v19, %v6765_v53  ;;  %v10982_v19 = vld [vmem:[%s14298_s3 + $0x48] sm:$0xff]  }
 0x32d   : > { %9709 = vmatpush3.bf16.msra.mxu0 %v10971_v3  ;;  %7713 = vmatprep.mubr.bf16.mxu0 %v11060_v15  ;;  %v10980_v3 = vld [vmem:[%s14298_s3 + $0x50] sm:$0xff]  }
 0x32e   : > { %v9351_v49 = vpop.f32.mrf.mxu0  ;;  %v9378_v34 = vpop.f32.mrf.mxu1  ;;  %9769 = vmatmul.mubr.bf16.vlgmr.msra.gmra.mxu1 %v11061_v41  ;;  %9710 = vmatprep.subr.bf16.mxu0 %v10972_v55  ;;  %v14338_v41 = vld [vmem:[#allocation3_spill] sm:$0xff] }
 0x32f   : > { %v9352_v26 = vadd.f32 %v9351_v49, %v9350_v43  ;;  %v14336_v43 = vld [vmem:[#allocation7_spill] sm:$0xff]  ;;  %v10981_v49 = vld [vmem:[%s14298_s3 + $0x10] sm:$0xff]  }
 0x330   : > { %v9353_v32 = vpop.f32.mrf.mxu0  ;;  %v9379_v5 = vpop.f32.mrf.mxu1  ;;  %v6761_v4 = vadd.f32 %v14336_v43, %v6708_v17 }
 0x331   : > { %v7120_v12 = vadd.f32 %v9352_v26, %v13914_v10  ;;  %v9380_v47 = vadd.f32 %v9379_v5, %v9378_v34  ;;  %9711 = vmatpush3.bf16.msra.mxu0 %v10973_v21  ;;  %v14337_v34 = vld [vmem:[#allocation2_spill] sm:$0xff] }
 0x332   : > { %v9354_v44 = vpop.f32.mrf.mxu0  ;;  %v9381_v22 = vpop.f32.mrf.mxu1  ;;  %9712 = vmatprep.subr.bf16.mxu0 %v10974_v18  ;;  %v6665_v18 = vadd.f32 %v14338_v41, %v14337_v34 }
 0x333   : > { %v14017_v2 = vadd.f32 %v9380_v47, %v7120_v12  ;;  %v9355_v61 = vadd.f32 %v9354_v44, %v9353_v32  ;;  %v6814_v32 = vadd.f32 %v14340_v46, %v6761_v4  ;;  %v6871_v12 = vadd.f32 %v13649_v20, %v6818_v14  ;;  %v10983_v47 = vld [vmem:[%s14298_s3 + $0x8] sm:$0xff]  }
 0x334   : > { %v9356_v10 = vpop.f32.mrf.mxu0  ;;  %v9382_v50 = vpop.f32.mrf.mxu1  ;;  %7714 = vmatmul.mubr.bf16.gmra.mxu0 %v11062_v6 }
 0x335   : > { %v7123_v33 = vadd.f32 %v9355_v61, %v13932_v9  ;;  %v9383_v54 = vadd.f32 %v9382_v50, %v9381_v22  ;;  %9713 = vmatpush3.bf16.msra.mxu0 %v10975_v58  ;;  %7995 = vmatprep.mubr.bf16.mxu0 %v7784_v60  ;;  %v10978_v9 = vld [vmem:[%s14298_s3 + $0x58] sm:$0xff]   ;;  %v14342_v58 = vld [vmem:[#allocation12_spill] sm:$0xff]  ;;  %v14343_v22 = vld [vmem:[#allocation14_spill] sm:$0xff]  ;;  %v14071_v60 = vadd.f32 %v13762_v62, %v6871_v12 }
 0x336   : > { %v9357_v56 = vpop.f32.mrf.mxu0  ;;  %v9384_v8 = vpop.f32.mrf.mxu1  ;;  %9714 = vmatprep.subr.bf16.mxu0 %v10976_v40  ;;  %v6867_v40 = vadd.f32 %v14343_v22, %v6814_v32  ;;  %v10984_v61 = vld [vmem:[%s14298_s3 + $0x40] sm:$0xff]  }
 0x337   : > { %v14033_v30 = vadd.f32 %v9383_v54, %v7123_v33  ;;  %v9358_v31 = vadd.f32 %v9357_v56, %v9356_v10  ;;  %14344 = vst [vmem:[#allocation4_spill] sm:$0xff] %v14071_v60  ;;  %v14346_v50 = vld [vmem:[#allocation18_spill] sm:$0xff]  ;;  %v14348_v54 = vld [vmem:[#allocation15_spill] sm:$0xff]  ;;  %v14350_v56 = vld [vmem:[#allocation16_spill] sm:$0xff] }
 0x338   : > { %v9359_v7 = vpop.f32.mrf.mxu0  ;;  %v9385_v48 = vpop.f32.mrf.mxu1  ;;  %v14079_v6 = vadd.f32 %v14346_v50, %v6867_v40  ;;  %v10985_v33 = vld [vmem:[%s14298_s3] sm:$0xff]  }
 0x339   : > { %v7128_v57 = vadd.f32 %v9358_v31, %v13949_v0  ;;  %v9386_v11 = vadd.f32 %v9385_v48, %v9384_v8  ;;  %9715 = vmatpush3.bf16.msra.mxu0 %v10977_v28  ;;  %v6669_v0 = vadd.f32 %v14335_v45, %v6616_v59  ;;  %v14306_v28 = vmax.f32 %v14071_v60, 0.0 }
 0x33a   : > { %v9360_v35 = vpop.f32.mrf.mxu0  ;;  %v9387_v37 = vpop.f32.mrf.mxu1  ;;  %9716 = vmatprep.subr.bf16.mxu0 %v10978_v9  ;;  %14347 = vst [vmem:[#allocation6_spill] sm:$0xff] %v14079_v6  ;;  %v14307_v42 = vmax.f32 %v14079_v6, 0.0  ;;  %v14351_v9 = vld [vmem:[#allocation20_spill] sm:$0xff] }
 0x33b   : > { %v14045_v55 = vadd.f32 %v9386_v11, %v7128_v57  ;;  %v9361_v29 = vadd.f32 %v9360_v35, %v9359_v7  ;;  %v6722_v26 = vadd.f32 %v14339_v36, %v6669_v0 }
 0x33c   : > { %v9388_v21 = vpop.f32.mrf.mxu1  ;;  %v7783_v8 = vpack.c.bf16 %v14306_v28, %v14307_v42 }
 0x33d   : > { %v7131_v15 = vadd.f32 %v9361_v29, %v13963_v27  ;;  %v9389_v52 = vadd.f32 %v9388_v21, %v9387_v37  ;;  %9717 = vmatpush3.bf16.msra.mxu0 %v10979_v24  ;;  %v14341_v27 = vld [vmem:[#allocation9_spill] sm:$0xff]  ;;  %v6775_v44 = vadd.f32 %v14342_v58, %v6722_v26 }
 0x33e   : > { %9718 = vmatprep.subr.bf16.mxu0 %v10980_v3  ;;  %v6718_v38 = vadd.f32 %v14341_v27, %v6665_v18  ;;  %v10986_v18 = vld [vmem:[%s14298_s3 + $0x98] sm:$0xff]   ;;  %v10988_v27 = vld [vmem:[%s14298_s3 + $0x88] sm:$0xff]  }
 0x33f   : > { %v14061_v5 = vadd.f32 %v9389_v52, %v7131_v15  ;;  %v6828_v20 = vadd.f32 %v13711_v16, %v6775_v44  ;;  %9772 = vmatprep.subr.bf16.mxu1 %v10986_v18 }
 0x340   : > { %v6771_v10 = vadd.f32 %v14345_v1, %v6718_v38  ;;  %9773 = vmatpush3.bf16.msra.mxu1 %v10986_v18 }
 0x341   : > { %9719 = vmatpush3.bf16.msra.mxu0 %v10981_v49  ;;  %v6881_v51 = vadd.f32 %v14349_v39, %v6828_v20 }
 0x342   : > { %9720 = vmatprep.subr.bf16.mxu0 %v10982_v19  ;;  %v6824_v62 = vadd.f32 %v14348_v54, %v6771_v10 }
 0x343   : > { %v14094_v31 = vadd.f32 %v14351_v9, %v6881_v51 }
 0x344   : > { %v6877_v16 = vadd.f32 %v14350_v56, %v6824_v62 }
 0x345   : > { %9721 = vmatpush3.bf16.msra.mxu0 %v10983_v47  ;;  %14352 = vst [vmem:[#allocation8_spill] sm:$0xff] %v14094_v31  ;;  %v14308_v17 = vmax.f32 %v14094_v31, 0.0  ;;  %v10989_v47 = vld [vmem:[%s14298_s3 + $0x80] sm:$0xff]  }
 0x346   : > { %9722 = vmatprep.subr.bf16.mxu0 %v10984_v61  ;;  %v14097_v59 = vadd.f32 %v14353_v23, %v6877_v16 }
 0x348   : > { %14354 = vst [vmem:[#allocation5_spill] sm:$0xff] %v14097_v59  ;;  %v14305_v11 = vmax.f32 %v14097_v59, 0.0 }
 0x349   : > { %9723 = vmatpush3.bf16.msra.mxu0 %v10985_v33 }
 0x34a   : > { %v7786_v37 = vpack.c.bf16 %v14308_v17, %v14305_v11 }
 0x34c   : > { %v9406_v25 = vpop.f32.mrf.mxu0  ;;  %7996 = vmatmul.mubr.bf16.vlgmr.msra.gmra.mxu0 %v7783_v8 }
 0x34d   : > { %8003 = vmatprep.mubr.bf16.mxu0 %v13835_v63 }
 0x34e   : > { %v9407_v7 = vpop.f32.mrf.mxu0  ;;  %v9434_v48 = vpop.f32.mrf.mxu1 }
 0x34f   : > { %v9408_v57 = vadd.f32 %v9407_v7, %v9406_v25 }
 0x350   : > { %v14102_v24 = vpop.f32.mrf.mxu0  ;;  %v9435_v13 = vpop.f32.mrf.mxu1 }
 0x351   : > { %v7218_v53 = vadd.f32 %v9408_v57, %v14017_v2  ;;  %v9436_v35 = vadd.f32 %v9435_v13, %v9434_v48 }
 0x352   : > { %v14109_v3 = vpop.f32.mrf.mxu0  ;;  %v14111_v63 = vpop.f32.mrf.mxu1 }
 0x353   : > { %v14113_v29 = vadd.f32 %v9436_v35, %v7218_v53  ;;  %v9411_v31 = vadd.f32 %v14109_v3, %v14102_v24 }
 0x354   : > { %v9412_v45 = vpop.f32.mrf.mxu0  ;;  %v14115_v0 = vpop.f32.mrf.mxu1  ;;  %8004 = vmatmul.mubr.bf16.gmra.mxu0 %v7786_v37 }
 0x356   : > { %v9413_v43 = vpop.f32.mrf.mxu0  ;;  %v9440_v4 = vpop.f32.mrf.mxu1 }
 0x357   : > { %v9414_v14 = vadd.f32 %v9413_v43, %v9412_v45 }
 0x358   : > { %v9441_v2 = vpop.f32.mrf.mxu1  ;;  %v14120_v49 = vpop.f32.mrf.mxu0 }
 0x359   : > { %v7226_v21 = vadd.f32 %v9414_v14, %v14045_v55  ;;  %v9442_v15 = vadd.f32 %v9441_v2, %v9440_v4  ;;  %v10987_v55 = vld [vmem:[%s14298_s3 + $0x90] sm:$0xff]  }
 0x35a   : > { %v14122_v34 = vpop.f32.mrf.mxu1  ;;  %v14124_v41 = vpop.f32.mrf.mxu0  ;;  %9774 = vmatprep.subr.bf16.mxu1 %v10987_v55 }
 0x35b   : > { %v14118_v52 = vadd.f32 %v9442_v15, %v7226_v21  ;;  %9775 = vmatpush3.bf16.msra.mxu1 %v10987_v55  ;;  %v9417_v24 = vadd.f32 %v14124_v41, %v14120_v49 }
 0x35c   : > { %v14129_v36 = vpop.f32.mrf.mxu1  ;;  %9776 = vmatprep.subr.bf16.mxu1 %v10988_v27 }
 0x35f   : > { %9777 = vmatpush3.bf16.msra.mxu1 %v10988_v27 }
 0x360   : > { %9778 = vmatprep.subr.bf16.mxu1 %v10989_v47 }
 0x363   : > { %9779 = vmatpush3.bf16.msra.mxu1 %v10989_v47 }
 0x36c   : > { %v14131_v26 = vpop.f32.mrf.mxu0 }
 0x36e   : > { %v14133_v46 = vpop.f32.mrf.mxu1  ;;  %v9463_v32 = vpop.f32.mrf.mxu0 }
 0x370   : > { %v14138_v19 = vpop.f32.mrf.mxu1  ;;  %v9465_v38 = vpop.f32.mrf.mxu0 }
 0x372   : > { %v14143_v12 = vpop.f32.mrf.mxu1  ;;  %v9466_v58 = vpop.f32.mrf.mxu0 }
 0x374   : > { %v14148_v44 = vpop.f32.mrf.mxu1  ;;  %v9468_v22 = vpop.f32.mrf.mxu0 }
 0x376   : > { %v14150_v40 = vpop.f32.mrf.mxu1  ;;  %v9469_v61 = vpop.f32.mrf.mxu0 }
 0x378   : > { %v14152_v1 = vpop.f32.mrf.mxu1  ;;  %v14154_v10 = vpop.f32.mrf.mxu0 }
 0x37a   : > { %v14156_v20 = vpop.f32.mrf.mxu1  ;;  %v14158_v50 = vpop.f32.mrf.mxu0 }
 0x37c   : > { %v14160_v33 = vpop.f32.mrf.mxu1 }
 0x38c   : > { %v9518_v54 = vpop.f32.mrf.mxu0 }
 0x38e   : > { %v9546_v62 = vpop.f32.mrf.mxu1  ;;  %v9519_v39 = vpop.f32.mrf.mxu0 }
 0x390   : > { %v9547_v51 = vpop.f32.mrf.mxu1  ;;  %v9521_v56 = vpop.f32.mrf.mxu0 }
 0x392   : > { %v14162_v16 = vpop.f32.mrf.mxu1  ;;  %v9522_v8 = vpop.f32.mrf.mxu0 }
 0x394   : > { %v14164_v9 = vpop.f32.mrf.mxu1  ;;  %v9524_v23 = vpop.f32.mrf.mxu0 }
 0x396   : > { %v14166_v25 = vpop.f32.mrf.mxu1  ;;  %v9525_v7 = vpop.f32.mrf.mxu0 }
 0x398   : > { %v14168_v48 = vpop.f32.mrf.mxu1  ;;  %v14170_v57 = vpop.f32.mrf.mxu0 }
 0x39a   : > { %v14172_v13 = vpop.f32.mrf.mxu1  ;;  %v14174_v53 = vpop.f32.mrf.mxu0 }
 0x39b   : > { %14355 = vst [vmem:[#allocation7_spill] sm:$0xff] %v14172_v13 }
 0x39c   : > { %v14176_v35 = vpop.f32.mrf.mxu1 }
 0x39d   : > { %14356 = vst [vmem:[#allocation2_spill] sm:$0xff] %v14176_v35 }
 0x3ac   : > { %v9574_v37 = vpop.f32.mrf.mxu0 }
 0x3ae   : > { %v9602_v45 = vpop.f32.mrf.mxu1  ;;  %v9575_v43 = vpop.f32.mrf.mxu0 }
 0x3af   : > { %v9576_v41 = vadd.f32 %v9575_v43, %v9574_v37 }
 0x3b0   : > { %v9603_v4 = vpop.f32.mrf.mxu1  ;;  %v9577_v14 = vpop.f32.mrf.mxu0 }
 0x3b2   : > { %v14178_v2 = vpop.f32.mrf.mxu1  ;;  %v9578_v21 = vpop.f32.mrf.mxu0 }
 0x3b3   : > { %14357 = vst [vmem:[#allocation3_spill] sm:$0xff] %v14178_v2 }
 0x3b4   : > { %v14180_v15 = vpop.f32.mrf.mxu1  ;;  %v9580_v18 = vpop.f32.mrf.mxu0 }
 0x3b5   : > { %14358 = vst [vmem:[#allocation11_spill] sm:$0xff] %v14180_v15 }
 0x3b6   : > { %v14182_v55 = vpop.f32.mrf.mxu1  ;;  %v9581_v27 = vpop.f32.mrf.mxu0 }
 0x3b7   : > { %14359 = vst [vmem:[#allocation13_spill] sm:$0xff] %v14182_v55  ;;  %v9464_v55 = vadd.f32 %v9463_v32, %v14131_v26  ;;  %v9520_v26 = vadd.f32 %v9519_v39, %v9518_v54  ;;  %v9470_v32 = vadd.f32 %v9469_v61, %v9468_v22  ;;  %v9554_v39 = vadd.f32 %v14168_v48, %v14166_v25 }
 0x3b8   : > { %v14184_v47 = vpop.f32.mrf.mxu1  ;;  %v14186_v11 = vpop.f32.mrf.mxu0 }
 0x3b9   : > { %14360 = vst [vmem:[#allocation9_spill] sm:$0xff] %v14184_v47  ;;  %14361 = vst [vmem:[#allocation12_spill] sm:$0xff] %v14186_v11  ;;  %v7221_v47 = vadd.f32 %v9411_v31, %v14033_v30  ;;  %v7324_v49 = vadd.f32 %v9470_v32, %v14118_v52  ;;  %v9501_v52 = vadd.f32 %v14160_v33, %v14156_v20 }
 0x3ba   : > { %v14188_v28 = vpop.f32.mrf.mxu1  ;;  %v14190_v42 = vpop.f32.mrf.mxu0  ;;  %v14366_v20 = vld [vmem:[#allocation3_spill] sm:$0xff] }
 0x3bb   : > { %14362 = vst [vmem:[#allocation14_spill] sm:$0xff] %v14188_v28  ;;  %14363 = vst [vmem:[#allocation10_spill] sm:$0xff] %v14190_v42  ;;  %v9439_v28 = vadd.f32 %v14115_v0, %v14111_v63  ;;  %v9492_v42 = vadd.f32 %v14138_v19, %v14133_v46  ;;  %v9495_v63 = vadd.f32 %v14148_v44, %v14143_v12 }
 0x3bc   : > { %v14192_v17 = vpop.f32.mrf.mxu1  ;;  %v7229_v0 = vadd.f32 %v9417_v24, %v14061_v5  ;;  %v9526_v5 = vadd.f32 %v9525_v7, %v9524_v23  ;;  %v14367_v33 = vld [vmem:[#allocation11_spill] sm:$0xff] }
 0x3bd   : > { %14364 = vst [vmem:[#allocation18_spill] sm:$0xff] %v14192_v17  ;;  %v7316_v17 = vadd.f32 %v9464_v55, %v14113_v29  ;;  %v7270_v15 = vadd.f32 %v9439_v28, %v7221_v47  ;;  %v9445_v29 = vadd.f32 %v14129_v36, %v14122_v34  ;;  %v9498_v28 = vadd.f32 %v14152_v1, %v14150_v40 }
 0x3be   : > { %v9551_v36 = vadd.f32 %v14164_v9, %v14162_v16  ;;  %v9582_v9 = vadd.f32 %v9581_v27, %v9580_v18 }
 0x3bf   : > { %v7365_v30 = vadd.f32 %v9492_v42, %v7316_v17  ;;  %v7278_v12 = vadd.f32 %v9445_v29, %v7229_v0  ;;  %v7373_v61 = vadd.f32 %v9498_v28, %v7324_v49 }
 0x3c1   : > { %v7414_v19 = vadd.f32 %v9520_v26, %v7365_v30  ;;  %v14373_v30 = vld [vmem:[#allocation12_spill] sm:$0xff] }
 0x3cc   : > { %v9630_v59 = vpop.f32.mrf.mxu0 }
 0x3ce   : > { %v14194_v60 = vpop.f32.mrf.mxu1  ;;  %v9631_v6 = vpop.f32.mrf.mxu0 }
 0x3cf   : > { %14365 = vst [vmem:[#allocation15_spill] sm:$0xff] %v14194_v60  ;;  %v9467_v60 = vadd.f32 %v9466_v58, %v9465_v38  ;;  %v9548_v38 = vadd.f32 %v9547_v51, %v9546_v62  ;;  %v9523_v58 = vadd.f32 %v9522_v8, %v9521_v56  ;;  %v9604_v62 = vadd.f32 %v9603_v4, %v9602_v45 }
 0x3d0   : > { %v9659_v35 = vpop.f32.mrf.mxu1  ;;  %v9633_v13 = vpop.f32.mrf.mxu0  ;;  %v9529_v51 = vadd.f32 %v14174_v53, %v14170_v57  ;;  %v9632_v23 = vadd.f32 %v9631_v6, %v9630_v59  ;;  %v14371_v6 = vld [vmem:[#allocation13_spill] sm:$0xff] }
 0x3d1   : > { %v7319_v31 = vadd.f32 %v9467_v60, %v7270_v15  ;;  %v9473_v60 = vadd.f32 %v14158_v50, %v14154_v10  ;;  %v7463_v22 = vadd.f32 %v9548_v38, %v7414_v19  ;;  %v9579_v10 = vadd.f32 %v9578_v21, %v9577_v14  ;;  %v14368_v14 = vld [vmem:[#allocation7_spill] sm:$0xff]  ;;  %v14369_v21 = vld [vmem:[#allocation2_spill] sm:$0xff]  ;;  %v14372_v59 = vld [vmem:[#allocation9_spill] sm:$0xff] }
 0x3d2   : > { %v14202_v11 = vpop.f32.mrf.mxu1  ;;  %v9634_v3 = vpop.f32.mrf.mxu0  ;;  %v7422_v50 = vadd.f32 %v9526_v5, %v7373_v61  ;;  %v9607_v15 = vadd.f32 %v14367_v33, %v14366_v20  ;;  %v9557_v55 = vadd.f32 %v14369_v21, %v14368_v14  ;;  %v9610_v18 = vadd.f32 %v14372_v59, %v14371_v6 }
 0x3d3   : > { %v7368_v17 = vadd.f32 %v9495_v63, %v7319_v31  ;;  %v7327_v54 = vadd.f32 %v9473_v60, %v7278_v12  ;;  %v7512_v1 = vadd.f32 %v9576_v41, %v7463_v22  ;;  %v9635_v53 = vadd.f32 %v9634_v3, %v9633_v13  ;;  %v14374_v31 = vld [vmem:[#allocation10_spill] sm:$0xff] }
 0x3d4   : > { %v9662_v2 = vpop.f32.mrf.mxu1  ;;  %v9636_v46 = vpop.f32.mrf.mxu0  ;;  %v7471_v45 = vadd.f32 %v9554_v39, %v7422_v50  ;;  %v9585_v63 = vadd.f32 %v14374_v31, %v14373_v30  ;;  %v14375_v41 = vld [vmem:[#allocation14_spill] sm:$0xff] }
 0x3d5   : > { %v7417_v34 = vadd.f32 %v9523_v58, %v7368_v17  ;;  %v7376_v16 = vadd.f32 %v9501_v52, %v7327_v54  ;;  %v7561_v37 = vadd.f32 %v9604_v62, %v7512_v1  ;;  %v9663_v28 = vadd.f32 %v9662_v2, %v14202_v11  ;;  %v14376_v12 = vld [vmem:[#allocation18_spill] sm:$0xff] }
 0x3d6   : > { %v9664_v42 = vpop.f32.mrf.mxu1  ;;  %v9637_v44 = vpop.f32.mrf.mxu0  ;;  %v14370_v47 = vld [vmem:[#allocation15_spill] sm:$0xff]  ;;  %v7520_v24 = vadd.f32 %v9582_v9, %v7471_v45  ;;  %v9613_v5 = vadd.f32 %v14376_v12, %v14375_v41  ;;  %v9213_v30 = vld [vmem:[%s14299_s4] ss:$0 sm:$0xff] }
 0x3d7   : > { %v7466_v8 = vadd.f32 %v9551_v36, %v7417_v34  ;;  %v7425_v4 = vadd.f32 %v9529_v51, %v7376_v16  ;;  %v7610_v48 = vadd.f32 %v9632_v23, %v7561_v37  ;;  %v9660_v57 = vadd.f32 %v9659_v35, %v14370_v47 }
 0x3d8   : > { %v9665_v40 = vpop.f32.mrf.mxu1  ;;  %v9639_v56 = vpop.f32.mrf.mxu0  ;;  %v9638_v29 = vadd.f32 %v9637_v44, %v9636_v46  ;;  %v7569_v13 = vadd.f32 %v9610_v18, %v7520_v24 }
 0x3d9   : > { %v7515_v43 = vadd.f32 %v9579_v10, %v7466_v8  ;;  %v7474_v0 = vadd.f32 %v9557_v55, %v7425_v4  ;;  %v7659_v58 = vadd.f32 %v9660_v57, %v7610_v48  ;;  %v9666_v36 = vadd.f32 %v9665_v40, %v9664_v42 }
 0x3da   : > { %v9667_v7 = vpop.f32.mrf.mxu1  ;;  %v9640_v25 = vpop.f32.mrf.mxu0  ;;  %v7618_v34 = vadd.f32 %v9638_v29, %v7569_v13 }
 0x3db   : > { %v7564_v32 = vadd.f32 %v9607_v15, %v7515_v43  ;;  %v7523_v17 = vadd.f32 %v9585_v63, %v7474_v0  ;;  %v9641_v44 = vadd.f32 %v9640_v25, %v9639_v56  ;;  %v10991_v25 = vld [vmem:[%s14300_s5] sm:$0xff]  }
 0x3dc   : > { %v9668_v27 = vpop.f32.mrf.mxu1  ;;  %v7667_v50 = vadd.f32 %v9666_v36, %v7618_v34  ;;  %v10992_v36 = vld [vmem:[%s14302_s7 + $0x18] sm:$0xff]  }
 0x3dd   : > { %v7613_v49 = vadd.f32 %v9635_v53, %v7564_v32  ;;  %v7572_v10 = vadd.f32 %v9613_v5, %v7523_v17  ;;  %v9669_v8 = vadd.f32 %v9668_v27, %v9667_v7  ;;  %v10990_v7 = vld [vmem:[%s14300_s5 + $0x8] sm:$0xff]  }
 0x3de   : > { %9784 = vmatprep.subr.bf16.mxu1 %v10990_v7 }
 0x3df   : > { %v7662_v46 = vadd.f32 %v9663_v28, %v7613_v49  ;;  %v7621_v51 = vadd.f32 %v9641_v44, %v7572_v10  ;;  %v9236_v44 = vld [vmem:[%s14301_s6] ss:$0 sm:$0xff] }
 0x3e1   : > { %v7670_v20 = vadd.f32 %v9669_v8, %v7621_v51 }
 0x3ec   : > { %v9686_v26 = vpop.f32.mrf.mxu0 }
 0x3ee   : > { %v9687_v19 = vpop.f32.mrf.mxu0  ;;  %v9770_v38 = vpop.f32.mrf.mxu1 }
 0x3ef   : > { %v9688_v35 = vadd.f32 %v9687_v19, %v9686_v26 }
 0x3f0   : > { %v9689_v3 = vpop.f32.mrf.mxu0  ;;  %v7756_v60 = vpop.f32.mrf.mxu1 }
 0x3f1   : > { %v7708_v22 = vadd.f32 %v9688_v35, %v7659_v58 }
 0x3f2   : > { %v9690_v61 = vpop.f32.mrf.mxu0  ;;  %v9771_v54 = vpop.f32.mrf.mxu1 }
 0x3f3   : > { %v9691_v52 = vadd.f32 %v9690_v61, %v9689_v3  ;;  %v7757_v11 = vadd.f32 %v7756_v60, %v7708_v22  ;;  %v10993_v61 = vld [vmem:[%s14302_s7 + $0x10] sm:$0xff]  }
 0x3f4   : > { %v9692_v1 = vpop.f32.mrf.mxu0  ;;  %v7759_v62 = vpop.f32.mrf.mxu1 }
 0x3f5   : > { %v7711_v2 = vadd.f32 %v9691_v52, %v7662_v46  ;;  %v7773_v37 = vmax.f32 %v7757_v11, 0.0  ;;  %v10995_v46 = vld [vmem:[%s14302_s7] sm:$0xff]  }
 0x3f6   : > { %v9693_v39 = vpop.f32.mrf.mxu0 }
 0x3f7   : > { %v9694_v23 = vadd.f32 %v9693_v39, %v9692_v1  ;;  %v7760_v16 = vadd.f32 %v7759_v62, %v7711_v2 }
 0x3f8   : > { %v9695_v9 = vpop.f32.mrf.mxu0 }
 0x3f9   : > { %v7716_v43 = vadd.f32 %v9694_v23, %v7667_v50  ;;  %v7776_v42 = vmax.f32 %v7760_v16, 0.0 }
 0x3fa   : > { %v9696_v40 = vpop.f32.mrf.mxu0 }
 0x3fb   : > { %v7785_v56 = vpack.c.bf16 %v7776_v42, %v7773_v37  ;;  %v9697_v33 = vadd.f32 %v9696_v40, %v9695_v9  ;;  %v7765_v15 = vadd.f32 %v9770_v38, %v7716_v43  ;;  %v14377_v42 = vld [vmem:[#allocation8_spill] sm:$0xff] }
 0x3fc   : > { %v14378_v40 = vmax.f32 %v14377_v42, 0.0 }
 0x3fd   : > { %v7719_v45 = vadd.f32 %v9697_v33, %v7670_v20  ;;  %9780 = vmatprep.mubr.msk.bf16.mxu1 %vm7956_vm0, %v7785_v56  ;;  %v7779_v14 = vmax.f32 %v7765_v15, 0.0  ;;  %v14379_v33 = vld [vmem:[#allocation6_spill] sm:$0xff] }
 0x3fe   : > { %v14380_v15 = vmax.f32 %v14379_v33, 0.0 }
 0x3ff   : > { %v7768_v4 = vadd.f32 %v9771_v54, %v7719_v45  ;;  %v10994_v54 = vld [vmem:[%s14302_s7 + $0x8] sm:$0xff]  }
 0x401   : > { %v7782_v21 = vmax.f32 %v7768_v4, 0.0  ;;  %v14381_v4 = vld [vmem:[#allocation4_spill] sm:$0xff] }
 0x403   : > { %v7788_v55 = vpack.c.bf16 %v7782_v21, %v7779_v14  ;;  %v14382_v14 = vmax.f32 %v14381_v4, 0.0 }
 0x405   : > { %9781 = vmatmul.mubr.msk.bf16.vlgmr.msra.gmra.mxu1 %vm7956_vm0, %v7788_v55  ;;  %v14383_v55 = vld [vmem:[#allocation5_spill] sm:$0xff] }
 0x406   : > { %9785 = vmatpush3.bf16.msra.mxu1 %v10990_v7  ;;  %v14384_v7 = vmax.f32 %v14383_v55, 0.0 }
 0x407   : > { %9786 = vmatprep.subr.bf16.mxu1 %v10991_v25 }
 0x40a   : > { %9787 = vmatpush3.bf16.msra.mxu1 %v10991_v25 }
 0x40b   : > { %9792 = vmatprep.subr.bf16.mxu1 %v10992_v36 }
 0x40c   : > { %v9724_v48 = vpop.f32.mrf.mxu0 }
 0x40e   : > { %v9725_v47 = vpop.f32.mrf.mxu0 }
 0x40f   : > { %v9726_v27 = vadd.f32 %v9725_v47, %v9724_v48 }
 0x410   : > { %v9727_v57 = vpop.f32.mrf.mxu0 }
 0x411   : > { %v7998_v29 = vadd.f32 %v9726_v27, %v9213_v30 }
 0x412   : > { %v9728_v53 = vpop.f32.mrf.mxu0 }
 0x413   : > { %v9729_v63 = vadd.f32 %v9728_v53, %v9727_v57  ;;  %v9241_v53 = vld [vmem:[%s14303_s8] ss:$0 sm:$0xff] }
 0x414   : > { %v9730_v24 = vpop.f32.mrf.mxu0 }
 0x415   : > { %v8001_v35 = vadd.f32 %v9729_v63, %v9213_v30 }
 0x416   : > { %v9731_v6 = vpop.f32.mrf.mxu0 }
 0x417   : > { %v9732_v32 = vadd.f32 %v9731_v6, %v9730_v24 }
 0x418   : > { %v9733_v59 = vpop.f32.mrf.mxu0 }
 0x419   : > { %v8006_v38 = vadd.f32 %v9732_v32, %v9213_v30 }
 0x41a   : > { %v9734_v18 = vpop.f32.mrf.mxu0 }
 0x41b   : > { %v9735_v26 = vadd.f32 %v9734_v18, %v9733_v59 }
 0x41d   : > { %v8009_v19 = vadd.f32 %v9735_v26, %v9213_v30 }
 0x4c5   : > { %v9782_v31 = vpop.f32.mrf.mxu1 }
 0x4c6   : > { %v8055_v13 = vadd.f32 %v9782_v31, %v8006_v38 }
 0x4c7   : > { %v8046_v0 = vpop.f32.mrf.mxu1 }
 0x4c8   : > { %v8047_v49 = vadd.f32 %v8046_v0, %v7998_v29  ;;  %v8063_v5 = vmax.f32 %v8055_v13, 0.0 }
 0x4c9   : > { %v9783_v58 = vpop.f32.mrf.mxu1 }
 0x4ca   : > { %v8058_v28 = vadd.f32 %v9783_v58, %v8009_v19  ;;  %v8061_v41 = vmax.f32 %v8047_v49, 0.0 }
 0x4cb   : > { %v8049_v3 = vpop.f32.mrf.mxu1 }
 0x4cc   : > { %v8050_v60 = vadd.f32 %v8049_v3, %v8001_v35  ;;  %v8064_v17 = vmax.f32 %v8058_v28, 0.0 }
 0x4ce   : > { %v8062_v12 = vmax.f32 %v8050_v60, 0.0  ;;  %v8066_v34 = vpack.c.bf16 %v8064_v17, %v8063_v5 }
 0x4d0   : > { %v8065_v22 = vpack.c.bf16 %v8062_v12, %v8061_v41 }
 0x4d2   : > { %9788 = vmatprep.mubr.msk.bf16.mxu1 %vm8090_vm1, %v8065_v22 }
 0x4d3   : > { %9789 = vmatmul.mubr.msk.bf16.vlgmr.msra.gmra.mxu1 %vm8090_vm1, %v8066_v34 }
 0x4d4   : > { %9793 = vmatpush3.bf16.msra.mxu1 %v10992_v36 }
 0x4d5   : > { %9794 = vmatprep.subr.bf16.mxu1 %v10993_v61 }
 0x4d8   : > { %9795 = vmatpush3.bf16.msra.mxu1 %v10993_v61 }
 0x4d9   : > { %9796 = vmatprep.subr.bf16.mxu1 %v10994_v54 }
 0x4dc   : > { %9797 = vmatpush3.bf16.msra.mxu1 %v10994_v54 }
 0x4dd   : > { %9798 = vmatprep.subr.bf16.mxu1 %v10995_v46 }
 0x4e0   : > { %9799 = vmatpush3.bf16.msra.mxu1 %v10995_v46 }
 0x593   : > { %v9790_v52 = vpop.f32.mrf.mxu1 }
 0x594   : > { %v8140_v1 = vadd.f32 %v9790_v52, %v9236_v44 }
 0x595   : > { %v8131_v62 = vpop.f32.mrf.mxu1 }
 0x596   : > { %v8148_v10 = vmax.f32 %v8140_v1, 0.0  ;;  %v8132_v11 = vadd.f32 %v9236_v44, %v8131_v62 }
 0x597   : > { %v9791_v2 = vpop.f32.mrf.mxu1 }
 0x598   : > { %v8146_v50 = vmax.f32 %v8132_v11, 0.0  ;;  %v8143_v39 = vadd.f32 %v9791_v2, %v9236_v44  ;;  %8158 = vrot.lane.b32.xlu1 %v8148_v10, %s11072_s14 }
 0x599   : > { %v8134_v51 = vpop.f32.mrf.mxu1 }
 0x59a   : > { %v8149_v8 = vmax.f32 %v8143_v39, 0.0  ;;  %v8135_v23 = vadd.f32 %v9236_v44, %v8134_v51  ;;  %8154 = vrot.lane.b32.xlu0 %v8146_v50, %s11072_s14 }
 0x59c   : > { %v8147_v16 = vmax.f32 %v8135_v23, 0.0  ;;  %8160 = vrot.lane.b32.xlu1 %v8149_v8, %s11072_s14 }
 0x59e   : > { %8156 = vrot.lane.b32.xlu0 %v8147_v16, %s11072_s14 }
 0x60a   : > { %v8159_v9 = vpop.permute.xlu1 %8158 }
 0x60b   : > { %v8168_v25 = vsel %vm8090_vm1, %v14384_v7, %v8159_v9 }
 0x60c   : > { %v8155_v37 = vpop.permute.xlu0 %8154 }
 0x60d   : > { %v8166_v45 = vsel %vm8090_vm1, %v14380_v15, %v8155_v37 }
 0x60e   : > { %v8161_v43 = vpop.permute.xlu1 %8160 }
 0x60f   : > { %v8169_v20 = vsel %vm8090_vm1, %v14378_v40, %v8161_v43 }
 0x610   : > { %v8157_v56 = vpop.permute.xlu0 %8156  ;;  %v8171_v47 = vpack.c.bf16 %v8169_v20, %v8168_v25 }
 0x611   : > { %v8167_v21 = vsel %vm8090_vm1, %v14382_v14, %v8157_v56 }
 0x612   : > { %v8170_v48 = vpack.c.bf16 %v8167_v21, %v8166_v45 }
 0x614   : > { %9800 = vmatprep.mubr.msk.bf16.mxu1 %vm7956_vm0, %v8170_v48 }
 0x615   : > { %9801 = vmatmul.mubr.msk.bf16.vlgmr.msra.gmra.mxu1 %vm7956_vm0, %v8171_v47 }
 0x6d5   : > { %v9802_v57 = vpop.f32.mrf.mxu1 }
 0x6d6   : > { %v8260_v27 = vadd.f32 %v9802_v57, %v9241_v53 }
 0x6d7   : > { %v8251_v24 = vpop.f32.mrf.mxu1 }
 0x6d8   : > { %v8252_v6 = vadd.f32 %v9241_v53, %v8251_v24 }
 0x6d9   : > { %v9803_v59 = vpop.f32.mrf.mxu1 }
 0x6da   : > { %8270 = vrot.lane.b32.xlu0 %v8252_v6, %s11073_s17  ;;  %v8263_v32 = vadd.f32 %v9803_v59, %v9241_v53 }
 0x6db   : > { %v8254_v18 = vpop.f32.mrf.mxu1 }
 0x6dc   : > { %v8255_v26 = vadd.f32 %v9241_v53, %v8254_v18 }
 0x6de   : > { %8272 = vrot.lane.b32.xlu1 %v8255_v26, %s11073_s17  ;;  %8274 = vrot.lane.b32.xlu0 %v8260_v27, %s11073_s17 }
 0x6e2   : > { %8276 = vrot.lane.b32.xlu1 %v8263_v32, %s11073_s17 }
 0x74c   : > { %v8271_v30 = vpop.permute.xlu0 %8270 }
 0x74d   : > { %v8282_v31 = vsel %vm7956_vm0, %v8166_v45, %v8271_v30 }
 0x74e   : > { %8286 = vst [vmem:[%s337_s10] sm:$0xff] %v8282_v31 }
 0x750   : > { %v8273_v63 = vpop.permute.xlu1 %8272  ;;  %v8275_v0 = vpop.permute.xlu0 %8274 }
 0x751   : > { %v8283_v29 = vsel %vm7956_vm0, %v8167_v21, %v8273_v63  ;;  %v8284_v19 = vsel %vm7956_vm0, %v8168_v25, %v8275_v0 }
 0x752   : > { %8287 = vst [vmem:[%s337_s10 + $0x8] sm:$0xff] %v8283_v29  ;;  %8288 = vst [vmem:[%s337_s10 + $0x10] sm:$0xff] %v8284_v19 }
 0x754   : > { %v8277_v38 = vpop.permute.xlu1 %8276 }
 0x755   : > { %v8285_v58 = vsel %vm7956_vm0, %v8169_v20, %v8277_v38 }
 0x756   : > { %8289 = vst [vmem:[%s337_s10 + $0x18] sm:$0xff] %v8285_v58 }
 0x757 PF: > { %s19_s30 = sadd.s32 1, %s11069_s30  }
 0x758   : > { %p16_p4 = scmp.ge.s32.totalorder %s19_s30, 4  }
 0x75a   :  { %18 = sbr.rel (!%p16_p4) target bundleno = 1 (0x1), region = 86 }

</bundles_post_ra>
